<compile_context>
chip_gen: v7x
topology: tpu7x:2x2x1
jax: 0.10.0
libtpu: 0.0.40
codegen_flags: <defaults>
</compile_context>

<pallas_src>
import functools

import jax
import jax.numpy as jnp
from jax.experimental import pallas as pl
from jax.experimental.pallas import tpu as pltpu


def _unary_density_kernel(x_ref, w1_ref, b1_ref, w2_ref, b2_ref,
                          w3_ref, b3_ref, o_ref, *, minn):
    # x_ref: (tile_m, d_in) f32 batch tile (natural layout).
    # w1_ref: (d_in, 64) bf16, w2_ref: (64, 64) bf16 -> single-pass MXU.
    # b1_ref/b2_ref/w3_ref: (1, 64) f32.  b3_ref: (1, 1) f32 in SMEM.
    x = x_ref[...].astype(jnp.bfloat16)
    # Layer 1: Linear(d_in -> 64) + ReLU (bf16 operands, f32 accumulation).
    h = jnp.dot(x, w1_ref[...], preferred_element_type=jnp.float32)
    h = jnp.maximum(h + b1_ref[...], 0.0)
    # Layer 2 (n_hidden = 1): Linear(64 -> 64) + ReLU.
    h = jnp.dot(h.astype(jnp.bfloat16), w2_ref[...],
                preferred_element_type=jnp.float32)
    h = jnp.maximum(h + b2_ref[...], 0.0)
    # Layer 3: Linear(64 -> 1) + Sigmoid, off the MXU: f32 VPU multiply by the
    # weight row + lane (XLU) reduction -> (tile_m, 1).
    z = jnp.sum(h * w3_ref[...], axis=-1, keepdims=True) + b3_ref[0, 0]
    out = jax.nn.sigmoid(z)
    # out = out * (1 - minn) + minn
    o_ref[...] = (out * (1.0 - minn) + minn).astype(o_ref.dtype)


def _tensorcores_per_chip():
    """Best-effort TensorCores-per-chip count (perf heuristic only).

    v5e/v6e expose one TensorCore to a Pallas grid; v4/v5p/v7x expose two
    ("megacore").  Misdetection only changes tiling, never correctness.
    """
    try:
        kind = jax.devices()[0].device_kind.lower()
    except Exception:  # defensive: never fail the wrapper on a device query
        return 1
    return 2 if any(tag in kind for tag in ("v7", "7x", "v4", "v5p")) else 1


def _pick_batch_tiling(B, tm, n_tc):
    """Pick (tile_m, grid_n) for the batch axis.

    Single-TC chips: one grid step whenever the batch fits in `tm` (the
    ~0.35us per-step cost is a big fraction of this kernel's wall time).
    2-TC chips: round the tile count up to a multiple of the TC count so the
    "parallel" grid axis splits evenly across TensorCores.
    """
    gran = 8                                    # f32 sublane granule
    max_rows = max(gran, (tm // gran) * gran)   # tile cap, multiple of 8
    if n_tc <= 1 and B <= max_rows:
        return B, 1                             # single full-extent tile
    n_tiles = max(n_tc, pl.cdiv(B, max_rows))
    if n_tc > 1:
        n_tiles = n_tc * pl.cdiv(n_tiles, n_tc)
    tile_m = gran * pl.cdiv(pl.cdiv(B, n_tiles), gran)
    grid_n = pl.cdiv(B, tile_m)
    if grid_n == 1:
        tile_m = B                              # full-extent block, no padding
    return tile_m, grid_n


def unary_density(x, params, *, minn=0.005, tm=4096):
    """x: (B, particle_size + in_features) float32. Returns (B, 1) float32."""
    w1, b1, w2, b2, w3, b3 = params             # (in, out) weights, (1, out) biases
    x = x.astype(jnp.float32)
    B, d_in = x.shape
    n_feat = w1.shape[1]

    n_tc = _tensorcores_per_chip()
    tile_m, grid_n = _pick_batch_tiling(B, tm, n_tc)

    # Tiny parameter tensors: bf16 matmul weights (cast once on the host),
    # f32 biases / final weight row, scalar final bias for SMEM.
    w1b = w1.astype(jnp.bfloat16)                       # (d_in, 64)
    w2b = w2.astype(jnp.bfloat16)                       # (64, 64)
    b1r = b1.reshape(1, n_feat).astype(jnp.float32)
    b2r = b2.reshape(1, n_feat).astype(jnp.float32)
    w3r = w3.reshape(1, n_feat).astype(jnp.float32)     # (64, 1) -> (1, 64) row
    b3s = b3.reshape(1, 1).astype(jnp.float32)

    kernel = functools.partial(_unary_density_kernel, minn=minn)
    resident = lambda a: pl.BlockSpec(a.shape, lambda i: (0, 0))

    return pl.pallas_call(
        kernel,
        out_shape=jax.ShapeDtypeStruct((B, 1), jnp.float32),
        grid_spec=pltpu.PrefetchScalarGridSpec(
            num_scalar_prefetch=0,
            grid=(grid_n,),
            in_specs=[
                pl.BlockSpec((tile_m, d_in), lambda i: (i, 0)),    # x batch tile
                resident(w1b), resident(b1r),                      # layer 1
                resident(w2b), resident(b2r),                      # layer 2
                resident(w3r),                                     # layer 3 weight
                pl.BlockSpec(memory_space=pltpu.MemorySpace.SMEM), # b3 scalar
            ],
            out_specs=pl.BlockSpec((tile_m, 1), lambda i: (i, 0)),
        ),
        compiler_params=pltpu.CompilerParams(
            dimension_semantics=("parallel",)),
    )(x, w1b, b1r, w2b, b2r, w3r, b3s)


def init_params(key, particle_size=2, in_features=64, n_features=64):
    """Deterministic PyTorch-Linear-style init (uniform +-1/sqrt(fan_in)).

    Weights are (in_dim, out_dim) (torch weight transposed); biases (1, out).
    """
    d_in = particle_size + in_features
    ks = jax.random.split(key, 6)

    def lin(kw, kb, fan_in, fan_out):
        bound = 1.0 / jnp.sqrt(fan_in)
        w = jax.random.uniform(kw, (fan_in, fan_out), jnp.float32, -bound, bound)
        b = jax.random.uniform(kb, (1, fan_out), jnp.float32, -bound, bound)
        return w, b

    w1, b1 = lin(ks[0], ks[1], d_in, n_features)
    w2, b2 = lin(ks[2], ks[3], n_features, n_features)
    w3, b3 = lin(ks[4], ks[5], n_features, 1)
    return (w1, b1, w2, b2, w3, b3)


def unary_density_ref(x, params, minn=0.005, matmul_dtype=None):
    """Pure-JAX reference.  matmul_dtype=jnp.bfloat16 mirrors the kernel's
    bf16-operand / f32-accumulation matmul path; None = full f32 HIGHEST."""
    w1, b1, w2, b2, w3, b3 = params
    hp = jax.lax.Precision.HIGHEST
    if matmul_dtype is None:
        h = jnp.maximum(jnp.dot(x, w1, precision=hp) + b1, 0.0)
        h = jnp.maximum(jnp.dot(h, w2, precision=hp) + b2, 0.0)
        z = jnp.dot(h, w3, precision=hp) + b3
    else:
        dt = matmul_dtype
        h = jnp.dot(x.astype(dt), w1.astype(dt),
                    preferred_element_type=jnp.float32)
        h = jnp.maximum(h + b1, 0.0)
        h = jnp.dot(h.astype(dt), w2.astype(dt),
                    preferred_element_type=jnp.float32)
        h = jnp.maximum(h + b2, 0.0)
        z = jnp.dot(h, w3, precision=hp) + b3
    out = jax.nn.sigmoid(z)
    return out * (1.0 - minn) + minn


if __name__ == "__main__":
    key = jax.random.PRNGKey(0)
    k_params, k_x = jax.random.split(key)

    particle_size, in_features, n_features = 2, 64, 64
    B = 1000  # particles; deliberately not a power-of-two / tile multiple
    params = init_params(k_params, particle_size, in_features, n_features)
    x = jax.random.normal(k_x, (B, particle_size + in_features), jnp.float32)

    out = jax.block_until_ready(unary_density(x, params))
    assert out.shape == (B, 1)

    # Tight check vs a reference that mirrors the kernel's bf16 matmul inputs.
    ref_bf16 = unary_density_ref(x, params, matmul_dtype=jnp.bfloat16)
    assert jnp.allclose(out, ref_bf16, atol=1e-3, rtol=1e-3), \
        "mismatch vs bf16-matmul reference"

    # Loose sanity check vs the full-f32 HIGHEST-precision reference
    # (bf16 matmul operands cost ~1e-4..1e-3 absolute on the output).
    ref_f32 = unary_density_ref(x, params)
    assert jnp.allclose(out, ref_f32, atol=2e-2, rtol=2e-2), \
        "mismatch vs f32 reference"

    print("KERNEL_OK")
</pallas_src>

<mosaic_0001>
module attributes {stable_mosaic.version = 11 : i64} {
  func.func @_unary_density_kernel(%arg0: i32, %arg1: memref<1000x66xf32, #tpu.memory_space<vmem>>, %arg2: memref<66x64xbf16, #tpu.memory_space<vmem>>, %arg3: memref<1x64xf32, #tpu.memory_space<vmem>>, %arg4: memref<64x64xbf16, #tpu.memory_space<vmem>>, %arg5: memref<1x64xf32, #tpu.memory_space<vmem>>, %arg6: memref<1x64xf32, #tpu.memory_space<vmem>>, %arg7: memref<1x1xf32, #tpu.memory_space<smem>>, %arg8: memref<1000x1xf32, #tpu.memory_space<vmem>>) attributes {dimension_semantics = [#tpu.dimension_semantics<parallel>], iteration_bounds = array<i64: 1>, scalar_prefetch = 0 : i64, scratch_operands = 0 : i64, tpu.core_type = #tpu.core_type<tc>, window_params = [{transform_indices = @transform_0, window_bounds = array<i64: 1000, 66>}, {pipeline_mode = #tpu.pipeline_mode<synchronous>, transform_indices = @transform_1, window_bounds = array<i64: 66, 64>}, {pipeline_mode = #tpu.pipeline_mode<synchronous>, transform_indices = @transform_2, window_bounds = array<i64: 1, 64>}, {pipeline_mode = #tpu.pipeline_mode<synchronous>, transform_indices = @transform_3, window_bounds = array<i64: 64, 64>}, {pipeline_mode = #tpu.pipeline_mode<synchronous>, transform_indices = @transform_4, window_bounds = array<i64: 1, 64>}, {pipeline_mode = #tpu.pipeline_mode<synchronous>, transform_indices = @transform_5, window_bounds = array<i64: 1, 64>}, {transform_indices = @transform_6, window_bounds = array<i64: 1, 1>}, {transform_indices = @transform_7, window_bounds = array<i64: 1000, 1>}]} {
    %c0 = arith.constant 0 : index
    %c0_0 = arith.constant 0 : index
    %0 = vector.load %arg1[%c0, %c0_0] : memref<1000x66xf32, #tpu.memory_space<vmem>>, vector<1000x66xf32>
    %1 = arith.truncf %0 : vector<1000x66xf32> to vector<1000x66xbf16>
    %c0_1 = arith.constant 0 : index
    %c0_2 = arith.constant 0 : index
    %2 = vector.load %arg2[%c0_1, %c0_2] : memref<66x64xbf16, #tpu.memory_space<vmem>>, vector<66x64xbf16>
    %cst = arith.constant dense<0.000000e+00> : vector<1000x64xf32>
    %3 = tpu.matmul %1, %2, %cst {dimension_numbers = #tpu.dot_dimension_numbers<[1], [0], [0], [1], [0, 0, 1, 1], [], []>} : vector<1000x66xbf16>, vector<66x64xbf16>, vector<1000x64xf32> -> vector<1000x64xf32>
    %c0_3 = arith.constant 0 : index
    %c0_4 = arith.constant 0 : index
    %4 = vector.load %arg3[%c0_3, %c0_4] : memref<1x64xf32, #tpu.memory_space<vmem>>, vector<1x64xf32>
    %5 = vector.broadcast %4 : vector<1x64xf32> to vector<1000x64xf32>
    %6 = arith.addf %3, %5 : vector<1000x64xf32>
    %cst_5 = arith.constant 0.000000e+00 : f32
    %7 = vector.broadcast %cst_5 : f32 to vector<1000x64xf32>
    %8 = arith.maximumf %6, %7 : vector<1000x64xf32>
    %9 = arith.truncf %8 : vector<1000x64xf32> to vector<1000x64xbf16>
    %c0_6 = arith.constant 0 : index
    %c0_7 = arith.constant 0 : index
    %10 = vector.load %arg4[%c0_6, %c0_7] : memref<64x64xbf16, #tpu.memory_space<vmem>>, vector<64x64xbf16>
    %cst_8 = arith.constant dense<0.000000e+00> : vector<1000x64xf32>
    %11 = tpu.matmul %9, %10, %cst_8 {dimension_numbers = #tpu.dot_dimension_numbers<[1], [0], [0], [1], [0, 0, 1, 1], [], []>} : vector<1000x64xbf16>, vector<64x64xbf16>, vector<1000x64xf32> -> vector<1000x64xf32>
    %c0_9 = arith.constant 0 : index
    %c0_10 = arith.constant 0 : index
    %12 = vector.load %arg5[%c0_9, %c0_10] : memref<1x64xf32, #tpu.memory_space<vmem>>, vector<1x64xf32>
    %13 = vector.broadcast %12 : vector<1x64xf32> to vector<1000x64xf32>
    %14 = arith.addf %11, %13 : vector<1000x64xf32>
    %cst_11 = arith.constant 0.000000e+00 : f32
    %15 = vector.broadcast %cst_11 : f32 to vector<1000x64xf32>
    %16 = arith.maximumf %14, %15 : vector<1000x64xf32>
    %c0_12 = arith.constant 0 : index
    %c0_13 = arith.constant 0 : index
    %17 = vector.load %arg6[%c0_12, %c0_13] : memref<1x64xf32, #tpu.memory_space<vmem>>, vector<1x64xf32>
    %18 = vector.broadcast %17 : vector<1x64xf32> to vector<1000x64xf32>
    %19 = arith.mulf %16, %18 : vector<1000x64xf32>
    %cst_14 = arith.constant dense<0.000000e+00> : vector<1000xf32>
    %20 = vector.multi_reduction <add>, %19, %cst_14 [1] : vector<1000x64xf32> to vector<1000xf32>
    %21 = vector.shape_cast %20 : vector<1000xf32> to vector<1000x1xf32>
    %c0_15 = arith.constant 0 : index
    %c0_16 = arith.constant 0 : index
    %22 = memref.load %arg7[%c0_15, %c0_16] : memref<1x1xf32, #tpu.memory_space<smem>>
    %23 = vector.broadcast %22 : f32 to vector<1000x1xf32>
    %24 = arith.addf %21, %23 : vector<1000x1xf32>
    %25 = arith.negf %24 : vector<1000x1xf32>
    %26 = math.exp %25 : vector<1000x1xf32>
    %cst_17 = arith.constant 1.000000e+00 : f32
    %27 = vector.broadcast %cst_17 : f32 to vector<1000x1xf32>
    %28 = arith.addf %27, %26 : vector<1000x1xf32>
    %29 = arith.divf %27, %28 : vector<1000x1xf32>
    %cst_18 = arith.constant 9.950000e-01 : f32
    %30 = vector.broadcast %cst_18 : f32 to vector<1000x1xf32>
    %31 = arith.mulf %29, %30 : vector<1000x1xf32>
    %cst_19 = arith.constant 5.000000e-03 : f32
    %32 = vector.broadcast %cst_19 : f32 to vector<1000x1xf32>
    %33 = arith.addf %31, %32 : vector<1000x1xf32>
    %c0_20 = arith.constant 0 : index
    %c0_21 = arith.constant 0 : index
    %34 = vector.load %arg8[%c0_20, %c0_21] : memref<1000x1xf32, #tpu.memory_space<vmem>>, vector<1000x1xf32>
    tpu.vector_store %arg8[%c0_20, %c0_21], %33 {strides = array<i32>} : memref<1000x1xf32, #tpu.memory_space<vmem>>, vector<1000x1xf32>,
    return
  }
  func.func @transform_0(%arg0: i32) -> (i32, i32) {
    %c0_i32 = arith.constant 0 : i32
    %c0_i32_0 = arith.constant 0 : i32
    return %arg0, %c0_i32 : i32, i32
  }
  func.func @transform_1(%arg0: i32) -> (i32, i32) {
    %c0_i32 = arith.constant 0 : i32
    %c0_i32_0 = arith.constant 0 : i32
    %c0_i32_1 = arith.constant 0 : i32
    return %c0_i32, %c0_i32_0 : i32, i32
  }
  func.func @transform_2(%arg0: i32) -> (i32, i32) {
    %c0_i32 = arith.constant 0 : i32
    %c0_i32_0 = arith.constant 0 : i32
    %c0_i32_1 = arith.constant 0 : i32
    return %c0_i32, %c0_i32_0 : i32, i32
  }
  func.func @transform_3(%arg0: i32) -> (i32, i32) {
    %c0_i32 = arith.constant 0 : i32
    %c0_i32_0 = arith.constant 0 : i32
    %c0_i32_1 = arith.constant 0 : i32
    return %c0_i32, %c0_i32_0 : i32, i32
  }
  func.func @transform_4(%arg0: i32) -> (i32, i32) {
    %c0_i32 = arith.constant 0 : i32
    %c0_i32_0 = arith.constant 0 : i32
    %c0_i32_1 = arith.constant 0 : i32
    return %c0_i32, %c0_i32_0 : i32, i32
  }
  func.func @transform_5(%arg0: i32) -> (i32, i32) {
    %c0_i32 = arith.constant 0 : i32
    %c0_i32_0 = arith.constant 0 : i32
    %c0_i32_1 = arith.constant 0 : i32
    return %c0_i32, %c0_i32_0 : i32, i32
  }
  func.func @transform_6(%arg0: i32) -> (i32, i32) {
    %c0_i32 = arith.constant 0 : i32
    %c0_i32_0 = arith.constant 0 : i32
    %c0_i32_1 = arith.constant 0 : i32
    return %c0_i32, %c0_i32_0 : i32, i32
  }
  func.func @transform_7(%arg0: i32) -> (i32, i32) {
    %c0_i32 = arith.constant 0 : i32
    %c0_i32_0 = arith.constant 0 : i32
    return %arg0, %c0_i32 : i32, i32
  }
}

</mosaic_0001>

<bundles_post_ra>
// kernel: tpu_custom_call.1
= control target key start
LH: loop header
LB: loop body
LE: loop exit
PB: predicated region body
PF: predicated region fallthrough
CT: control target
= control target key end

     0   :  { %v5273_v0 = vmov 0.0   ;;  %vm5274_vm0 = vmmov 0   ;;  %vm449_vm1 = vcmask 1040384   ;;  %vm259_vm2 = vcmask 539648   ;;  %s7304_s1 = inlined_call_operand.vmem [shape: bf16[66,64], index: 1, kind: input, shape index: {}]   ;;  %s7305_s0 = inlined_call_operand.vmem [shape: f32[1000,66], index: 0, kind: input, shape index: {}]   ;;  %s7306_s3 = inlined_call_operand.vmem [shape: bf16[64,64], index: 3, kind: input, shape index: {}]   ;;  %s7307_s2 = inlined_call_operand.vmem [shape: f32[1,64], index: 2, kind: input, shape index: {}]   ;;  %s7308_s4 = inlined_call_operand.vmem [shape: f32[1,64], index: 4, kind: input, shape index: {}]   ;;  %s7309_s5 = inlined_call_operand.vmem [shape: f32[1,64], index: 5, kind: input, shape index: {}]   ;;  %s7310_s6 = inlined_call_operand.<no memory space> [shape: f32[1,1], index: 6, kind: input, shape index: {}]   ;;  %s7311_s7 = inlined_call_operand.vmem [shape: f32[1000,1], index: 7, kind: output, shape index: {}]  }
   0x1   :  { %4229 = vmatprep.subr.bf16.mxu0 %v5273_v0  ;;  %v4753_v1 = vld [vmem:[%s7304_s1] sm:$0xff]   ;;  %4239 = vmatprep.mubr.msk.bf16.mxu0 %vm5274_vm0, %v5273_v0  ;;  %v4754_v2 = vld [vmem:[%s7304_s1 + $0x8] sm:$0xff]   ;;  %v4755_v3 = vld [vmem:[%s7304_s1 + $0x10] sm:$0xff]   ;;  %vm1216_vm3 = vcmask 523264   ;;  %vm3701_vm4 = vcmask 7168  }
   0x2   :  { %4491 = vmatprep.subr.bf16.mxu1 %v5273_v0  ;;  %4499 = vmatprep.mubr.msk.bf16.mxu1 %vm5274_vm0, %v5273_v0  ;;  %v4756_v4 = vld [vmem:[%s7304_s1 + $0x18] sm:$0xff]   ;;  %v4757_v5 = vld [vmem:[%s7304_s1 + $0x20] ss:$0 sps:$4 sm:$0x11]   ;;  %v29_v7 = vld [vmem:[%s7305_s0 + $0x8] sm:$0xff] }
   0x3   :  { %4230 = vmatpush3.bf16.msra.mxu0 %v4753_v1  ;;  %v28_v6 = vld [vmem:[%s7305_s0] sm:$0xff]  ;;  %v451_v8 = vsel %vm449_vm1, %v4757_v5, 0  ;;  %v30_v10 = vld [vmem:[%s7305_s0 + $0x10] sm:$0xff]  ;;  %v31_v11 = vld [vmem:[%s7305_s0 + $0x18] sm:$0xff] }
   0x4   :  { %4231 = vmatprep.subr.bf16.mxu0 %v5273_v0  ;;  %v153_v9 = vpack.c.bf16 %v29_v7, %v28_v6  ;;  %v154_v12 = vpack.c.bf16 %v31_v11, %v30_v10  ;;  %v32_v13 = vld [vmem:[%s7305_s0 + $0x20] sm:$0xff]  ;;  %v33_v14 = vld [vmem:[%s7305_s0 + $0x28] sm:$0xff]  ;;  %v34_v16 = vld [vmem:[%s7305_s0 + $0x30] sm:$0xff] }
   0x5   :  { %v155_v15 = vpack.c.bf16 %v33_v14, %v32_v13  ;;  %v35_v17 = vld [vmem:[%s7305_s0 + $0x38] sm:$0xff]  ;;  %v36_v19 = vld [vmem:[%s7305_s0 + $0x40] sm:$0xff]  ;;  %v37_v20 = vld [vmem:[%s7305_s0 + $0x48] sm:$0xff] }
   0x6   :  { %v156_v18 = vpack.c.bf16 %v35_v17, %v34_v16  ;;  %v157_v21 = vpack.c.bf16 %v37_v20, %v36_v19  ;;  %v38_v22 = vld [vmem:[%s7305_s0 + $0x50] sm:$0xff]  ;;  %v39_v23 = vld [vmem:[%s7305_s0 + $0x58] sm:$0xff]  ;;  %v40_v25 = vld [vmem:[%s7305_s0 + $0x60] sm:$0xff] }
   0x7   :  { %4232 = vmatpush3.bf16.msra.mxu0 %v4754_v2  ;;  %v158_v24 = vpack.c.bf16 %v39_v23, %v38_v22  ;;  %v41_v26 = vld [vmem:[%s7305_s0 + $0x68] sm:$0xff]  ;;  %v42_v28 = vld [vmem:[%s7305_s0 + $0x70] sm:$0xff]  ;;  %v43_v29 = vld [vmem:[%s7305_s0 + $0x78] sm:$0xff] }
   0x8   :  { %4233 = vmatprep.subr.bf16.mxu0 %v5273_v0  ;;  %v159_v27 = vpack.c.bf16 %v41_v26, %v40_v25  ;;  %v160_v30 = vpack.c.bf16 %v43_v29, %v42_v28  ;;  %v44_v31 = vld [vmem:[%s7305_s0 + $0x80] sm:$0xff]  ;;  %v45_v32 = vld [vmem:[%s7305_s0 + $0x88] sm:$0xff]  ;;  %v46_v34 = vld [vmem:[%s7305_s0 + $0x90] sm:$0xff] }
   0x9   :  { %v161_v33 = vpack.c.bf16 %v45_v32, %v44_v31  ;;  %v47_v35 = vld [vmem:[%s7305_s0 + $0x98] sm:$0xff]  ;;  %v48_v37 = vld [vmem:[%s7305_s0 + $0xa0] sm:$0xff]  ;;  %v49_v38 = vld [vmem:[%s7305_s0 + $0xa8] sm:$0xff] }
   0xa   :  { %v162_v36 = vpack.c.bf16 %v47_v35, %v46_v34  ;;  %v4758_v39 = vld [vmem:[%s7306_s3] sm:$0xff]   ;;  %v163_v40 = vpack.c.bf16 %v49_v38, %v48_v37  ;;  %v4759_v41 = vld [vmem:[%s7306_s3 + $0x8] sm:$0xff]   ;;  %v50_v42 = vld [vmem:[%s7305_s0 + $0xb0] sm:$0xff] }
   0xb   :  { %4234 = vmatpush3.bf16.msra.mxu0 %v4755_v3  ;;  %4492 = vmatpush3.bf16.msra.mxu1 %v4758_v39  ;;  %v51_v43 = vld [vmem:[%s7305_s0 + $0xb8] sm:$0xff]  ;;  %v4760_v44 = vld [vmem:[%s7306_s3 + $0x10] sm:$0xff]   ;;  %v52_v47 = vld [vmem:[%s7305_s0 + $0xc0] sm:$0xff] }
   0xc   :  { %4235 = vmatprep.subr.bf16.mxu0 %v5273_v0  ;;  %4493 = vmatprep.subr.bf16.mxu1 %v5273_v0  ;;  %v164_v45 = vpack.c.bf16 %v51_v43, %v50_v42  ;;  %v4761_v46 = vld [vmem:[%s7306_s3 + $0x18] sm:$0xff]   ;;  %v53_v48 = vld [vmem:[%s7305_s0 + $0xc8] sm:$0xff]  ;;  %v54_v50 = vld [vmem:[%s7305_s0 + $0xd0] sm:$0xff] }
   0xd   :  { %v165_v49 = vpack.c.bf16 %v53_v48, %v52_v47  ;;  %v55_v51 = vld [vmem:[%s7305_s0 + $0xd8] sm:$0xff]  ;;  %v56_v53 = vld [vmem:[%s7305_s0 + $0xe0] sm:$0xff]  ;;  %v57_v54 = vld [vmem:[%s7305_s0 + $0xe8] sm:$0xff] }
   0xe   :  { %v166_v52 = vpack.c.bf16 %v55_v51, %v54_v50  ;;  %v167_v55 = vpack.c.bf16 %v57_v54, %v56_v53  ;;  %v58_v56 = vld [vmem:[%s7305_s0 + $0xf0] sm:$0xff]  ;;  %v59_v57 = vld [vmem:[%s7305_s0 + $0xf8] sm:$0xff]  ;;  %v60_v59 = vld [vmem:[%s7305_s0 + $0x100] sm:$0xff] }
   0xf   :  { %4236 = vmatpush3.bf16.msra.mxu0 %v4756_v4  ;;  %4494 = vmatpush3.bf16.msra.mxu1 %v4759_v41  ;;  %v168_v58 = vpack.c.bf16 %v59_v57, %v58_v56  ;;  %v61_v60 = vld [vmem:[%s7305_s0 + $0x108] sm:$0xff]  ;;  %v62_v62 = vld [vmem:[%s7305_s0 + $0x110] sm:$0xff]  ;;  %v63_v63 = vld [vmem:[%s7305_s0 + $0x118] sm:$0xff] }
  0x10   :  { %4237 = vmatprep.subr.bf16.mxu0 %v5273_v0  ;;  %4495 = vmatprep.subr.bf16.mxu1 %v5273_v0  ;;  %v169_v61 = vpack.c.bf16 %v61_v60, %v60_v59  ;;  %v170_v1 = vpack.c.bf16 %v63_v63, %v62_v62  ;;  %v64_v2 = vld [vmem:[%s7305_s0 + $0x120] sm:$0xff]  ;;  %v65_v3 = vld [vmem:[%s7305_s0 + $0x128] sm:$0xff]  ;;  %v66_v5 = vld [vmem:[%s7305_s0 + $0x130] sm:$0xff] }
  0x11   :  { %v171_v4 = vpack.c.bf16 %v65_v3, %v64_v2  ;;  %v67_v6 = vld [vmem:[%s7305_s0 + $0x138] sm:$0xff]  ;;  %v70_v11 = vld [vmem:[%s7305_s0 + $0x150] sm:$0xff]  ;;  %v72_v14 = vld [vmem:[%s7305_s0 + $0x160] sm:$0xff] }
  0x12   :  { %v172_v7 = vpack.c.bf16 %v67_v6, %v66_v5  ;;  %v74_v17 = vld [vmem:[%s7305_s0 + $0x170] sm:$0xff]  ;;  %v76_v20 = vld [vmem:[%s7305_s0 + $0x180] sm:$0xff]  ;;  %v83_v31 = vld [vmem:[%s7305_s0 + $0x1b8] sm:$0xff] }
  0x13   :  { %4238 = vmatpush3.bf16.msra.mxu0 %v451_v8  ;;  %4496 = vmatpush3.bf16.msra.mxu1 %v4760_v44  ;;  %v68_v8 = vld [vmem:[%s7305_s0 + $0x140] sm:$0xff]  ;;  %v78_v23 = vld [vmem:[%s7305_s0 + $0x190] sm:$0xff]  ;;  %v85_v42 = vld [vmem:[%s7305_s0 + $0x1c8] sm:$0xff] }
  0x14   :  { %4497 = vmatprep.subr.bf16.mxu1 %v5273_v0  ;;  %v80_v26 = vld [vmem:[%s7305_s0 + $0x1a0] sm:$0xff]  ;;  %v86_v53 = vld [vmem:[%s7305_s0 + $0x1d0] sm:$0xff]  ;;  %v87_v54 = vld [vmem:[%s7305_s0 + $0x1d8] sm:$0xff] }
  0x15   :  { %v5599_v29 = vld [vmem:[%s7307_s2] ss:$0 sm:$0xff]  ;;  %v182_v59 = vpack.c.bf16 %v87_v54, %v86_v53  ;;  %v89_v3 = vld [vmem:[%s7305_s0 + $0x1e8] sm:$0xff] }
  0x16   :  { %4240 = vmatmul.mubr.msk.bf16.vlgmr.msra.gmra.mrb[0].mxu0 %vm259_vm2, %v153_v9  ;;  %v69_v9 = vld [vmem:[%s7305_s0 + $0x148] sm:$0xff]  ;;  %v84_v41 = vld [vmem:[%s7305_s0 + $0x1c0] sm:$0xff] }
  0x17   :  { %4243 = vmatprep.mubr.msk.bf16.mxu0 %vm5274_vm0, %v5273_v0  ;;  %4498 = vmatpush3.bf16.msra.mxu1 %v4761_v46  ;;  %v173_v10 = vpack.c.bf16 %v69_v9, %v68_v8  ;;  %v181_v47 = vpack.c.bf16 %v85_v42, %v84_v41  ;;  %v88_v2 = vld [vmem:[%s7305_s0 + $0x1e0] sm:$0xff] }
  0x18   :  { %v183_v8 = vpack.c.bf16 %v89_v3, %v88_v2 }
  0x1e   :  { %4244 = vmatmul.mubr.msk.bf16.gmra.mrb[4].mxu0 %vm259_vm2, %v154_v12  ;;  %v71_v12 = vld [vmem:[%s7305_s0 + $0x158] sm:$0xff] }
  0x1f   :  { %4247 = vmatprep.mubr.msk.bf16.mxu0 %vm5274_vm0, %v5273_v0  ;;  %v174_v13 = vpack.c.bf16 %v71_v12, %v70_v11 }
  0x26   :  { %4248 = vmatmul.mubr.msk.bf16.gmra.mrb[8].mxu0 %vm259_vm2, %v155_v15  ;;  %v73_v15 = vld [vmem:[%s7305_s0 + $0x168] sm:$0xff] }
  0x27   :  { %4251 = vmatprep.mubr.msk.bf16.mxu0 %vm5274_vm0, %v5273_v0  ;;  %v175_v16 = vpack.c.bf16 %v73_v15, %v72_v14  ;;  %v90_v14 = vld [vmem:[%s7305_s0 + $0x1f0] sm:$0xff]  ;;  %v91_v15 = vld [vmem:[%s7305_s0 + $0x1f8] sm:$0xff] }
  0x2e   :  { %4252 = vmatmul.mubr.msk.bf16.gmra.mrb[12].mxu0 %vm259_vm2, %v156_v18  ;;  %v75_v18 = vld [vmem:[%s7305_s0 + $0x178] sm:$0xff] }
  0x2f   :  { %4255 = vmatprep.mubr.msk.bf16.mxu0 %vm5274_vm0, %v5273_v0  ;;  %v176_v19 = vpack.c.bf16 %v75_v18, %v74_v17 }
  0x36   :  { %4256 = vmatmul.mubr.msk.bf16.gmra.mrb[16].mxu0 %vm259_vm2, %v157_v21  ;;  %v77_v21 = vld [vmem:[%s7305_s0 + $0x188] sm:$0xff] }
  0x37   :  { %4259 = vmatprep.mubr.msk.bf16.mxu0 %vm5274_vm0, %v5273_v0  ;;  %v177_v22 = vpack.c.bf16 %v77_v21, %v76_v20  ;;  %v184_v20 = vpack.c.bf16 %v91_v15, %v90_v14 }
  0x3e   :  { %4260 = vmatmul.mubr.msk.bf16.gmra.mrb[20].mxu0 %vm259_vm2, %v158_v24  ;;  %v79_v24 = vld [vmem:[%s7305_s0 + $0x198] sm:$0xff] }
  0x3f   :  { %4263 = vmatprep.mubr.msk.bf16.mxu0 %vm5274_vm0, %v5273_v0  ;;  %v178_v25 = vpack.c.bf16 %v79_v24, %v78_v23 }
  0x46   :  { %4264 = vmatmul.mubr.msk.bf16.gmra.mrb[24].mxu0 %vm259_vm2, %v159_v27  ;;  %v81_v27 = vld [vmem:[%s7305_s0 + $0x1a8] sm:$0xff] }
  0x47   :  { %4267 = vmatprep.mubr.msk.bf16.mxu0 %vm5274_vm0, %v5273_v0  ;;  %v179_v28 = vpack.c.bf16 %v81_v27, %v80_v26  ;;  %v92_v26 = vld [vmem:[%s7305_s0 + $0x200] sm:$0xff]  ;;  %v93_v27 = vld [vmem:[%s7305_s0 + $0x208] sm:$0xff] }
  0x4e   :  { %4268 = vmatmul.mubr.msk.bf16.gmra.mrb[28].mxu0 %vm259_vm2, %v160_v30  ;;  %v82_v30 = vld [vmem:[%s7305_s0 + $0x1b0] sm:$0xff] }
  0x4f   :  { %4271 = vmatprep.mubr.msk.bf16.mxu0 %vm5274_vm0, %v5273_v0  ;;  %v180_v35 = vpack.c.bf16 %v83_v31, %v82_v30 }
  0x56   :  { %4272 = vmatmul.mubr.msk.bf16.gmra.mrb[32].mxu0 %vm259_vm2, %v161_v33 }
  0x57   :  { %4275 = vmatprep.mubr.msk.bf16.mxu0 %vm5274_vm0, %v5273_v0 }
  0x5e   :  { %4276 = vmatmul.mubr.msk.bf16.gmra.mrb[36].mxu0 %vm259_vm2, %v162_v36 }
  0x5f   :  { %4279 = vmatprep.mubr.msk.bf16.mxu0 %vm5274_vm0, %v5273_v0 }
  0x66   :  { %4280 = vmatmul.mubr.msk.bf16.gmra.mrb[40].mxu0 %vm259_vm2, %v163_v40 }
  0x67   :  { %4283 = vmatprep.mubr.msk.bf16.mxu0 %vm5274_vm0, %v5273_v0 }
  0x6e   :  { %4284 = vmatmul.mubr.msk.bf16.gmra.mrb[44].mxu0 %vm259_vm2, %v164_v45 }
  0x6f   :  { %4287 = vmatprep.mubr.msk.bf16.mxu0 %vm5274_vm0, %v5273_v0 }
  0x76   :  { %4288 = vmatmul.mubr.msk.bf16.gmra.mrb[48].mxu0 %vm259_vm2, %v165_v49 }
  0x77   :  { %4291 = vmatprep.mubr.msk.bf16.mxu0 %vm5274_vm0, %v5273_v0 }
  0x7e   :  { %4292 = vmatmul.mubr.msk.bf16.gmra.mrb[52].mxu0 %vm259_vm2, %v166_v52 }
  0x7f   :  { %4295 = vmatprep.mubr.msk.bf16.mxu0 %vm5274_vm0, %v5273_v0 }
  0x86   :  { %4296 = vmatmul.mubr.msk.bf16.gmra.mrb[56].mxu0 %vm259_vm2, %v167_v55 }
  0x87   :  { %4299 = vmatprep.mubr.msk.bf16.mxu0 %vm5274_vm0, %v5273_v0 }
  0x8e   :  { %4300 = vmatmul.mubr.msk.bf16.gmra.mrb[60].mxu0 %vm259_vm2, %v168_v58 }
  0x8f   :  { %4303 = vmatprep.mubr.msk.bf16.mxu0 %vm5274_vm0, %v5273_v0 }
  0x96   :  { %4304 = vmatmul.mubr.msk.bf16.gmra.mrb[64].mxu0 %vm259_vm2, %v169_v61 }
  0x97   :  { %4307 = vmatprep.mubr.msk.bf16.mxu0 %vm5274_vm0, %v5273_v0 }
  0x9e   :  { %4308 = vmatmul.mubr.msk.bf16.gmra.mrb[68].mxu0 %vm259_vm2, %v170_v1 }
  0x9f   :  { %4311 = vmatprep.mubr.msk.bf16.mxu0 %vm5274_vm0, %v5273_v0 }
  0xa6   :  { %4312 = vmatmul.mubr.msk.bf16.gmra.mrb[72].mxu0 %vm259_vm2, %v171_v4 }
  0xa7   :  { %4315 = vmatprep.mubr.msk.bf16.mxu0 %vm5274_vm0, %v5273_v0 }
  0xae   :  { %4316 = vmatmul.mubr.msk.bf16.gmra.mrb[76].mxu0 %vm259_vm2, %v172_v7 }
  0xaf   :  { %4319 = vmatprep.mubr.msk.bf16.mxu0 %vm5274_vm0, %v5273_v0 }
  0xb6   :  { %4320 = vmatmul.mubr.msk.bf16.gmra.mrb[80].mxu0 %vm259_vm2, %v173_v10 }
  0xb7   :  { %4323 = vmatprep.mubr.msk.bf16.mxu0 %vm5274_vm0, %v5273_v0 }
  0xbe   :  { %4324 = vmatmul.mubr.msk.bf16.gmra.mrb[84].mxu0 %vm259_vm2, %v174_v13 }
  0xbf   :  { %4327 = vmatprep.mubr.msk.bf16.mxu0 %vm5274_vm0, %v5273_v0 }
  0xc6   :  { %4328 = vmatmul.mubr.msk.bf16.gmra.mrb[88].mxu0 %vm259_vm2, %v175_v16 }
  0xc7   :  { %4331 = vmatprep.mubr.msk.bf16.mxu0 %vm5274_vm0, %v5273_v0 }
  0xce   :  { %4332 = vmatmul.mubr.msk.bf16.gmra.mrb[92].mxu0 %vm259_vm2, %v176_v19 }
  0xcf   :  { %4335 = vmatprep.mubr.msk.bf16.mxu0 %vm5274_vm0, %v5273_v0 }
  0xd6   :  { %4336 = vmatmul.mubr.msk.bf16.gmra.mrb[96].mxu0 %vm259_vm2, %v177_v22 }
  0xd7   :  { %4339 = vmatprep.mubr.msk.bf16.mxu0 %vm5274_vm0, %v5273_v0 }
  0xde   :  { %4340 = vmatmul.mubr.msk.bf16.gmra.mrb[100].mxu0 %vm259_vm2, %v178_v25 }
  0xdf   :  { %4343 = vmatprep.mubr.msk.bf16.mxu0 %vm5274_vm0, %v5273_v0 }
  0xe6   :  { %4344 = vmatmul.mubr.msk.bf16.gmra.mrb[104].mxu0 %vm259_vm2, %v179_v28 }
  0xe7   :  { %4347 = vmatprep.mubr.msk.bf16.mxu0 %vm5274_vm0, %v5273_v0 }
  0xe9   :  { %v487_v32 = vpop.f32.mrb[0].mxu0 }
  0xea   :  { %v488_v33 = vadd.f32 %v5599_v29, %v487_v32  ;;  %v4241_v34 = vpop.f32.mrb[1].mxu0 }
  0xeb   :  { %v490_v36 = vpop.f32.mrb[2].mxu0 }
  0xec   :  { %v491_v37 = vadd.f32 %v5599_v29, %v490_v36  ;;  %v4242_v38 = vpop.f32.mrb[3].mxu0  ;;  %v989_v39 = vmax.f32 %v488_v33, 0.0  ;;  %v185_v33 = vpack.c.bf16 %v93_v27, %v92_v26 }
  0xee   :  { %v990_v40 = vmax.f32 %v491_v37, 0.0  ;;  %4348 = vmatmul.mubr.msk.bf16.gmra.mrb[108].mxu0 %vm259_vm2, %v180_v35 }
  0xef   :  { %4351 = vmatprep.mubr.msk.bf16.mxu0 %vm5274_vm0, %v5273_v0 }
  0xf0   :  { %v1114_v43 = vpack.c.bf16 %v990_v40, %v989_v39  ;;  %v94_v39 = vld [vmem:[%s7305_s0 + $0x210] sm:$0xff]  ;;  %v95_v40 = vld [vmem:[%s7305_s0 + $0x218] sm:$0xff] }
  0xf1   :  { %v495_v44 = vpop.f32.mrb[4].mxu0 }
  0xf2   :  { %v496_v45 = vadd.f32 %v5599_v29, %v495_v44  ;;  %v4245_v46 = vpop.f32.mrb[5].mxu0  ;;  %4500 = vmatmul.mubr.msk.bf16.vlgmr.msra.gmra.mrb[0].mxu1 %vm1216_vm3, %v1114_v43 }
  0xf3   :  { %v498_v48 = vpop.f32.mrb[6].mxu0  ;;  %4503 = vmatprep.mubr.msk.bf16.mxu1 %vm5274_vm0, %v5273_v0 }
  0xf4   :  { %v499_v49 = vadd.f32 %v5599_v29, %v498_v48  ;;  %v4246_v50 = vpop.f32.mrb[7].mxu0  ;;  %v991_v51 = vmax.f32 %v496_v45, 0.0  ;;  %v186_v45 = vpack.c.bf16 %v95_v40, %v94_v39 }
  0xf6   :  { %v992_v52 = vmax.f32 %v499_v49, 0.0  ;;  %4352 = vmatmul.mubr.msk.bf16.gmra.mrb[112].mxu0 %vm259_vm2, %v181_v47 }
  0xf7   :  { %4355 = vmatprep.mubr.msk.bf16.mxu0 %vm5274_vm0, %v5273_v0 }
  0xf8   :  { %v1115_v55 = vpack.c.bf16 %v992_v52, %v991_v51  ;;  %v96_v51 = vld [vmem:[%s7305_s0 + $0x220] sm:$0xff]  ;;  %v97_v52 = vld [vmem:[%s7305_s0 + $0x228] sm:$0xff] }
  0xf9   :  { %v503_v56 = vpop.f32.mrb[8].mxu0 }
  0xfa   :  { %v504_v57 = vadd.f32 %v5599_v29, %v503_v56  ;;  %v4249_v58 = vpop.f32.mrb[9].mxu0  ;;  %4504 = vmatmul.mubr.msk.bf16.gmra.mrb[4].mxu1 %vm1216_vm3, %v1115_v55 }
  0xfb   :  { %v506_v60 = vpop.f32.mrb[10].mxu0  ;;  %4507 = vmatprep.mubr.msk.bf16.mxu1 %vm5274_vm0, %v5273_v0 }
  0xfc   :  { %v507_v61 = vadd.f32 %v5599_v29, %v506_v60  ;;  %v4250_v62 = vpop.f32.mrb[11].mxu0  ;;  %v993_v63 = vmax.f32 %v504_v57, 0.0  ;;  %v187_v57 = vpack.c.bf16 %v97_v52, %v96_v51 }
  0xfe   :  { %v994_v1 = vmax.f32 %v507_v61, 0.0  ;;  %4356 = vmatmul.mubr.msk.bf16.gmra.mrb[116].mxu0 %vm259_vm2, %v182_v59 }
  0xff   :  { %4359 = vmatprep.mubr.msk.bf16.mxu0 %vm5274_vm0, %v5273_v0 }
 0x100   :  { %v1116_v4 = vpack.c.bf16 %v994_v1, %v993_v63  ;;  %v98_v63 = vld [vmem:[%s7305_s0 + $0x230] sm:$0xff]  ;;  %v99_v1 = vld [vmem:[%s7305_s0 + $0x238] sm:$0xff] }
 0x101   :  { %v511_v5 = vpop.f32.mrb[12].mxu0 }
 0x102   :  { %v512_v6 = vadd.f32 %v5599_v29, %v511_v5  ;;  %v4253_v7 = vpop.f32.mrb[13].mxu0  ;;  %4508 = vmatmul.mubr.msk.bf16.gmra.mrb[8].mxu1 %vm1216_vm3, %v1116_v4 }
 0x103   :  { %v514_v9 = vpop.f32.mrb[14].mxu0  ;;  %4511 = vmatprep.mubr.msk.bf16.mxu1 %vm5274_vm0, %v5273_v0 }
 0x104   :  { %v515_v10 = vadd.f32 %v5599_v29, %v514_v9  ;;  %v4254_v11 = vpop.f32.mrb[15].mxu0  ;;  %v995_v12 = vmax.f32 %v512_v6, 0.0  ;;  %v188_v6 = vpack.c.bf16 %v99_v1, %v98_v63 }
 0x106   :  { %v996_v13 = vmax.f32 %v515_v10, 0.0  ;;  %4360 = vmatmul.mubr.msk.bf16.gmra.mrb[120].mxu0 %vm259_vm2, %v183_v8 }
 0x107   :  { %4363 = vmatprep.mubr.msk.bf16.mxu0 %vm5274_vm0, %v5273_v0 }
 0x108   :  { %v1117_v16 = vpack.c.bf16 %v996_v13, %v995_v12  ;;  %v100_v12 = vld [vmem:[%s7305_s0 + $0x240] sm:$0xff]  ;;  %v101_v13 = vld [vmem:[%s7305_s0 + $0x248] sm:$0xff] }
 0x109   :  { %v519_v17 = vpop.f32.mrb[16].mxu0 }
 0x10a   :  { %v520_v18 = vadd.f32 %v5599_v29, %v519_v17  ;;  %v4257_v19 = vpop.f32.mrb[17].mxu0  ;;  %4512 = vmatmul.mubr.msk.bf16.gmra.mrb[12].mxu1 %vm1216_vm3, %v1117_v16 }
 0x10b   :  { %v522_v21 = vpop.f32.mrb[18].mxu0  ;;  %4515 = vmatprep.mubr.msk.bf16.mxu1 %vm5274_vm0, %v5273_v0 }
 0x10c   :  { %v523_v22 = vadd.f32 %v5599_v29, %v522_v21  ;;  %v4258_v23 = vpop.f32.mrb[19].mxu0  ;;  %v997_v24 = vmax.f32 %v520_v18, 0.0  ;;  %v189_v18 = vpack.c.bf16 %v101_v13, %v100_v12 }
 0x10e   :  { %v998_v25 = vmax.f32 %v523_v22, 0.0  ;;  %4364 = vmatmul.mubr.msk.bf16.gmra.mrb[124].mxu0 %vm259_vm2, %v184_v20 }
 0x10f   :  { %4367 = vmatprep.mubr.msk.bf16.mxu0 %vm5274_vm0, %v5273_v0 }
 0x110   :  { %v1118_v28 = vpack.c.bf16 %v998_v25, %v997_v24  ;;  %v102_v24 = vld [vmem:[%s7305_s0 + $0x250] sm:$0xff]  ;;  %v103_v25 = vld [vmem:[%s7305_s0 + $0x258] sm:$0xff] }
 0x111   :  { %v527_v30 = vpop.f32.mrb[20].mxu0 }
 0x112   :  { %v528_v31 = vadd.f32 %v5599_v29, %v527_v30  ;;  %v4261_v32 = vpop.f32.mrb[21].mxu0  ;;  %4516 = vmatmul.mubr.msk.bf16.gmra.mrb[16].mxu1 %vm1216_vm3, %v1118_v28 }
 0x113   :  { %v530_v34 = vpop.f32.mrb[22].mxu0  ;;  %4519 = vmatprep.mubr.msk.bf16.mxu1 %vm5274_vm0, %v5273_v0 }
 0x114   :  { %v531_v35 = vadd.f32 %v5599_v29, %v530_v34  ;;  %v4262_v36 = vpop.f32.mrb[23].mxu0  ;;  %v999_v37 = vmax.f32 %v528_v31, 0.0  ;;  %v190_v31 = vpack.c.bf16 %v103_v25, %v102_v24 }
 0x116   :  { %v1000_v38 = vmax.f32 %v531_v35, 0.0  ;;  %4368 = vmatmul.mubr.msk.bf16.gmra.mrb[128].mxu0 %vm259_vm2, %v185_v33 }
 0x117   :  { %4371 = vmatprep.mubr.msk.bf16.mxu0 %vm5274_vm0, %v5273_v0 }
 0x118   :  { %v1119_v41 = vpack.c.bf16 %v1000_v38, %v999_v37  ;;  %v104_v37 = vld [vmem:[%s7305_s0 + $0x260] sm:$0xff]  ;;  %v105_v38 = vld [vmem:[%s7305_s0 + $0x268] sm:$0xff] }
 0x119   :  { %v535_v42 = vpop.f32.mrb[24].mxu0 }
 0x11a   :  { %v536_v43 = vadd.f32 %v5599_v29, %v535_v42  ;;  %v4265_v44 = vpop.f32.mrb[25].mxu0  ;;  %4520 = vmatmul.mubr.msk.bf16.gmra.mrb[20].mxu1 %vm1216_vm3, %v1119_v41 }
 0x11b   :  { %v538_v46 = vpop.f32.mrb[26].mxu0  ;;  %4523 = vmatprep.mubr.msk.bf16.mxu1 %vm5274_vm0, %v5273_v0 }
 0x11c   :  { %v539_v47 = vadd.f32 %v5599_v29, %v538_v46  ;;  %v4266_v48 = vpop.f32.mrb[27].mxu0  ;;  %v1001_v49 = vmax.f32 %v536_v43, 0.0  ;;  %v191_v43 = vpack.c.bf16 %v105_v38, %v104_v37 }
 0x11e   :  { %v1002_v50 = vmax.f32 %v539_v47, 0.0  ;;  %4372 = vmatmul.mubr.msk.bf16.gmra.mrb[132].mxu0 %vm259_vm2, %v186_v45 }
 0x11f   :  { %4375 = vmatprep.mubr.msk.bf16.mxu0 %vm5274_vm0, %v5273_v0 }
 0x120   :  { %v1120_v53 = vpack.c.bf16 %v1002_v50, %v1001_v49  ;;  %v106_v49 = vld [vmem:[%s7305_s0 + $0x270] sm:$0xff]  ;;  %v107_v50 = vld [vmem:[%s7305_s0 + $0x278] sm:$0xff] }
 0x121   :  { %v543_v54 = vpop.f32.mrb[28].mxu0 }
 0x122   :  { %v544_v55 = vadd.f32 %v5599_v29, %v543_v54  ;;  %v4269_v56 = vpop.f32.mrb[29].mxu0  ;;  %4524 = vmatmul.mubr.msk.bf16.gmra.mrb[24].mxu1 %vm1216_vm3, %v1120_v53 }
 0x123   :  { %v546_v58 = vpop.f32.mrb[30].mxu0  ;;  %4527 = vmatprep.mubr.msk.bf16.mxu1 %vm5274_vm0, %v5273_v0 }
 0x124   :  { %v547_v59 = vadd.f32 %v5599_v29, %v546_v58  ;;  %v4270_v60 = vpop.f32.mrb[31].mxu0  ;;  %v1003_v61 = vmax.f32 %v544_v55, 0.0  ;;  %v192_v55 = vpack.c.bf16 %v107_v50, %v106_v49 }
 0x126   :  { %v1004_v62 = vmax.f32 %v547_v59, 0.0  ;;  %4376 = vmatmul.mubr.msk.bf16.gmra.mrb[136].mxu0 %vm259_vm2, %v187_v57 }
 0x127   :  { %4379 = vmatprep.mubr.msk.bf16.mxu0 %vm5274_vm0, %v5273_v0 }
 0x128   :  { %v1121_v2 = vpack.c.bf16 %v1004_v62, %v1003_v61  ;;  %v108_v61 = vld [vmem:[%s7305_s0 + $0x280] sm:$0xff]  ;;  %v109_v62 = vld [vmem:[%s7305_s0 + $0x288] sm:$0xff] }
 0x129   :  { %v551_v3 = vpop.f32.mrb[32].mxu0 }
 0x12a   :  { %v552_v4 = vadd.f32 %v5599_v29, %v551_v3  ;;  %v4273_v5 = vpop.f32.mrb[33].mxu0  ;;  %4528 = vmatmul.mubr.msk.bf16.gmra.mrb[28].mxu1 %vm1216_vm3, %v1121_v2 }
 0x12b   :  { %v554_v7 = vpop.f32.mrb[34].mxu0  ;;  %4531 = vmatprep.mubr.msk.bf16.mxu1 %vm5274_vm0, %v5273_v0 }
 0x12c   :  { %v555_v8 = vadd.f32 %v5599_v29, %v554_v7  ;;  %v4274_v9 = vpop.f32.mrb[35].mxu0  ;;  %v1005_v10 = vmax.f32 %v552_v4, 0.0  ;;  %v193_v4 = vpack.c.bf16 %v109_v62, %v108_v61 }
 0x12e   :  { %v1006_v11 = vmax.f32 %v555_v8, 0.0  ;;  %4380 = vmatmul.mubr.msk.bf16.gmra.mrb[140].mxu0 %vm259_vm2, %v188_v6 }
 0x12f   :  { %4383 = vmatprep.mubr.msk.bf16.mxu0 %vm5274_vm0, %v5273_v0 }
 0x130   :  { %v1122_v14 = vpack.c.bf16 %v1006_v11, %v1005_v10  ;;  %v110_v10 = vld [vmem:[%s7305_s0 + $0x290] sm:$0xff]  ;;  %v111_v11 = vld [vmem:[%s7305_s0 + $0x298] sm:$0xff] }
 0x131   :  { %v559_v15 = vpop.f32.mrb[36].mxu0 }
 0x132   :  { %v560_v16 = vadd.f32 %v5599_v29, %v559_v15  ;;  %v4277_v17 = vpop.f32.mrb[37].mxu0  ;;  %4532 = vmatmul.mubr.msk.bf16.gmra.mrb[32].mxu1 %vm1216_vm3, %v1122_v14 }
 0x133   :  { %v562_v19 = vpop.f32.mrb[38].mxu0  ;;  %4535 = vmatprep.mubr.msk.bf16.mxu1 %vm5274_vm0, %v5273_v0 }
 0x134   :  { %v563_v20 = vadd.f32 %v5599_v29, %v562_v19  ;;  %v4278_v21 = vpop.f32.mrb[39].mxu0  ;;  %v1007_v22 = vmax.f32 %v560_v16, 0.0  ;;  %v194_v16 = vpack.c.bf16 %v111_v11, %v110_v10 }
 0x136   :  { %v1008_v23 = vmax.f32 %v563_v20, 0.0  ;;  %4384 = vmatmul.mubr.msk.bf16.gmra.mrb[144].mxu0 %vm259_vm2, %v189_v18 }
 0x137   :  { %4387 = vmatprep.mubr.msk.bf16.mxu0 %vm5274_vm0, %v5273_v0 }
 0x138   :  { %v1123_v26 = vpack.c.bf16 %v1008_v23, %v1007_v22  ;;  %v112_v22 = vld [vmem:[%s7305_s0 + $0x2a0] sm:$0xff]  ;;  %v113_v23 = vld [vmem:[%s7305_s0 + $0x2a8] sm:$0xff] }
 0x139   :  { %v567_v27 = vpop.f32.mrb[40].mxu0 }
 0x13a   :  { %v568_v28 = vadd.f32 %v5599_v29, %v567_v27  ;;  %v4281_v30 = vpop.f32.mrb[41].mxu0  ;;  %4536 = vmatmul.mubr.msk.bf16.gmra.mrb[36].mxu1 %vm1216_vm3, %v1123_v26 }
 0x13b   :  { %v570_v32 = vpop.f32.mrb[42].mxu0  ;;  %4539 = vmatprep.mubr.msk.bf16.mxu1 %vm5274_vm0, %v5273_v0 }
 0x13c   :  { %v571_v33 = vadd.f32 %v5599_v29, %v570_v32  ;;  %v4282_v34 = vpop.f32.mrb[43].mxu0  ;;  %v1009_v35 = vmax.f32 %v568_v28, 0.0  ;;  %v195_v28 = vpack.c.bf16 %v113_v23, %v112_v22 }
 0x13e   :  { %v1010_v36 = vmax.f32 %v571_v33, 0.0  ;;  %4388 = vmatmul.mubr.msk.bf16.gmra.mrb[148].mxu0 %vm259_vm2, %v190_v31 }
 0x13f   :  { %4391 = vmatprep.mubr.msk.bf16.mxu0 %vm5274_vm0, %v5273_v0 }
 0x140   :  { %v1124_v39 = vpack.c.bf16 %v1010_v36, %v1009_v35  ;;  %v114_v35 = vld [vmem:[%s7305_s0 + $0x2b0] sm:$0xff]  ;;  %v115_v36 = vld [vmem:[%s7305_s0 + $0x2b8] sm:$0xff] }
 0x141   :  { %v575_v40 = vpop.f32.mrb[44].mxu0 }
 0x142   :  { %v576_v41 = vadd.f32 %v5599_v29, %v575_v40  ;;  %v4285_v42 = vpop.f32.mrb[45].mxu0  ;;  %4540 = vmatmul.mubr.msk.bf16.gmra.mrb[40].mxu1 %vm1216_vm3, %v1124_v39 }
 0x143   :  { %v578_v44 = vpop.f32.mrb[46].mxu0  ;;  %4543 = vmatprep.mubr.msk.bf16.mxu1 %vm5274_vm0, %v5273_v0 }
 0x144   :  { %v579_v45 = vadd.f32 %v5599_v29, %v578_v44  ;;  %v4286_v46 = vpop.f32.mrb[47].mxu0  ;;  %v1011_v47 = vmax.f32 %v576_v41, 0.0  ;;  %v196_v41 = vpack.c.bf16 %v115_v36, %v114_v35 }
 0x146   :  { %v1012_v48 = vmax.f32 %v579_v45, 0.0  ;;  %4392 = vmatmul.mubr.msk.bf16.gmra.mrb[152].mxu0 %vm259_vm2, %v191_v43 }
 0x147   :  { %4395 = vmatprep.mubr.msk.bf16.mxu0 %vm5274_vm0, %v5273_v0 }
 0x148   :  { %v1125_v51 = vpack.c.bf16 %v1012_v48, %v1011_v47  ;;  %v116_v47 = vld [vmem:[%s7305_s0 + $0x2c0] sm:$0xff]  ;;  %v117_v48 = vld [vmem:[%s7305_s0 + $0x2c8] sm:$0xff] }
 0x149   :  { %v583_v52 = vpop.f32.mrb[48].mxu0 }
 0x14a   :  { %v584_v53 = vadd.f32 %v5599_v29, %v583_v52  ;;  %v4289_v54 = vpop.f32.mrb[49].mxu0  ;;  %4544 = vmatmul.mubr.msk.bf16.gmra.mrb[44].mxu1 %vm1216_vm3, %v1125_v51 }
 0x14b   :  { %v586_v56 = vpop.f32.mrb[50].mxu0  ;;  %4547 = vmatprep.mubr.msk.bf16.mxu1 %vm5274_vm0, %v5273_v0 }
 0x14c   :  { %v587_v57 = vadd.f32 %v5599_v29, %v586_v56  ;;  %v4290_v58 = vpop.f32.mrb[51].mxu0  ;;  %v1013_v59 = vmax.f32 %v584_v53, 0.0  ;;  %v197_v53 = vpack.c.bf16 %v117_v48, %v116_v47 }
 0x14e   :  { %v1014_v60 = vmax.f32 %v587_v57, 0.0  ;;  %4396 = vmatmul.mubr.msk.bf16.gmra.mrb[156].mxu0 %vm259_vm2, %v192_v55 }
 0x14f   :  { %4399 = vmatprep.mubr.msk.bf16.mxu0 %vm5274_vm0, %v5273_v0 }
 0x150   :  { %v1126_v63 = vpack.c.bf16 %v1014_v60, %v1013_v59  ;;  %v118_v59 = vld [vmem:[%s7305_s0 + $0x2d0] sm:$0xff]  ;;  %v119_v60 = vld [vmem:[%s7305_s0 + $0x2d8] sm:$0xff] }
 0x151   :  { %v591_v1 = vpop.f32.mrb[52].mxu0 }
 0x152   :  { %v592_v2 = vadd.f32 %v5599_v29, %v591_v1  ;;  %v4293_v3 = vpop.f32.mrb[53].mxu0  ;;  %4548 = vmatmul.mubr.msk.bf16.gmra.mrb[48].mxu1 %vm1216_vm3, %v1126_v63 }
 0x153   :  { %v594_v5 = vpop.f32.mrb[54].mxu0  ;;  %4551 = vmatprep.mubr.msk.bf16.mxu1 %vm5274_vm0, %v5273_v0 }
 0x154   :  { %v595_v6 = vadd.f32 %v5599_v29, %v594_v5  ;;  %v4294_v7 = vpop.f32.mrb[55].mxu0  ;;  %v1015_v8 = vmax.f32 %v592_v2, 0.0  ;;  %v198_v2 = vpack.c.bf16 %v119_v60, %v118_v59 }
 0x156   :  { %v1016_v9 = vmax.f32 %v595_v6, 0.0  ;;  %4400 = vmatmul.mubr.msk.bf16.gmra.mrb[160].mxu0 %vm259_vm2, %v193_v4 }
 0x157   :  { %4403 = vmatprep.mubr.msk.bf16.mxu0 %vm5274_vm0, %v5273_v0 }
 0x158   :  { %v1127_v12 = vpack.c.bf16 %v1016_v9, %v1015_v8  ;;  %v120_v8 = vld [vmem:[%s7305_s0 + $0x2e0] sm:$0xff]  ;;  %v121_v9 = vld [vmem:[%s7305_s0 + $0x2e8] sm:$0xff] }
 0x159   :  { %v599_v13 = vpop.f32.mrb[56].mxu0 }
 0x15a   :  { %v600_v14 = vadd.f32 %v5599_v29, %v599_v13  ;;  %v4297_v15 = vpop.f32.mrb[57].mxu0  ;;  %4552 = vmatmul.mubr.msk.bf16.gmra.mrb[52].mxu1 %vm1216_vm3, %v1127_v12 }
 0x15b   :  { %v602_v17 = vpop.f32.mrb[58].mxu0  ;;  %4555 = vmatprep.mubr.msk.bf16.mxu1 %vm5274_vm0, %v5273_v0 }
 0x15c   :  { %v603_v18 = vadd.f32 %v5599_v29, %v602_v17  ;;  %v4298_v19 = vpop.f32.mrb[59].mxu0  ;;  %v1017_v20 = vmax.f32 %v600_v14, 0.0  ;;  %v199_v14 = vpack.c.bf16 %v121_v9, %v120_v8 }
 0x15e   :  { %v1018_v21 = vmax.f32 %v603_v18, 0.0  ;;  %4404 = vmatmul.mubr.msk.bf16.gmra.mrb[164].mxu0 %vm259_vm2, %v194_v16 }
 0x15f   :  { %4407 = vmatprep.mubr.msk.bf16.mxu0 %vm5274_vm0, %v5273_v0 }
 0x160   :  { %v1128_v24 = vpack.c.bf16 %v1018_v21, %v1017_v20  ;;  %v122_v20 = vld [vmem:[%s7305_s0 + $0x2f0] sm:$0xff]  ;;  %v123_v21 = vld [vmem:[%s7305_s0 + $0x2f8] sm:$0xff] }
 0x161   :  { %v607_v25 = vpop.f32.mrb[60].mxu0 }
 0x162   :  { %v608_v26 = vadd.f32 %v5599_v29, %v607_v25  ;;  %v4301_v27 = vpop.f32.mrb[61].mxu0  ;;  %4556 = vmatmul.mubr.msk.bf16.gmra.mrb[56].mxu1 %vm1216_vm3, %v1128_v24 }
 0x163   :  { %v610_v30 = vpop.f32.mrb[62].mxu0  ;;  %4559 = vmatprep.mubr.msk.bf16.mxu1 %vm5274_vm0, %v5273_v0 }
 0x164   :  { %v611_v31 = vadd.f32 %v5599_v29, %v610_v30  ;;  %v4302_v32 = vpop.f32.mrb[63].mxu0  ;;  %v1019_v33 = vmax.f32 %v608_v26, 0.0  ;;  %v200_v26 = vpack.c.bf16 %v123_v21, %v122_v20 }
 0x166   :  { %v1020_v34 = vmax.f32 %v611_v31, 0.0  ;;  %4408 = vmatmul.mubr.msk.bf16.gmra.mrb[168].mxu0 %vm259_vm2, %v195_v28 }
 0x167   :  { %4411 = vmatprep.mubr.msk.bf16.mxu0 %vm5274_vm0, %v5273_v0 }
 0x168   :  { %v1129_v37 = vpack.c.bf16 %v1020_v34, %v1019_v33  ;;  %v124_v33 = vld [vmem:[%s7305_s0 + $0x300] sm:$0xff]  ;;  %v125_v34 = vld [vmem:[%s7305_s0 + $0x308] sm:$0xff] }
 0x169   :  { %v615_v38 = vpop.f32.mrb[64].mxu0 }
 0x16a   :  { %v616_v39 = vadd.f32 %v5599_v29, %v615_v38  ;;  %v4305_v40 = vpop.f32.mrb[65].mxu0  ;;  %4560 = vmatmul.mubr.msk.bf16.gmra.mrb[60].mxu1 %vm1216_vm3, %v1129_v37 }
 0x16b   :  { %v618_v42 = vpop.f32.mrb[66].mxu0  ;;  %4563 = vmatprep.mubr.msk.bf16.mxu1 %vm5274_vm0, %v5273_v0 }
 0x16c   :  { %v619_v43 = vadd.f32 %v5599_v29, %v618_v42  ;;  %v4306_v44 = vpop.f32.mrb[67].mxu0  ;;  %v1021_v45 = vmax.f32 %v616_v39, 0.0  ;;  %v201_v39 = vpack.c.bf16 %v125_v34, %v124_v33 }
 0x16e   :  { %v1022_v46 = vmax.f32 %v619_v43, 0.0  ;;  %4412 = vmatmul.mubr.msk.bf16.gmra.mrb[172].mxu0 %vm259_vm2, %v196_v41 }
 0x16f   :  { %4415 = vmatprep.mubr.msk.bf16.mxu0 %vm5274_vm0, %v5273_v0 }
 0x170   :  { %v1130_v49 = vpack.c.bf16 %v1022_v46, %v1021_v45  ;;  %v126_v45 = vld [vmem:[%s7305_s0 + $0x310] sm:$0xff]  ;;  %v127_v46 = vld [vmem:[%s7305_s0 + $0x318] sm:$0xff] }
 0x171   :  { %v623_v50 = vpop.f32.mrb[68].mxu0 }
 0x172   :  { %v624_v51 = vadd.f32 %v5599_v29, %v623_v50  ;;  %v4309_v52 = vpop.f32.mrb[69].mxu0  ;;  %4564 = vmatmul.mubr.msk.bf16.gmra.mrb[64].mxu1 %vm1216_vm3, %v1130_v49 }
 0x173   :  { %v626_v54 = vpop.f32.mrb[70].mxu0  ;;  %4567 = vmatprep.mubr.msk.bf16.mxu1 %vm5274_vm0, %v5273_v0 }
 0x174   :  { %v627_v55 = vadd.f32 %v5599_v29, %v626_v54  ;;  %v4310_v56 = vpop.f32.mrb[71].mxu0  ;;  %v1023_v57 = vmax.f32 %v624_v51, 0.0  ;;  %v202_v51 = vpack.c.bf16 %v127_v46, %v126_v45 }
 0x176   :  { %v1024_v58 = vmax.f32 %v627_v55, 0.0  ;;  %4416 = vmatmul.mubr.msk.bf16.gmra.mrb[176].mxu0 %vm259_vm2, %v197_v53 }
 0x177   :  { %4419 = vmatprep.mubr.msk.bf16.mxu0 %vm5274_vm0, %v5273_v0 }
 0x178   :  { %v1131_v61 = vpack.c.bf16 %v1024_v58, %v1023_v57  ;;  %v128_v57 = vld [vmem:[%s7305_s0 + $0x320] sm:$0xff]  ;;  %v129_v58 = vld [vmem:[%s7305_s0 + $0x328] sm:$0xff] }
 0x179   :  { %v631_v62 = vpop.f32.mrb[72].mxu0 }
 0x17a   :  { %v632_v63 = vadd.f32 %v5599_v29, %v631_v62  ;;  %v4313_v1 = vpop.f32.mrb[73].mxu0  ;;  %4568 = vmatmul.mubr.msk.bf16.gmra.mrb[68].mxu1 %vm1216_vm3, %v1131_v61 }
 0x17b   :  { %v634_v3 = vpop.f32.mrb[74].mxu0  ;;  %4571 = vmatprep.mubr.msk.bf16.mxu1 %vm5274_vm0, %v5273_v0 }
 0x17c   :  { %v635_v4 = vadd.f32 %v5599_v29, %v634_v3  ;;  %v4314_v5 = vpop.f32.mrb[75].mxu0  ;;  %v1025_v6 = vmax.f32 %v632_v63, 0.0  ;;  %v203_v63 = vpack.c.bf16 %v129_v58, %v128_v57 }
 0x17e   :  { %v1026_v7 = vmax.f32 %v635_v4, 0.0  ;;  %4420 = vmatmul.mubr.msk.bf16.gmra.mrb[180].mxu0 %vm259_vm2, %v198_v2 }
 0x17f   :  { %4423 = vmatprep.mubr.msk.bf16.mxu0 %vm5274_vm0, %v5273_v0 }
 0x180   :  { %v1132_v10 = vpack.c.bf16 %v1026_v7, %v1025_v6  ;;  %v130_v6 = vld [vmem:[%s7305_s0 + $0x330] sm:$0xff]  ;;  %v131_v7 = vld [vmem:[%s7305_s0 + $0x338] sm:$0xff] }
 0x181   :  { %v639_v11 = vpop.f32.mrb[76].mxu0 }
 0x182   :  { %v640_v12 = vadd.f32 %v5599_v29, %v639_v11  ;;  %v4317_v13 = vpop.f32.mrb[77].mxu0  ;;  %4572 = vmatmul.mubr.msk.bf16.gmra.mrb[72].mxu1 %vm1216_vm3, %v1132_v10 }
 0x183   :  { %v642_v15 = vpop.f32.mrb[78].mxu0  ;;  %4575 = vmatprep.mubr.msk.bf16.mxu1 %vm5274_vm0, %v5273_v0 }
 0x184   :  { %v643_v16 = vadd.f32 %v5599_v29, %v642_v15  ;;  %v4318_v17 = vpop.f32.mrb[79].mxu0  ;;  %v1027_v18 = vmax.f32 %v640_v12, 0.0  ;;  %v204_v12 = vpack.c.bf16 %v131_v7, %v130_v6 }
 0x186   :  { %v1028_v19 = vmax.f32 %v643_v16, 0.0  ;;  %4424 = vmatmul.mubr.msk.bf16.gmra.mrb[184].mxu0 %vm259_vm2, %v199_v14 }
 0x187   :  { %4427 = vmatprep.mubr.msk.bf16.mxu0 %vm5274_vm0, %v5273_v0 }
 0x188   :  { %v1133_v22 = vpack.c.bf16 %v1028_v19, %v1027_v18  ;;  %v132_v18 = vld [vmem:[%s7305_s0 + $0x340] sm:$0xff]  ;;  %v133_v19 = vld [vmem:[%s7305_s0 + $0x348] sm:$0xff] }
 0x189   :  { %v647_v23 = vpop.f32.mrb[80].mxu0 }
 0x18a   :  { %v648_v24 = vadd.f32 %v5599_v29, %v647_v23  ;;  %v4321_v25 = vpop.f32.mrb[81].mxu0  ;;  %4576 = vmatmul.mubr.msk.bf16.gmra.mrb[76].mxu1 %vm1216_vm3, %v1133_v22 }
 0x18b   :  { %v650_v27 = vpop.f32.mrb[82].mxu0  ;;  %4579 = vmatprep.mubr.msk.bf16.mxu1 %vm5274_vm0, %v5273_v0 }
 0x18c   :  { %v651_v28 = vadd.f32 %v5599_v29, %v650_v27  ;;  %v4322_v30 = vpop.f32.mrb[83].mxu0  ;;  %v1029_v31 = vmax.f32 %v648_v24, 0.0  ;;  %v205_v24 = vpack.c.bf16 %v133_v19, %v132_v18 }
 0x18e   :  { %v1030_v32 = vmax.f32 %v651_v28, 0.0  ;;  %4428 = vmatmul.mubr.msk.bf16.gmra.mrb[188].mxu0 %vm259_vm2, %v200_v26 }
 0x18f   :  { %4431 = vmatprep.mubr.msk.bf16.mxu0 %vm5274_vm0, %v5273_v0 }
 0x190   :  { %v1134_v35 = vpack.c.bf16 %v1030_v32, %v1029_v31  ;;  %v134_v31 = vld [vmem:[%s7305_s0 + $0x350] sm:$0xff]  ;;  %v135_v32 = vld [vmem:[%s7305_s0 + $0x358] sm:$0xff] }
 0x191   :  { %v655_v36 = vpop.f32.mrb[84].mxu0 }
 0x192   :  { %v656_v37 = vadd.f32 %v5599_v29, %v655_v36  ;;  %v4325_v38 = vpop.f32.mrb[85].mxu0  ;;  %4580 = vmatmul.mubr.msk.bf16.gmra.mrb[80].mxu1 %vm1216_vm3, %v1134_v35 }
 0x193   :  { %v658_v40 = vpop.f32.mrb[86].mxu0  ;;  %4583 = vmatprep.mubr.msk.bf16.mxu1 %vm5274_vm0, %v5273_v0 }
 0x194   :  { %v659_v41 = vadd.f32 %v5599_v29, %v658_v40  ;;  %v4326_v42 = vpop.f32.mrb[87].mxu0  ;;  %v1031_v43 = vmax.f32 %v656_v37, 0.0  ;;  %v206_v37 = vpack.c.bf16 %v135_v32, %v134_v31 }
 0x196   :  { %v1032_v44 = vmax.f32 %v659_v41, 0.0  ;;  %4432 = vmatmul.mubr.msk.bf16.gmra.mrb[192].mxu0 %vm259_vm2, %v201_v39 }
 0x197   :  { %4435 = vmatprep.mubr.msk.bf16.mxu0 %vm5274_vm0, %v5273_v0 }
 0x198   :  { %v1135_v47 = vpack.c.bf16 %v1032_v44, %v1031_v43  ;;  %v136_v43 = vld [vmem:[%s7305_s0 + $0x360] sm:$0xff]  ;;  %v137_v44 = vld [vmem:[%s7305_s0 + $0x368] sm:$0xff] }
 0x199   :  { %v663_v48 = vpop.f32.mrb[88].mxu0 }
 0x19a   :  { %v664_v49 = vadd.f32 %v5599_v29, %v663_v48  ;;  %v4329_v50 = vpop.f32.mrb[89].mxu0  ;;  %4584 = vmatmul.mubr.msk.bf16.gmra.mrb[84].mxu1 %vm1216_vm3, %v1135_v47 }
 0x19b   :  { %v666_v52 = vpop.f32.mrb[90].mxu0  ;;  %4587 = vmatprep.mubr.msk.bf16.mxu1 %vm5274_vm0, %v5273_v0 }
 0x19c   :  { %v667_v53 = vadd.f32 %v5599_v29, %v666_v52  ;;  %v4330_v54 = vpop.f32.mrb[91].mxu0  ;;  %v1033_v55 = vmax.f32 %v664_v49, 0.0  ;;  %v207_v49 = vpack.c.bf16 %v137_v44, %v136_v43 }
 0x19e   :  { %v1034_v56 = vmax.f32 %v667_v53, 0.0  ;;  %4436 = vmatmul.mubr.msk.bf16.gmra.mrb[196].mxu0 %vm259_vm2, %v202_v51  ;;  %v5989_v51 = vld [vmem:[%s7308_s4] ss:$0 sm:$0xff] }
 0x19f   :  { %4439 = vmatprep.mubr.msk.bf16.mxu0 %vm5274_vm0, %v5273_v0 }
 0x1a0   :  { %v1136_v59 = vpack.c.bf16 %v1034_v56, %v1033_v55 }
 0x1a1   :  { %v671_v60 = vpop.f32.mrb[92].mxu0 }
 0x1a2   :  { %v672_v61 = vadd.f32 %v5599_v29, %v671_v60  ;;  %v4333_v62 = vpop.f32.mrb[93].mxu0  ;;  %4588 = vmatmul.mubr.msk.bf16.gmra.mrb[88].mxu1 %vm1216_vm3, %v1136_v59  ;;  %v6001_v60 = vld [vmem:[%s7309_s5] ss:$0 sm:$0xff] }
 0x1a3   :  { %v674_v1 = vpop.f32.mrb[94].mxu0  ;;  %4591 = vmatprep.mubr.msk.bf16.mxu1 %vm5274_vm0, %v5273_v0  ;;  %v139_v62 = vld [vmem:[%s7305_s0 + $0x378] sm:$0xff] }
 0x1a4   :  { %v675_v2 = vadd.f32 %v5599_v29, %v674_v1  ;;  %v4334_v3 = vpop.f32.mrb[95].mxu0  ;;  %v1035_v4 = vmax.f32 %v672_v61, 0.0  ;;  %v138_v61 = vld [vmem:[%s7305_s0 + $0x370] sm:$0xff] }
 0x1a6   :  { %v1036_v5 = vmax.f32 %v675_v2, 0.0  ;;  %4440 = vmatmul.mubr.msk.bf16.gmra.mrb[200].mxu0 %vm259_vm2, %v203_v63 }
 0x1a7   :  { %4443 = vmatprep.mubr.msk.bf16.mxu0 %vm5274_vm0, %v5273_v0 }
 0x1a8   :  { %v1137_v8 = vpack.c.bf16 %v1036_v5, %v1035_v4 }
 0x1a9   :  { %v679_v9 = vpop.f32.mrb[96].mxu0 }
 0x1aa   :  { %v680_v10 = vadd.f32 %v5599_v29, %v679_v9  ;;  %v4337_v11 = vpop.f32.mrb[97].mxu0  ;;  %4592 = vmatmul.mubr.msk.bf16.gmra.mrb[92].mxu1 %vm1216_vm3, %v1137_v8  ;;  %v208_v9 = vpack.c.bf16 %v139_v62, %v138_v61 }
 0x1ab   :  { %v682_v13 = vpop.f32.mrb[98].mxu0  ;;  %4595 = vmatprep.mubr.msk.bf16.mxu1 %vm5274_vm0, %v5273_v0 }
 0x1ac   :  { %v683_v14 = vadd.f32 %v5599_v29, %v682_v13  ;;  %v4338_v15 = vpop.f32.mrb[99].mxu0  ;;  %v1037_v16 = vmax.f32 %v680_v10, 0.0 }
 0x1ae   :  { %v1038_v17 = vmax.f32 %v683_v14, 0.0  ;;  %4444 = vmatmul.mubr.msk.bf16.gmra.mrb[204].mxu0 %vm259_vm2, %v204_v12 }
 0x1af   :  { %4447 = vmatprep.mubr.msk.bf16.mxu0 %vm5274_vm0, %v5273_v0 }
 0x1b0   :  { %v1138_v20 = vpack.c.bf16 %v1038_v17, %v1037_v16 }
 0x1b1   :  { %v687_v21 = vpop.f32.mrb[100].mxu0 }
 0x1b2   :  { %v688_v22 = vadd.f32 %v5599_v29, %v687_v21  ;;  %v4341_v23 = vpop.f32.mrb[101].mxu0  ;;  %4596 = vmatmul.mubr.msk.bf16.gmra.mrb[96].mxu1 %vm1216_vm3, %v1138_v20  ;;  %v140_v21 = vld [vmem:[%s7305_s0 + $0x380] sm:$0xff] }
 0x1b3   :  { %v690_v25 = vpop.f32.mrb[102].mxu0  ;;  %4599 = vmatprep.mubr.msk.bf16.mxu1 %vm5274_vm0, %v5273_v0 }
 0x1b4   :  { %v691_v26 = vadd.f32 %v5599_v29, %v690_v25  ;;  %v4342_v27 = vpop.f32.mrb[103].mxu0  ;;  %v1039_v28 = vmax.f32 %v688_v22, 0.0  ;;  %v141_v22 = vld [vmem:[%s7305_s0 + $0x388] sm:$0xff] }
 0x1b6   :  { %v1040_v30 = vmax.f32 %v691_v26, 0.0  ;;  %4448 = vmatmul.mubr.msk.bf16.gmra.mrb[208].mxu0 %vm259_vm2, %v205_v24 }
 0x1b7   :  { %4451 = vmatprep.mubr.msk.bf16.mxu0 %vm5274_vm0, %v5273_v0 }
 0x1b8   :  { %v1139_v33 = vpack.c.bf16 %v1040_v30, %v1039_v28 }
 0x1b9   :  { %v695_v34 = vpop.f32.mrb[104].mxu0 }
 0x1ba   :  { %v696_v35 = vadd.f32 %v5599_v29, %v695_v34  ;;  %v4345_v36 = vpop.f32.mrb[105].mxu0  ;;  %4600 = vmatmul.mubr.msk.bf16.gmra.mrb[100].mxu1 %vm1216_vm3, %v1139_v33  ;;  %v209_v34 = vpack.c.bf16 %v141_v22, %v140_v21 }
 0x1bb   :  { %v698_v38 = vpop.f32.mrb[106].mxu0  ;;  %4603 = vmatprep.mubr.msk.bf16.mxu1 %vm5274_vm0, %v5273_v0 }
 0x1bc   :  { %v699_v39 = vadd.f32 %v5599_v29, %v698_v38  ;;  %v4346_v40 = vpop.f32.mrb[107].mxu0  ;;  %v1041_v41 = vmax.f32 %v696_v35, 0.0 }
 0x1be   :  { %v1042_v42 = vmax.f32 %v699_v39, 0.0  ;;  %4452 = vmatmul.mubr.msk.bf16.gmra.mrb[212].mxu0 %vm259_vm2, %v206_v37 }
 0x1bf   :  { %4455 = vmatprep.mubr.msk.bf16.mxu0 %vm5274_vm0, %v5273_v0 }
 0x1c0   :  { %v1140_v45 = vpack.c.bf16 %v1042_v42, %v1041_v41 }
 0x1c1   :  { %v703_v46 = vpop.f32.mrb[108].mxu0 }
 0x1c2   :  { %v704_v47 = vadd.f32 %v5599_v29, %v703_v46  ;;  %v4349_v48 = vpop.f32.mrb[109].mxu0  ;;  %4604 = vmatmul.mubr.msk.bf16.gmra.mrb[104].mxu1 %vm1216_vm3, %v1140_v45  ;;  %v143_v46 = vld [vmem:[%s7305_s0 + $0x398] sm:$0xff] }
 0x1c3   :  { %v706_v50 = vpop.f32.mrb[110].mxu0  ;;  %4607 = vmatprep.mubr.msk.bf16.mxu1 %vm5274_vm0, %v5273_v0 }
 0x1c4   :  { %v707_v52 = vadd.f32 %v5599_v29, %v706_v50  ;;  %v4350_v53 = vpop.f32.mrb[111].mxu0  ;;  %v1043_v55 = vmax.f32 %v704_v47, 0.0 }
 0x1c5   :  { %v1440_v54 = vpop.f32.mrb[0].mxu1 }
 0x1c6   :  { %v1044_v56 = vmax.f32 %v707_v52, 0.0  ;;  %v1441_v57 = vadd.f32 %v5989_v51, %v1440_v54  ;;  %4456 = vmatmul.mubr.msk.bf16.gmra.mrb[216].mxu0 %vm259_vm2, %v207_v49  ;;  %v4501_v58 = vpop.f32.mrb[1].mxu1 }
 0x1c7   :  { %v1443_v59 = vpop.f32.mrb[2].mxu1  ;;  %4459 = vmatprep.mubr.msk.bf16.mxu0 %vm5274_vm0, %v5273_v0 }
 0x1c8   :  { %v1141_v63 = vpack.c.bf16 %v1044_v56, %v1043_v55  ;;  %v1942_v1 = vmax.f32 %v1441_v57, 0.0  ;;  %v1444_v2 = vadd.f32 %v5989_v51, %v1443_v59  ;;  %v4502_v3 = vpop.f32.mrb[3].mxu1  ;;  %v6053_v55 = vld [vmem:[%s7307_s2] ss:$0 sm:$0xff] }
 0x1c9   :  { %v711_v4 = vpop.f32.mrb[112].mxu0 }
 0x1ca   :  { %v1943_v5 = vmax.f32 %v1444_v2, 0.0  ;;  %v712_v6 = vadd.f32 %v5599_v29, %v711_v4  ;;  %v4353_v7 = vpop.f32.mrb[113].mxu0  ;;  %4608 = vmatmul.mubr.msk.bf16.gmra.mrb[108].mxu1 %vm1216_vm3, %v1141_v63  ;;  %v2074_v8 = vmul.f32 %v6001_v60, %v1942_v1 }
 0x1cb   :  { %v714_v10 = vpop.f32.mrb[114].mxu0  ;;  %4611 = vmatprep.mubr.msk.bf16.mxu1 %vm5274_vm0, %v5273_v0 }
 0x1cc   :  { %v715_v11 = vadd.f32 %v5599_v29, %v714_v10  ;;  %v4354_v12 = vpop.f32.mrb[115].mxu0  ;;  %v2199_v13 = vsel %vm1216_vm3, %v2074_v8, 0.0  ;;  %v2075_v14 = vmul.f32 %v6001_v60, %v1943_v5  ;;  %v1045_v16 = vmax.f32 %v712_v6, 0.0  ;;  %v144_v10 = vld [vmem:[%s7305_s0 + $0x3a0] sm:$0xff] }
 0x1cd   :  { %2200 = vadd.xlane.f32.xlu0 %v2199_v13  ;;  %v1448_v15 = vpop.f32.mrb[4].mxu1 }
 0x1ce   :  { %v1046_v17 = vmax.f32 %v715_v11, 0.0  ;;  %v1449_v18 = vadd.f32 %v5989_v51, %v1448_v15  ;;  %4460 = vmatmul.mubr.msk.bf16.gmra.mrb[220].mxu0 %vm259_vm2, %v208_v9  ;;  %v4505_v19 = vpop.f32.mrb[5].mxu1  ;;  %v2202_v27 = vsel %vm1216_vm3, %v2075_v14, 0.0  ;;  %v145_v11 = vld [vmem:[%s7305_s0 + $0x3a8] sm:$0xff] }
 0x1cf   :  { %v1451_v20 = vpop.f32.mrb[6].mxu1  ;;  %4463 = vmatprep.mubr.msk.bf16.mxu0 %vm5274_vm0, %v5273_v0  ;;  %v211_v21 = vpack.c.bf16 %v145_v11, %v144_v10 }
 0x1d0   :  { %v1142_v23 = vpack.c.bf16 %v1046_v17, %v1045_v16  ;;  %v1944_v24 = vmax.f32 %v1449_v18, 0.0  ;;  %v1452_v25 = vadd.f32 %v5989_v51, %v1451_v20  ;;  %v4506_v26 = vpop.f32.mrb[7].mxu1 }
 0x1d1   :  { %2203 = vadd.xlane.f32.xlu0 %v2202_v27  ;;  %v719_v28 = vpop.f32.mrb[116].mxu0 }
 0x1d2   :  { %v1945_v30 = vmax.f32 %v1452_v25, 0.0  ;;  %v720_v31 = vadd.f32 %v5599_v29, %v719_v28  ;;  %v4357_v32 = vpop.f32.mrb[117].mxu0  ;;  %4612 = vmatmul.mubr.msk.bf16.gmra.mrb[112].mxu1 %vm1216_vm3, %v1142_v23  ;;  %v2076_v33 = vmul.f32 %v6001_v60, %v1944_v24 }
 0x1d3   :  { %v722_v35 = vpop.f32.mrb[118].mxu0  ;;  %4615 = vmatprep.mubr.msk.bf16.mxu1 %vm5274_vm0, %v5273_v0 }
 0x1d4   :  { %v723_v36 = vadd.f32 %v5599_v29, %v722_v35  ;;  %v4358_v37 = vpop.f32.mrb[119].mxu0  ;;  %v2205_v38 = vsel %vm1216_vm3, %v2076_v33, 0.0  ;;  %v2077_v39 = vmul.f32 %v6001_v60, %v1945_v30  ;;  %v1047_v41 = vmax.f32 %v720_v31, 0.0  ;;  %v142_v29 = vld [vmem:[%s7305_s0 + $0x390] sm:$0xff] }
 0x1d5   :  { %2206 = vadd.xlane.f32.xlu1 %v2205_v38  ;;  %v1456_v40 = vpop.f32.mrb[8].mxu1  ;;  %v210_v59 = vpack.c.bf16 %v143_v46, %v142_v29  ;;  %v146_v35 = vld [vmem:[%s7305_s0 + $0x3b0] sm:$0xff] }
 0x1d6   :  { %v1048_v42 = vmax.f32 %v723_v36, 0.0  ;;  %v1457_v43 = vadd.f32 %v5989_v51, %v1456_v40  ;;  %4464 = vmatmul.mubr.msk.bf16.gmra.mrb[224].mxu0 %vm259_vm2, %v209_v34  ;;  %v4509_v44 = vpop.f32.mrb[9].mxu1  ;;  %v2208_v52 = vsel %vm1216_vm3, %v2077_v39, 0.0  ;;  %v147_v36 = vld [vmem:[%s7305_s0 + $0x3b8] sm:$0xff] }
 0x1d7   :  { %v1459_v45 = vpop.f32.mrb[10].mxu1  ;;  %4467 = vmatprep.mubr.msk.bf16.mxu0 %vm5274_vm0, %v5273_v0  ;;  %v212_v29 = vpack.c.bf16 %v147_v36, %v146_v35 }
 0x1d8   :  { %v1143_v47 = vpack.c.bf16 %v1048_v42, %v1047_v41  ;;  %v1946_v48 = vmax.f32 %v1457_v43, 0.0  ;;  %v1460_v49 = vadd.f32 %v5989_v51, %v1459_v45  ;;  %v4510_v50 = vpop.f32.mrb[11].mxu1 }
 0x1d9   :  { %2209 = vadd.xlane.f32.xlu1 %v2208_v52  ;;  %v727_v53 = vpop.f32.mrb[120].mxu0 }
 0x1da   :  { %v1947_v54 = vmax.f32 %v1460_v49, 0.0  ;;  %v728_v56 = vadd.f32 %v6053_v55, %v727_v53  ;;  %v4361_v57 = vpop.f32.mrb[121].mxu0  ;;  %4616 = vmatmul.mubr.msk.bf16.gmra.mrb[116].mxu1 %vm1216_vm3, %v1143_v47  ;;  %v2078_v58 = vmul.f32 %v6001_v60, %v1946_v48 }
 0x1db   :  { %v730_v61 = vpop.f32.mrb[122].mxu0  ;;  %4619 = vmatprep.mubr.msk.bf16.mxu1 %vm5274_vm0, %v5273_v0 }
 0x1dc   :  { %v731_v62 = vadd.f32 %v6053_v55, %v730_v61  ;;  %v4362_v63 = vpop.f32.mrb[123].mxu0  ;;  %v2211_v1 = vsel %vm1216_vm3, %v2078_v58, 0.0  ;;  %v2079_v2 = vmul.f32 %v6001_v60, %v1947_v54  ;;  %v1049_v4 = vmax.f32 %v728_v56, 0.0  ;;  %v148_v61 = vld [vmem:[%s7305_s0 + $0x3c0] sm:$0xff] }
 0x1dd   :  { %2212 = vadd.xlane.f32.xlu0 %v2211_v1  ;;  %v1464_v3 = vpop.f32.mrb[12].mxu1 }
 0x1de   :  { %v1050_v5 = vmax.f32 %v731_v62, 0.0  ;;  %v1465_v6 = vadd.f32 %v5989_v51, %v1464_v3  ;;  %4468 = vmatmul.mubr.msk.bf16.gmra.mrb[228].mxu0 %vm259_vm2, %v210_v59  ;;  %v4513_v7 = vpop.f32.mrb[13].mxu1  ;;  %v2214_v8 = vsel %vm1216_vm3, %v2079_v2, 0.0  ;;  %v149_v62 = vld [vmem:[%s7305_s0 + $0x3c8] sm:$0xff] }
 0x1df   :  { %2215 = vadd.xlane.f32.xlu1 %v2214_v8  ;;  %v1467_v9 = vpop.f32.mrb[14].mxu1  ;;  %4471 = vmatprep.mubr.msk.bf16.mxu0 %vm5274_vm0, %v5273_v0 }
 0x1e0   :  { %v1144_v12 = vpack.c.bf16 %v1050_v5, %v1049_v4  ;;  %v1948_v13 = vmax.f32 %v1465_v6, 0.0  ;;  %v1468_v14 = vadd.f32 %v5989_v51, %v1467_v9  ;;  %v4514_v15 = vpop.f32.mrb[15].mxu1  ;;  %v213_v9 = vpack.c.bf16 %v149_v62, %v148_v61 }
 0x1e1   :  { %v735_v16 = vpop.f32.mrb[124].mxu0 }
 0x1e2   :  { %v1949_v17 = vmax.f32 %v1468_v14, 0.0  ;;  %v736_v18 = vadd.f32 %v6053_v55, %v735_v16  ;;  %v4365_v19 = vpop.f32.mrb[125].mxu0  ;;  %4620 = vmatmul.mubr.msk.bf16.gmra.mrb[120].mxu1 %vm1216_vm3, %v1144_v12  ;;  %v2080_v20 = vmul.f32 %v6001_v60, %v1948_v13 }
 0x1e3   :  { %v738_v22 = vpop.f32.mrb[126].mxu0  ;;  %4623 = vmatprep.mubr.msk.bf16.mxu1 %vm5274_vm0, %v5273_v0 }
 0x1e4   :  { %v739_v23 = vadd.f32 %v6053_v55, %v738_v22  ;;  %v4366_v24 = vpop.f32.mrb[127].mxu0  ;;  %v2217_v25 = vsel %vm1216_vm3, %v2080_v20, 0.0  ;;  %v2081_v26 = vmul.f32 %v6001_v60, %v1949_v17  ;;  %v1051_v28 = vmax.f32 %v736_v18, 0.0  ;;  %v150_v22 = vld [vmem:[%s7305_s0 + $0x3d0] sm:$0xff] }
 0x1e5   :  { %2218 = vadd.xlane.f32.xlu0 %v2217_v25  ;;  %v1472_v27 = vpop.f32.mrb[16].mxu1 }
 0x1e6   :  { %v1052_v30 = vmax.f32 %v739_v23, 0.0  ;;  %v1473_v31 = vadd.f32 %v5989_v51, %v1472_v27  ;;  %4472 = vmatmul.mubr.msk.bf16.gmra.mrb[232].mxu0 %vm259_vm2, %v211_v21  ;;  %v4517_v32 = vpop.f32.mrb[17].mxu1  ;;  %v2220_v33 = vsel %vm1216_vm3, %v2081_v26, 0.0  ;;  %v151_v23 = vld [vmem:[%s7305_s0 + $0x3d8] sm:$0xff] }
 0x1e7   :  { %2221 = vadd.xlane.f32.xlu1 %v2220_v33  ;;  %v1475_v34 = vpop.f32.mrb[18].mxu1  ;;  %4475 = vmatprep.mubr.msk.bf16.mxu0 %vm5274_vm0, %v5273_v0 }
 0x1e8   :  { %v1145_v37 = vpack.c.bf16 %v1052_v30, %v1051_v28  ;;  %v1950_v38 = vmax.f32 %v1473_v31, 0.0  ;;  %v1476_v39 = vadd.f32 %v5989_v51, %v1475_v34  ;;  %v4518_v40 = vpop.f32.mrb[19].mxu1  ;;  %v214_v34 = vpack.c.bf16 %v151_v23, %v150_v22 }
 0x1e9   :  { %v743_v41 = vpop.f32.mrb[128].mxu0 }
 0x1ea   :  { %v1951_v42 = vmax.f32 %v1476_v39, 0.0  ;;  %v744_v43 = vadd.f32 %v6053_v55, %v743_v41  ;;  %v4369_v44 = vpop.f32.mrb[129].mxu0  ;;  %4624 = vmatmul.mubr.msk.bf16.gmra.mrb[124].mxu1 %vm1216_vm3, %v1145_v37  ;;  %v2082_v45 = vmul.f32 %v6001_v60, %v1950_v38 }
 0x1eb   :  { %v746_v46 = vpop.f32.mrb[130].mxu0  ;;  %4627 = vmatprep.mubr.msk.bf16.mxu1 %vm5274_vm0, %v5273_v0 }
 0x1ec   :  { %v747_v47 = vadd.f32 %v6053_v55, %v746_v46  ;;  %v4370_v48 = vpop.f32.mrb[131].mxu0  ;;  %v2223_v49 = vsel %vm1216_vm3, %v2082_v45, 0.0  ;;  %v2083_v50 = vmul.f32 %v6001_v60, %v1951_v42  ;;  %v1053_v53 = vmax.f32 %v744_v43, 0.0  ;;  %v152_v46 = vld [vmem:[%s7305_s0 + $0x3e0] sm:$0xff] }
 0x1ed   :  { %2224 = vadd.xlane.f32.xlu0 %v2223_v49  ;;  %v1480_v52 = vpop.f32.mrb[20].mxu1 }
 0x1ee   :  { %v1054_v54 = vmax.f32 %v747_v47, 0.0  ;;  %v1481_v56 = vadd.f32 %v5989_v51, %v1480_v52  ;;  %4476 = vmatmul.mubr.msk.bf16.gmra.mrb[236].mxu0 %vm259_vm2, %v212_v29  ;;  %v4521_v57 = vpop.f32.mrb[21].mxu1  ;;  %v2226_v58 = vsel %vm1216_vm3, %v2083_v50, 0.0 }
 0x1ef   :  { %2227 = vadd.xlane.f32.xlu1 %v2226_v58  ;;  %v1483_v59 = vpop.f32.mrb[22].mxu1  ;;  %4479 = vmatprep.mubr.msk.bf16.mxu0 %vm5274_vm0, %v5273_v0  ;;  %v215_v58 = vpack.c.bf16 %v152_v46, %v152_v46 }
 0x1f0   :  { %v1146_v63 = vpack.c.bf16 %v1054_v54, %v1053_v53  ;;  %v1952_v1 = vmax.f32 %v1481_v56, 0.0  ;;  %v1484_v2 = vadd.f32 %v5989_v51, %v1483_v59  ;;  %v4522_v3 = vpop.f32.mrb[23].mxu1 }
 0x1f1   :  { %v751_v4 = vpop.f32.mrb[132].mxu0 }
 0x1f2   :  { %v1953_v5 = vmax.f32 %v1484_v2, 0.0  ;;  %v752_v6 = vadd.f32 %v6053_v55, %v751_v4  ;;  %v4373_v7 = vpop.f32.mrb[133].mxu0  ;;  %4628 = vmatmul.mubr.msk.bf16.gmra.mrb[128].mxu1 %vm1216_vm3, %v1146_v63  ;;  %v2084_v8 = vmul.f32 %v6001_v60, %v1952_v1 }
 0x1f3   :  { %v754_v10 = vpop.f32.mrb[134].mxu0  ;;  %4631 = vmatprep.mubr.msk.bf16.mxu1 %vm5274_vm0, %v5273_v0 }
 0x1f4   :  { %v755_v11 = vadd.f32 %v6053_v55, %v754_v10  ;;  %v4374_v12 = vpop.f32.mrb[135].mxu0  ;;  %v2229_v13 = vsel %vm1216_vm3, %v2084_v8, 0.0  ;;  %v2085_v14 = vmul.f32 %v6001_v60, %v1953_v5  ;;  %v1055_v16 = vmax.f32 %v752_v6, 0.0 }
 0x1f5   :  { %2230 = vadd.xlane.f32.xlu0 %v2229_v13  ;;  %v1488_v15 = vpop.f32.mrb[24].mxu1 }
 0x1f6   :  { %v1056_v17 = vmax.f32 %v755_v11, 0.0  ;;  %v1489_v18 = vadd.f32 %v5989_v51, %v1488_v15  ;;  %4480 = vmatmul.mubr.msk.bf16.gmra.mrb[240].mxu0 %vm259_vm2, %v213_v9  ;;  %v4525_v19 = vpop.f32.mrb[25].mxu1  ;;  %v2232_v20 = vsel %vm1216_vm3, %v2085_v14, 0.0 }
 0x1f7   :  { %2233 = vadd.xlane.f32.xlu1 %v2232_v20  ;;  %v1491_v21 = vpop.f32.mrb[26].mxu1  ;;  %4483 = vmatprep.mubr.msk.bf16.mxu0 %vm5274_vm0, %v5273_v0 }
 0x1f8   :  { %v1147_v24 = vpack.c.bf16 %v1056_v17, %v1055_v16  ;;  %v1954_v25 = vmax.f32 %v1489_v18, 0.0  ;;  %v1492_v26 = vadd.f32 %v5989_v51, %v1491_v21  ;;  %v4526_v27 = vpop.f32.mrb[27].mxu1 }
 0x1f9   :  { %v759_v28 = vpop.f32.mrb[136].mxu0 }
 0x1fa   :  { %v1955_v30 = vmax.f32 %v1492_v26, 0.0  ;;  %v760_v31 = vadd.f32 %v6053_v55, %v759_v28  ;;  %v4377_v32 = vpop.f32.mrb[137].mxu0  ;;  %4632 = vmatmul.mubr.msk.bf16.gmra.mrb[132].mxu1 %vm1216_vm3, %v1147_v24  ;;  %v2086_v33 = vmul.f32 %v6001_v60, %v1954_v25 }
 0x1fb   :  { %v762_v35 = vpop.f32.mrb[138].mxu0  ;;  %4635 = vmatprep.mubr.msk.bf16.mxu1 %vm5274_vm0, %v5273_v0 }
 0x1fc   :  { %v763_v36 = vadd.f32 %v6053_v55, %v762_v35  ;;  %v4378_v37 = vpop.f32.mrb[139].mxu0  ;;  %v2235_v38 = vsel %vm1216_vm3, %v2086_v33, 0.0  ;;  %v2087_v39 = vmul.f32 %v6001_v60, %v1955_v30  ;;  %v1057_v41 = vmax.f32 %v760_v31, 0.0 }
 0x1fd   :  { %2236 = vadd.xlane.f32.xlu0 %v2235_v38  ;;  %v1496_v40 = vpop.f32.mrb[28].mxu1 }
 0x1fe   :  { %v1058_v42 = vmax.f32 %v763_v36, 0.0  ;;  %v1497_v43 = vadd.f32 %v5989_v51, %v1496_v40  ;;  %4484 = vmatmul.mubr.msk.bf16.gmra.mrb[244].mxu0 %vm259_vm2, %v214_v34  ;;  %v4529_v44 = vpop.f32.mrb[29].mxu1  ;;  %v2238_v45 = vsel %vm1216_vm3, %v2087_v39, 0.0 }
 0x1ff   :  { %2239 = vadd.xlane.f32.xlu1 %v2238_v45  ;;  %v1499_v29 = vpop.f32.mrb[30].mxu1  ;;  %4487 = vmatprep.mubr.msk.bf16.mxu0 %vm5274_vm0, %v5273_v0 }
 0x200   :  { %v1148_v47 = vpack.c.bf16 %v1058_v42, %v1057_v41  ;;  %v1956_v48 = vmax.f32 %v1497_v43, 0.0  ;;  %v1500_v49 = vadd.f32 %v5989_v51, %v1499_v29  ;;  %v4530_v50 = vpop.f32.mrb[31].mxu1 }
 0x201   :  { %v767_v52 = vpop.f32.mrb[140].mxu0 }
 0x202   :  { %v1957_v53 = vmax.f32 %v1500_v49, 0.0  ;;  %v768_v54 = vadd.f32 %v6053_v55, %v767_v52  ;;  %v4381_v56 = vpop.f32.mrb[141].mxu0  ;;  %4636 = vmatmul.mubr.msk.bf16.gmra.mrb[136].mxu1 %vm1216_vm3, %v1148_v47  ;;  %v2088_v57 = vmul.f32 %v6001_v60, %v1956_v48 }
 0x203   :  { %v770_v59 = vpop.f32.mrb[142].mxu0  ;;  %4639 = vmatprep.mubr.msk.bf16.mxu1 %vm5274_vm0, %v5273_v0 }
 0x204   :  { %v771_v61 = vadd.f32 %v6053_v55, %v770_v59  ;;  %v4382_v62 = vpop.f32.mrb[143].mxu0  ;;  %v2241_v63 = vsel %vm1216_vm3, %v2088_v57, 0.0  ;;  %v2089_v1 = vmul.f32 %v6001_v60, %v1957_v53  ;;  %v1059_v3 = vmax.f32 %v768_v54, 0.0 }
 0x205   :  { %2242 = vadd.xlane.f32.xlu0 %v2241_v63  ;;  %v1504_v2 = vpop.f32.mrb[32].mxu1 }
 0x206   :  { %v1060_v4 = vmax.f32 %v771_v61, 0.0  ;;  %v1505_v5 = vadd.f32 %v5989_v51, %v1504_v2  ;;  %4488 = vmatmul.mubr.msk.bf16.gmra.mrb[248].mxu0 %vm259_vm2, %v215_v58  ;;  %v4533_v6 = vpop.f32.mrb[33].mxu1  ;;  %v2244_v7 = vsel %vm1216_vm3, %v2089_v1, 0.0 }
 0x207   :  { %2245 = vadd.xlane.f32.xlu1 %v2244_v7  ;;  %v1507_v8 = vpop.f32.mrb[34].mxu1 }
 0x208   :  { %v1149_v9 = vpack.c.bf16 %v1060_v4, %v1059_v3  ;;  %v1958_v10 = vmax.f32 %v1505_v5, 0.0  ;;  %v1508_v11 = vadd.f32 %v5989_v51, %v1507_v8  ;;  %v4534_v12 = vpop.f32.mrb[35].mxu1 }
 0x209   :  { %v775_v13 = vpop.f32.mrb[144].mxu0 }
 0x20a   :  { %v1959_v14 = vmax.f32 %v1508_v11, 0.0  ;;  %v776_v15 = vadd.f32 %v6053_v55, %v775_v13  ;;  %v4385_v16 = vpop.f32.mrb[145].mxu0  ;;  %4640 = vmatmul.mubr.msk.bf16.gmra.mrb[140].mxu1 %vm1216_vm3, %v1149_v9  ;;  %v2090_v17 = vmul.f32 %v6001_v60, %v1958_v10 }
 0x20b   :  { %v778_v18 = vpop.f32.mrb[146].mxu0  ;;  %4643 = vmatprep.mubr.msk.bf16.mxu1 %vm5274_vm0, %v5273_v0 }
 0x20c   :  { %v779_v19 = vadd.f32 %v6053_v55, %v778_v18  ;;  %v4386_v20 = vpop.f32.mrb[147].mxu0  ;;  %v2247_v21 = vsel %vm1216_vm3, %v2090_v17, 0.0  ;;  %v2091_v22 = vmul.f32 %v6001_v60, %v1959_v14  ;;  %v1061_v24 = vmax.f32 %v776_v15, 0.0 }
 0x20d   :  { %2248 = vadd.xlane.f32.xlu0 %v2247_v21  ;;  %v1512_v23 = vpop.f32.mrb[36].mxu1 }
 0x20e   :  { %v1062_v25 = vmax.f32 %v779_v19, 0.0  ;;  %v1513_v26 = vadd.f32 %v5989_v51, %v1512_v23  ;;  %v4537_v27 = vpop.f32.mrb[37].mxu1  ;;  %v2250_v28 = vsel %vm1216_vm3, %v2091_v22, 0.0 }
 0x20f   :  { %2251 = vadd.xlane.f32.xlu1 %v2250_v28  ;;  %v1515_v30 = vpop.f32.mrb[38].mxu1 }
 0x210   :  { %v1150_v31 = vpack.c.bf16 %v1062_v25, %v1061_v24  ;;  %v1960_v32 = vmax.f32 %v1513_v26, 0.0  ;;  %v1516_v33 = vadd.f32 %v5989_v51, %v1515_v30  ;;  %v4538_v34 = vpop.f32.mrb[39].mxu1 }
 0x211   :  { %v783_v35 = vpop.f32.mrb[148].mxu0 }
 0x212   :  { %v1961_v36 = vmax.f32 %v1516_v33, 0.0  ;;  %v784_v37 = vadd.f32 %v6053_v55, %v783_v35  ;;  %v4389_v38 = vpop.f32.mrb[149].mxu0  ;;  %4644 = vmatmul.mubr.msk.bf16.gmra.mrb[144].mxu1 %vm1216_vm3, %v1150_v31  ;;  %v2092_v39 = vmul.f32 %v6001_v60, %v1960_v32 }
 0x213   :  { %v786_v40 = vpop.f32.mrb[150].mxu0  ;;  %4647 = vmatprep.mubr.msk.bf16.mxu1 %vm5274_vm0, %v5273_v0 }
 0x214   :  { %v787_v41 = vadd.f32 %v6053_v55, %v786_v40  ;;  %v4390_v42 = vpop.f32.mrb[151].mxu0  ;;  %v2253_v43 = vsel %vm1216_vm3, %v2092_v39, 0.0  ;;  %v2093_v44 = vmul.f32 %v6001_v60, %v1961_v36  ;;  %v1063_v29 = vmax.f32 %v784_v37, 0.0 }
 0x215   :  { %2254 = vadd.xlane.f32.xlu0 %v2253_v43  ;;  %v1520_v45 = vpop.f32.mrb[40].mxu1 }
 0x216   :  { %v1064_v46 = vmax.f32 %v787_v41, 0.0  ;;  %v1521_v47 = vadd.f32 %v5989_v51, %v1520_v45  ;;  %v4541_v48 = vpop.f32.mrb[41].mxu1  ;;  %v2256_v49 = vsel %vm1216_vm3, %v2093_v44, 0.0 }
 0x217   :  { %2257 = vadd.xlane.f32.xlu1 %v2256_v49  ;;  %v1523_v50 = vpop.f32.mrb[42].mxu1 }
 0x218   :  { %v1151_v52 = vpack.c.bf16 %v1064_v46, %v1063_v29  ;;  %v1962_v53 = vmax.f32 %v1521_v47, 0.0  ;;  %v1524_v54 = vadd.f32 %v5989_v51, %v1523_v50  ;;  %v4542_v56 = vpop.f32.mrb[43].mxu1 }
 0x219   :  { %v791_v57 = vpop.f32.mrb[152].mxu0 }
 0x21a   :  { %v1963_v58 = vmax.f32 %v1524_v54, 0.0  ;;  %v792_v59 = vadd.f32 %v6053_v55, %v791_v57  ;;  %v4393_v61 = vpop.f32.mrb[153].mxu0  ;;  %4648 = vmatmul.mubr.msk.bf16.gmra.mrb[148].mxu1 %vm1216_vm3, %v1151_v52  ;;  %v2094_v62 = vmul.f32 %v6001_v60, %v1962_v53 }
 0x21b   :  { %v794_v63 = vpop.f32.mrb[154].mxu0  ;;  %4651 = vmatprep.mubr.msk.bf16.mxu1 %vm5274_vm0, %v5273_v0 }
 0x21c   :  { %v795_v1 = vadd.f32 %v6053_v55, %v794_v63  ;;  %v4394_v2 = vpop.f32.mrb[155].mxu0  ;;  %v2259_v3 = vsel %vm1216_vm3, %v2094_v62, 0.0  ;;  %v2095_v4 = vmul.f32 %v6001_v60, %v1963_v58  ;;  %v1065_v6 = vmax.f32 %v792_v59, 0.0 }
 0x21d   :  { %2260 = vadd.xlane.f32.xlu0 %v2259_v3  ;;  %v1528_v5 = vpop.f32.mrb[44].mxu1 }
 0x21e   :  { %v1066_v7 = vmax.f32 %v795_v1, 0.0  ;;  %v1529_v8 = vadd.f32 %v5989_v51, %v1528_v5  ;;  %v4545_v9 = vpop.f32.mrb[45].mxu1  ;;  %v2262_v10 = vsel %vm1216_vm3, %v2095_v4, 0.0 }
 0x21f   :  { %2263 = vadd.xlane.f32.xlu1 %v2262_v10  ;;  %v1531_v11 = vpop.f32.mrb[46].mxu1 }
 0x220   :  { %v1152_v12 = vpack.c.bf16 %v1066_v7, %v1065_v6  ;;  %v1964_v13 = vmax.f32 %v1529_v8, 0.0  ;;  %v1532_v14 = vadd.f32 %v5989_v51, %v1531_v11  ;;  %v4546_v15 = vpop.f32.mrb[47].mxu1 }
 0x221   :  { %v799_v16 = vpop.f32.mrb[156].mxu0 }
 0x222   :  { %v1965_v17 = vmax.f32 %v1532_v14, 0.0  ;;  %v800_v18 = vadd.f32 %v6053_v55, %v799_v16  ;;  %v4397_v19 = vpop.f32.mrb[157].mxu0  ;;  %4652 = vmatmul.mubr.msk.bf16.gmra.mrb[152].mxu1 %vm1216_vm3, %v1152_v12  ;;  %v2096_v20 = vmul.f32 %v6001_v60, %v1964_v13 }
 0x223   :  { %v802_v21 = vpop.f32.mrb[158].mxu0  ;;  %4655 = vmatprep.mubr.msk.bf16.mxu1 %vm5274_vm0, %v5273_v0 }
 0x224   :  { %v803_v22 = vadd.f32 %v6053_v55, %v802_v21  ;;  %v4398_v23 = vpop.f32.mrb[159].mxu0  ;;  %v2265_v24 = vsel %vm1216_vm3, %v2096_v20, 0.0  ;;  %v2097_v25 = vmul.f32 %v6001_v60, %v1965_v17  ;;  %v1067_v27 = vmax.f32 %v800_v18, 0.0 }
 0x225   :  { %2266 = vadd.xlane.f32.xlu0 %v2265_v24  ;;  %v1536_v26 = vpop.f32.mrb[48].mxu1 }
 0x226   :  { %v1068_v28 = vmax.f32 %v803_v22, 0.0  ;;  %v1537_v30 = vadd.f32 %v5989_v51, %v1536_v26  ;;  %v4549_v31 = vpop.f32.mrb[49].mxu1  ;;  %v2268_v32 = vsel %vm1216_vm3, %v2097_v25, 0.0 }
 0x227   :  { %2269 = vadd.xlane.f32.xlu1 %v2268_v32  ;;  %v1539_v33 = vpop.f32.mrb[50].mxu1 }
 0x228   :  { %v1153_v34 = vpack.c.bf16 %v1068_v28, %v1067_v27  ;;  %v1966_v35 = vmax.f32 %v1537_v30, 0.0  ;;  %v1540_v36 = vadd.f32 %v5989_v51, %v1539_v33  ;;  %v4550_v37 = vpop.f32.mrb[51].mxu1 }
 0x229   :  { %v807_v38 = vpop.f32.mrb[160].mxu0 }
 0x22a   :  { %v1967_v39 = vmax.f32 %v1540_v36, 0.0  ;;  %v808_v40 = vadd.f32 %v6053_v55, %v807_v38  ;;  %v4401_v41 = vpop.f32.mrb[161].mxu0  ;;  %4656 = vmatmul.mubr.msk.bf16.gmra.mrb[156].mxu1 %vm1216_vm3, %v1153_v34  ;;  %v2098_v42 = vmul.f32 %v6001_v60, %v1966_v35 }
 0x22b   :  { %v810_v43 = vpop.f32.mrb[162].mxu0  ;;  %4659 = vmatprep.mubr.msk.bf16.mxu1 %vm5274_vm0, %v5273_v0 }
 0x22c   :  { %v811_v44 = vadd.f32 %v6053_v55, %v810_v43  ;;  %v4402_v45 = vpop.f32.mrb[163].mxu0  ;;  %v2271_v29 = vsel %vm1216_vm3, %v2098_v42, 0.0  ;;  %v2099_v46 = vmul.f32 %v6001_v60, %v1967_v39  ;;  %v1069_v48 = vmax.f32 %v808_v40, 0.0 }
 0x22d   :  { %2272 = vadd.xlane.f32.xlu0 %v2271_v29  ;;  %v1544_v47 = vpop.f32.mrb[52].mxu1 }
 0x22e   :  { %v1070_v49 = vmax.f32 %v811_v44, 0.0  ;;  %v1545_v50 = vadd.f32 %v5989_v51, %v1544_v47  ;;  %v4553_v52 = vpop.f32.mrb[53].mxu1  ;;  %v2274_v53 = vsel %vm1216_vm3, %v2099_v46, 0.0 }
 0x22f   :  { %2275 = vadd.xlane.f32.xlu1 %v2274_v53  ;;  %v1547_v54 = vpop.f32.mrb[54].mxu1 }
 0x230   :  { %v1154_v56 = vpack.c.bf16 %v1070_v49, %v1069_v48  ;;  %v1968_v57 = vmax.f32 %v1545_v50, 0.0  ;;  %v1548_v58 = vadd.f32 %v5989_v51, %v1547_v54  ;;  %v4554_v59 = vpop.f32.mrb[55].mxu1 }
 0x231   :  { %v815_v61 = vpop.f32.mrb[164].mxu0 }
 0x232   :  { %v1969_v62 = vmax.f32 %v1548_v58, 0.0  ;;  %v816_v63 = vadd.f32 %v6053_v55, %v815_v61  ;;  %v4405_v1 = vpop.f32.mrb[165].mxu0  ;;  %4660 = vmatmul.mubr.msk.bf16.gmra.mrb[160].mxu1 %vm1216_vm3, %v1154_v56  ;;  %v2100_v2 = vmul.f32 %v6001_v60, %v1968_v57 }
 0x233   :  { %v818_v3 = vpop.f32.mrb[166].mxu0  ;;  %4663 = vmatprep.mubr.msk.bf16.mxu1 %vm5274_vm0, %v5273_v0 }
 0x234   :  { %v819_v4 = vadd.f32 %v6053_v55, %v818_v3  ;;  %v4406_v5 = vpop.f32.mrb[167].mxu0  ;;  %v2277_v6 = vsel %vm1216_vm3, %v2100_v2, 0.0  ;;  %v2101_v7 = vmul.f32 %v6001_v60, %v1969_v62  ;;  %v1071_v9 = vmax.f32 %v816_v63, 0.0 }
 0x235   :  { %2278 = vadd.xlane.f32.xlu0 %v2277_v6  ;;  %v1552_v8 = vpop.f32.mrb[56].mxu1 }
 0x236   :  { %v1072_v10 = vmax.f32 %v819_v4, 0.0  ;;  %v1553_v11 = vadd.f32 %v5989_v51, %v1552_v8  ;;  %v4557_v12 = vpop.f32.mrb[57].mxu1  ;;  %v2280_v13 = vsel %vm1216_vm3, %v2101_v7, 0.0 }
 0x237   :  { %2281 = vadd.xlane.f32.xlu1 %v2280_v13  ;;  %v1555_v14 = vpop.f32.mrb[58].mxu1 }
 0x238   :  { %v1155_v15 = vpack.c.bf16 %v1072_v10, %v1071_v9  ;;  %v1970_v16 = vmax.f32 %v1553_v11, 0.0  ;;  %v1556_v17 = vadd.f32 %v5989_v51, %v1555_v14  ;;  %v4558_v18 = vpop.f32.mrb[59].mxu1 }
 0x239   :  { %v823_v19 = vpop.f32.mrb[168].mxu0 }
 0x23a   :  { %v1971_v20 = vmax.f32 %v1556_v17, 0.0  ;;  %v824_v21 = vadd.f32 %v6053_v55, %v823_v19  ;;  %v4409_v22 = vpop.f32.mrb[169].mxu0  ;;  %4664 = vmatmul.mubr.msk.bf16.gmra.mrb[164].mxu1 %vm1216_vm3, %v1155_v15  ;;  %v2102_v23 = vmul.f32 %v6001_v60, %v1970_v16 }
 0x23b   :  { %v826_v24 = vpop.f32.mrb[170].mxu0  ;;  %4667 = vmatprep.mubr.msk.bf16.mxu1 %vm5274_vm0, %v5273_v0 }
 0x23c   :  { %v827_v25 = vadd.f32 %v6053_v55, %v826_v24  ;;  %v4410_v26 = vpop.f32.mrb[171].mxu0  ;;  %v2283_v27 = vsel %vm1216_vm3, %v2102_v23, 0.0  ;;  %v2103_v28 = vmul.f32 %v6001_v60, %v1971_v20  ;;  %v1073_v31 = vmax.f32 %v824_v21, 0.0 }
 0x23d   :  { %2284 = vadd.xlane.f32.xlu0 %v2283_v27  ;;  %v1560_v30 = vpop.f32.mrb[60].mxu1 }
 0x23e   :  { %v1074_v32 = vmax.f32 %v827_v25, 0.0  ;;  %v1561_v33 = vadd.f32 %v5989_v51, %v1560_v30  ;;  %v4561_v34 = vpop.f32.mrb[61].mxu1  ;;  %v2286_v35 = vsel %vm1216_vm3, %v2103_v28, 0.0 }
 0x23f   :  { %2287 = vadd.xlane.f32.xlu1 %v2286_v35  ;;  %v1563_v36 = vpop.f32.mrb[62].mxu1 }
 0x240   :  { %v1156_v37 = vpack.c.bf16 %v1074_v32, %v1073_v31  ;;  %v1972_v38 = vmax.f32 %v1561_v33, 0.0  ;;  %v1564_v39 = vadd.f32 %v5989_v51, %v1563_v36  ;;  %v4562_v40 = vpop.f32.mrb[63].mxu1 }
 0x241   :  { %v831_v41 = vpop.f32.mrb[172].mxu0 }
 0x242   :  { %v1973_v42 = vmax.f32 %v1564_v39, 0.0  ;;  %v832_v43 = vadd.f32 %v6053_v55, %v831_v41  ;;  %v4413_v44 = vpop.f32.mrb[173].mxu0  ;;  %4668 = vmatmul.mubr.msk.bf16.gmra.mrb[168].mxu1 %vm1216_vm3, %v1156_v37  ;;  %v2104_v45 = vmul.f32 %v6001_v60, %v1972_v38 }
 0x243   :  { %v834_v29 = vpop.f32.mrb[174].mxu0  ;;  %4671 = vmatprep.mubr.msk.bf16.mxu1 %vm5274_vm0, %v5273_v0  ;;  %v6277_v44 = vstv %s7310_s6 }
 0x244   :  { %v835_v46 = vadd.f32 %v6053_v55, %v834_v29  ;;  %v4414_v47 = vpop.f32.mrb[175].mxu0  ;;  %v2289_v48 = vsel %vm1216_vm3, %v2104_v45, 0.0  ;;  %v2105_v49 = vmul.f32 %v6001_v60, %v1973_v42  ;;  %v1075_v52 = vmax.f32 %v832_v43, 0.0 }
 0x245   :  { %2290 = vadd.xlane.f32.xlu0 %v2289_v48  ;;  %v1568_v50 = vpop.f32.mrb[64].mxu1 }
 0x246   :  { %v1076_v53 = vmax.f32 %v835_v46, 0.0  ;;  %v1569_v54 = vadd.f32 %v5989_v51, %v1568_v50  ;;  %v4565_v56 = vpop.f32.mrb[65].mxu1  ;;  %v2292_v57 = vsel %vm1216_vm3, %v2105_v49, 0.0 }
 0x247   :  { %2293 = vadd.xlane.f32.xlu1 %v2292_v57  ;;  %v1571_v58 = vpop.f32.mrb[66].mxu1 }
 0x248   :  { %v1157_v59 = vpack.c.bf16 %v1076_v53, %v1075_v52  ;;  %v1974_v61 = vmax.f32 %v1569_v54, 0.0  ;;  %v1572_v62 = vadd.f32 %v5989_v51, %v1571_v58  ;;  %v4566_v63 = vpop.f32.mrb[67].mxu1 }
 0x249   :  { %v839_v1 = vpop.f32.mrb[176].mxu0 }
 0x24a   :  { %v1975_v2 = vmax.f32 %v1572_v62, 0.0  ;;  %v840_v3 = vadd.f32 %v6053_v55, %v839_v1  ;;  %v4417_v4 = vpop.f32.mrb[177].mxu0  ;;  %4672 = vmatmul.mubr.msk.bf16.gmra.mrb[172].mxu1 %vm1216_vm3, %v1157_v59  ;;  %v2106_v5 = vmul.f32 %v6001_v60, %v1974_v61  ;;  %v6291_v62 = vld [vmem:[%s7308_s4] ss:$0 sm:$0xff] }
 0x24b   :  { %v842_v6 = vpop.f32.mrb[178].mxu0  ;;  %4675 = vmatprep.mubr.msk.bf16.mxu1 %vm5274_vm0, %v5273_v0 }
 0x24c   :  { %v843_v7 = vadd.f32 %v6053_v55, %v842_v6  ;;  %v4418_v8 = vpop.f32.mrb[179].mxu0  ;;  %v2295_v9 = vsel %vm1216_vm3, %v2106_v5, 0.0  ;;  %v2107_v10 = vmul.f32 %v6001_v60, %v1975_v2  ;;  %v1077_v12 = vmax.f32 %v840_v3, 0.0 }
 0x24d   :  { %2296 = vadd.xlane.f32.xlu0 %v2295_v9  ;;  %v1576_v11 = vpop.f32.mrb[68].mxu1 }
 0x24e   :  { %v1078_v13 = vmax.f32 %v843_v7, 0.0  ;;  %v1577_v14 = vadd.f32 %v5989_v51, %v1576_v11  ;;  %v4569_v15 = vpop.f32.mrb[69].mxu1  ;;  %v2298_v16 = vsel %vm1216_vm3, %v2107_v10, 0.0 }
 0x24f   :  { %2299 = vadd.xlane.f32.xlu1 %v2298_v16  ;;  %v1579_v17 = vpop.f32.mrb[70].mxu1  ;;  %v6302_v15 = vld [vmem:[%s7309_s5] ss:$0 sm:$0xff] }
 0x250   :  { %v1158_v18 = vpack.c.bf16 %v1078_v13, %v1077_v12  ;;  %v1976_v19 = vmax.f32 %v1577_v14, 0.0  ;;  %v1580_v20 = vadd.f32 %v5989_v51, %v1579_v17  ;;  %v4570_v21 = vpop.f32.mrb[71].mxu1 }
 0x251   :  { %v847_v22 = vpop.f32.mrb[180].mxu0 }
 0x252   :  { %v1977_v23 = vmax.f32 %v1580_v20, 0.0  ;;  %v848_v24 = vadd.f32 %v6053_v55, %v847_v22  ;;  %v4421_v25 = vpop.f32.mrb[181].mxu0  ;;  %4676 = vmatmul.mubr.msk.bf16.gmra.mrb[176].mxu1 %vm1216_vm3, %v1158_v18  ;;  %v2108_v26 = vmul.f32 %v6001_v60, %v1976_v19 }
 0x253   :  { %v850_v27 = vpop.f32.mrb[182].mxu0  ;;  %4679 = vmatprep.mubr.msk.bf16.mxu1 %vm5274_vm0, %v5273_v0 }
 0x254   :  { %v851_v28 = vadd.f32 %v6053_v55, %v850_v27  ;;  %v4422_v30 = vpop.f32.mrb[183].mxu0  ;;  %v2301_v31 = vsel %vm1216_vm3, %v2108_v26, 0.0  ;;  %v2109_v32 = vmul.f32 %v6001_v60, %v1977_v23  ;;  %v1079_v34 = vmax.f32 %v848_v24, 0.0 }
 0x255   :  { %2302 = vadd.xlane.f32.xlu0 %v2301_v31  ;;  %v1584_v33 = vpop.f32.mrb[72].mxu1 }
 0x256   :  { %v1080_v35 = vmax.f32 %v851_v28, 0.0  ;;  %v1585_v36 = vadd.f32 %v5989_v51, %v1584_v33  ;;  %v4573_v37 = vpop.f32.mrb[73].mxu1  ;;  %v2304_v38 = vsel %vm1216_vm3, %v2109_v32, 0.0 }
 0x257   :  { %2305 = vadd.xlane.f32.xlu1 %v2304_v38  ;;  %v1587_v39 = vpop.f32.mrb[74].mxu1 }
 0x258   :  { %v1159_v40 = vpack.c.bf16 %v1080_v35, %v1079_v34  ;;  %v1978_v41 = vmax.f32 %v1585_v36, 0.0  ;;  %v1588_v42 = vadd.f32 %v5989_v51, %v1587_v39  ;;  %v4574_v43 = vpop.f32.mrb[75].mxu1 }
 0x259   :  { %v855_v45 = vpop.f32.mrb[184].mxu0 }
 0x25a   :  { %v1979_v29 = vmax.f32 %v1588_v42, 0.0  ;;  %v856_v46 = vadd.f32 %v6053_v55, %v855_v45  ;;  %v2201_v47 = vpop.xlane.xlu0 %2200  ;;  %v4425_v48 = vpop.f32.mrb[185].mxu0  ;;  %4680 = vmatmul.mubr.msk.bf16.gmra.mrb[180].mxu1 %vm1216_vm3, %v1159_v40  ;;  %v2110_v49 = vmul.f32 %v6001_v60, %v1978_v41 }
 0x25b   :  { %v2576_v50 = vadd.f32 %v6277_v44, %v2201_v47  ;;  %v858_v52 = vpop.f32.mrb[186].mxu0  ;;  %4683 = vmatprep.mubr.msk.bf16.mxu1 %vm5274_vm0, %v5273_v0 }
 0x25c   :  { %v859_v51 = vadd.f32 %v6053_v55, %v858_v52  ;;  %v4426_v53 = vpop.f32.mrb[187].mxu0  ;;  %v2307_v54 = vsel %vm1216_vm3, %v2110_v49, 0.0  ;;  %v2111_v56 = vmul.f32 %v6001_v60, %v1979_v29  ;;  %v1081_v59 = vmax.f32 %v856_v46, 0.0 }
 0x25d   :  { %v3969_v57 = vmul.f32 -1.442695, %v2576_v50  ;;  %2308 = vadd.xlane.f32.xlu0 %v2307_v54  ;;  %v1592_v58 = vpop.f32.mrb[76].mxu1 }
 0x25e   :  { %v1082_v61 = vmax.f32 %v859_v51, 0.0  ;;  %v1593_v63 = vadd.f32 %v6291_v62, %v1592_v58  ;;  %v2204_v1 = vpop.xlane.xlu0 %2203  ;;  %v4577_v2 = vpop.f32.mrb[77].mxu1  ;;  %v2310_v3 = vsel %vm1216_vm3, %v2111_v56, 0.0 }
 0x25f   :  { %4762 = vpow2.f32 %v3969_v57  ;;  %v2577_v4 = vadd.f32 %v6277_v44, %v2204_v1  ;;  %2311 = vadd.xlane.f32.xlu1 %v2310_v3  ;;  %v1595_v60 = vpop.f32.mrb[78].mxu1 }
 0x260   :  { %v1160_v5 = vpack.c.bf16 %v1082_v61, %v1081_v59  ;;  %v1980_v6 = vmax.f32 %v1593_v63, 0.0  ;;  %v1596_v7 = vadd.f32 %v6291_v62, %v1595_v60  ;;  %v4578_v8 = vpop.f32.mrb[79].mxu1 }
 0x261   :  { %v3970_v9 = vmul.f32 -1.442695, %v2577_v4  ;;  %v863_v10 = vpop.f32.mrb[188].mxu0 }
 0x262   :  { %v1981_v11 = vmax.f32 %v1596_v7, 0.0  ;;  %v864_v12 = vadd.f32 %v6053_v55, %v863_v10  ;;  %v2207_v13 = vpop.xlane.xlu1 %2206  ;;  %v4429_v14 = vpop.f32.mrb[189].mxu0  ;;  %4684 = vmatmul.mubr.msk.bf16.gmra.mrb[184].mxu1 %vm1216_vm3, %v1160_v5  ;;  %v2112_v16 = vmul.f32 %v6302_v15, %v1980_v6 }
 0x263   :  { %4764 = vpow2.f32 %v3970_v9  ;;  %v2578_v17 = vadd.f32 %v6277_v44, %v2207_v13  ;;  %v866_v18 = vpop.f32.mrb[190].mxu0  ;;  %4687 = vmatprep.mubr.msk.bf16.mxu1 %vm5274_vm0, %v5273_v0 }
 0x264   :  { %v867_v19 = vadd.f32 %v6053_v55, %v866_v18  ;;  %v4430_v20 = vpop.f32.mrb[191].mxu0  ;;  %v2313_v21 = vsel %vm1216_vm3, %v2112_v16, 0.0  ;;  %v2113_v22 = vmul.f32 %v6302_v15, %v1981_v11  ;;  %v1083_v25 = vmax.f32 %v864_v12, 0.0  ;;  %v6331_v12 = vld [vmem:[%s7307_s2] ss:$0 sm:$0xff] }
 0x265   :  { %v3971_v23 = vmul.f32 -1.442695, %v2578_v17  ;;  %2314 = vadd.xlane.f32.xlu0 %v2313_v21  ;;  %v1600_v24 = vpop.f32.mrb[80].mxu1 }
 0x266   :  { %v1084_v26 = vmax.f32 %v867_v19, 0.0  ;;  %v1601_v27 = vadd.f32 %v6291_v62, %v1600_v24  ;;  %v2210_v28 = vpop.xlane.xlu1 %2209  ;;  %v4581_v30 = vpop.f32.mrb[81].mxu1  ;;  %v2316_v31 = vsel %vm1216_vm3, %v2113_v22, 0.0 }
 0x267   :  { %4766 = vpow2.f32 %v3971_v23  ;;  %v2579_v32 = vadd.f32 %v6277_v44, %v2210_v28  ;;  %2317 = vadd.xlane.f32.xlu1 %v2316_v31  ;;  %v1603_v33 = vpop.f32.mrb[82].mxu1 }
 0x268   :  { %v1161_v34 = vpack.c.bf16 %v1084_v26, %v1083_v25  ;;  %v1982_v35 = vmax.f32 %v1601_v27, 0.0  ;;  %v1604_v36 = vadd.f32 %v6291_v62, %v1603_v33  ;;  %v4582_v37 = vpop.f32.mrb[83].mxu1 }
 0x269   :  { %v4763_v38 = vpop.eup %4762  ;;  %v3972_v39 = vmul.f32 -1.442695, %v2579_v32  ;;  %v871_v40 = vpop.f32.mrb[192].mxu0 }
 0x26a   :  { %v3076_v41 = vadd.f32 1.0, %v4763_v38  ;;  %v1983_v42 = vmax.f32 %v1604_v36, 0.0  ;;  %v872_v43 = vadd.f32 %v6053_v55, %v871_v40  ;;  %v2213_v45 = vpop.xlane.xlu0 %2212  ;;  %v4433_v29 = vpop.f32.mrb[193].mxu0  ;;  %4688 = vmatmul.mubr.msk.bf16.gmra.mrb[188].mxu1 %vm1216_vm3, %v1161_v34  ;;  %v2114_v46 = vmul.f32 %v6302_v15, %v1982_v35 }
 0x26b   :  { %4768 = vpow2.f32 %v3972_v39  ;;  %v2580_v47 = vadd.f32 %v6277_v44, %v2213_v45  ;;  %v874_v48 = vpop.f32.mrb[194].mxu0  ;;  %4691 = vmatprep.mubr.msk.bf16.mxu1 %vm5274_vm0, %v5273_v0 }
 0x26c   :  { %4770 = vrcp.f32 %v3076_v41  ;;  %v875_v49 = vadd.f32 %v6053_v55, %v874_v48  ;;  %v2216_v50 = vpop.xlane.xlu1 %2215  ;;  %v4434_v52 = vpop.f32.mrb[195].mxu0  ;;  %v2319_v51 = vsel %vm1216_vm3, %v2114_v46, 0.0  ;;  %v2115_v58 = vmul.f32 %v6302_v15, %v1983_v42 }
 0x26d   :  { %v4765_v53 = vpop.eup %4764  ;;  %v3973_v54 = vmul.f32 -1.442695, %v2580_v47  ;;  %v2581_v56 = vadd.f32 %v6277_v44, %v2216_v50  ;;  %2320 = vadd.xlane.f32.xlu0 %v2319_v51  ;;  %v1608_v57 = vpop.f32.mrb[84].mxu1  ;;  %v1085_v61 = vmax.f32 %v872_v43, 0.0 }
 0x26e   :  { %v3077_v59 = vadd.f32 1.0, %v4765_v53  ;;  %v1086_v63 = vmax.f32 %v875_v49, 0.0  ;;  %v1609_v1 = vadd.f32 %v6291_v62, %v1608_v57  ;;  %v4585_v2 = vpop.f32.mrb[85].mxu1  ;;  %v2322_v3 = vsel %vm1216_vm3, %v2115_v58, 0.0 }
 0x26f   :  { %4772 = vpow2.f32 %v3973_v54  ;;  %v3974_v55 = vmul.f32 -1.442695, %v2581_v56  ;;  %v1611_v4 = vpop.f32.mrb[86].mxu1  ;;  %2323 = vadd.xlane.f32.xlu1 %v2322_v3 }
 0x270   :  { %4774 = vrcp.f32 %v3077_v59  ;;  %v1162_v60 = vpack.c.bf16 %v1086_v63, %v1085_v61  ;;  %v1984_v5 = vmax.f32 %v1609_v1, 0.0  ;;  %v1612_v6 = vadd.f32 %v6291_v62, %v1611_v4  ;;  %v4586_v7 = vpop.f32.mrb[87].mxu1 }
 0x271   :  { %v4767_v8 = vpop.eup %4766  ;;  %4776 = vpow2.f32 %v3974_v55  ;;  %v879_v9 = vpop.f32.mrb[196].mxu0 }
 0x272   :  { %v3078_v10 = vadd.f32 1.0, %v4767_v8  ;;  %v1985_v11 = vmax.f32 %v1612_v6, 0.0  ;;  %v880_v13 = vadd.f32 %v6331_v12, %v879_v9  ;;  %v2219_v14 = vpop.xlane.xlu0 %2218  ;;  %v4437_v16 = vpop.f32.mrb[197].mxu0  ;;  %4692 = vmatmul.mubr.msk.bf16.gmra.mrb[192].mxu1 %vm1216_vm3, %v1162_v60  ;;  %v2116_v17 = vmul.f32 %v6302_v15, %v1984_v5 }
 0x273   :  { %v2582_v18 = vadd.f32 %v6277_v44, %v2219_v14  ;;  %v882_v19 = vpop.f32.mrb[198].mxu0  ;;  %4695 = vmatprep.mubr.msk.bf16.mxu1 %vm5274_vm0, %v5273_v0 }
 0x274   :  { %4778 = vrcp.f32 %v3078_v10  ;;  %v883_v20 = vadd.f32 %v6331_v12, %v882_v19  ;;  %v2222_v21 = vpop.xlane.xlu1 %2221  ;;  %v4438_v22 = vpop.f32.mrb[199].mxu0  ;;  %v2325_v23 = vsel %vm1216_vm3, %v2116_v17, 0.0  ;;  %v2117_v28 = vmul.f32 %v6302_v15, %v1985_v11 }
 0x275   :  { %v4769_v24 = vpop.eup %4768  ;;  %v3975_v25 = vmul.f32 -1.442695, %v2582_v18  ;;  %v2583_v26 = vadd.f32 %v6277_v44, %v2222_v21  ;;  %2326 = vadd.xlane.f32.xlu0 %v2325_v23  ;;  %v1616_v27 = vpop.f32.mrb[88].mxu1  ;;  %v1087_v32 = vmax.f32 %v880_v13, 0.0 }
 0x276   :  { %v4771_v30 = vpop.eup %4770  ;;  %v3079_v31 = vadd.f32 1.0, %v4769_v24  ;;  %v1088_v33 = vmax.f32 %v883_v20, 0.0  ;;  %v1617_v34 = vadd.f32 %v6291_v62, %v1616_v27  ;;  %v4589_v35 = vpop.f32.mrb[89].mxu1  ;;  %v2328_v38 = vsel %vm1216_vm3, %v2117_v28, 0.0 }
 0x277   :  { %v3451_v36 = vmul.f32 0.995, %v4771_v30  ;;  %4780 = vpow2.f32 %v3975_v25  ;;  %v3976_v37 = vmul.f32 -1.442695, %v2583_v26  ;;  %v1619_v39 = vpop.f32.mrb[90].mxu1  ;;  %2329 = vadd.xlane.f32.xlu1 %v2328_v38 }
 0x278   :  { %4782 = vrcp.f32 %v3079_v31  ;;  %v1163_v40 = vpack.c.bf16 %v1088_v33, %v1087_v32  ;;  %v1986_v41 = vmax.f32 %v1617_v34, 0.0  ;;  %v1620_v42 = vadd.f32 %v6291_v62, %v1619_v39  ;;  %v4590_v43 = vpop.f32.mrb[91].mxu1 }
 0x279   :  { %v4773_v45 = vpop.eup %4772  ;;  %v3576_v29 = vadd.f32 0.005, %v3451_v36  ;;  %4784 = vpow2.f32 %v3976_v37  ;;  %v887_v46 = vpop.f32.mrb[200].mxu0 }
 0x27a   :  { %v4775_v47 = vpop.eup %4774  ;;  %v3080_v48 = vadd.f32 1.0, %v4773_v45  ;;  %v1987_v49 = vmax.f32 %v1620_v42, 0.0  ;;  %v888_v50 = vadd.f32 %v6331_v12, %v887_v46  ;;  %v2225_v52 = vpop.xlane.xlu0 %2224  ;;  %4696 = vmatmul.mubr.msk.bf16.gmra.mrb[196].mxu1 %vm1216_vm3, %v1163_v40  ;;  %v2118_v53 = vmul.f32 %v6302_v15, %v1986_v41 }
 0x27b   :  { %v4441_v51 = vpop.f32.mrb[201].mxu0  ;;  %v4777_v54 = vpop.eup %4776  ;;  %3702 = vst.msk [vmem:[%s7311_s7] sm:$0xff] %vm3701_vm4, %v3576_v29  ;;  %v3452_v56 = vmul.f32 0.995, %v4775_v47  ;;  %v2584_v57 = vadd.f32 %v6277_v44, %v2225_v52  ;;  %4699 = vmatprep.mubr.msk.bf16.mxu1 %vm5274_vm0, %v5273_v0 }
 0x27c   :  { %v890_v58 = vpop.f32.mrb[202].mxu0  ;;  %4786 = vrcp.f32 %v3080_v48  ;;  %v3081_v59 = vadd.f32 1.0, %v4777_v54  ;;  %v1089_v61 = vmax.f32 %v888_v50, 0.0  ;;  %v2228_v1 = vpop.xlane.xlu1 %2227  ;;  %v2331_v60 = vsel %vm1216_vm3, %v2118_v53, 0.0 }
 0x27d   :  { %v891_v63 = vadd.f32 %v6331_v12, %v890_v58  ;;  %v4442_v2 = vpop.f32.mrb[203].mxu0  ;;  %v3577_v55 = vadd.f32 0.005, %v3452_v56  ;;  %v3977_v3 = vmul.f32 -1.442695, %v2584_v57  ;;  %v2585_v4 = vadd.f32 %v6277_v44, %v2228_v1  ;;  %v1624_v5 = vpop.f32.mrb[92].mxu1  ;;  %2332 = vadd.xlane.f32.xlu0 %v2331_v60 }
 0x27e   :  { %v4779_v6 = vpop.eup %4778  ;;  %4788 = vrcp.f32 %v3081_v59  ;;  %v1625_v8 = vadd.f32 %v6291_v62, %v1624_v5  ;;  %v4593_v9 = vpop.f32.mrb[93].mxu1  ;;  %v2119_v10 = vmul.f32 %v6302_v15, %v1987_v49 }
 0x27f   :  { %v1090_v7 = vmax.f32 %v891_v63, 0.0  ;;  %3703 = vst.msk [vmem:[%s7311_s7 + $0x8] sm:$0xff] %vm3701_vm4, %v3577_v55  ;;  %v3453_v11 = vmul.f32 0.995, %v4779_v6  ;;  %4790 = vpow2.f32 %v3977_v3  ;;  %v3978_v13 = vmul.f32 -1.442695, %v2585_v4 }
 0x280   :  { %v1627_v14 = vpop.f32.mrb[94].mxu1  ;;  %v1988_v17 = vmax.f32 %v1625_v8, 0.0  ;;  %v2334_v18 = vsel %vm1216_vm3, %v2119_v10, 0.0 }
 0x281   :  { %v1164_v16 = vpack.c.bf16 %v1090_v7, %v1089_v61  ;;  %v1628_v19 = vadd.f32 %v6291_v62, %v1627_v14  ;;  %v4594_v20 = vpop.f32.mrb[95].mxu1  ;;  %v4781_v21 = vpop.eup %4780  ;;  %v3578_v22 = vadd.f32 0.005, %v3453_v11  ;;  %4792 = vpow2.f32 %v3978_v13  ;;  %2335 = vadd.xlane.f32.xlu1 %v2334_v18 }
 0x282   :  { %v895_v23 = vpop.f32.mrb[204].mxu0  ;;  %v4783_v24 = vpop.eup %4782  ;;  %v3082_v25 = vadd.f32 1.0, %v4781_v21  ;;  %v2120_v31 = vmul.f32 %v6302_v15, %v1988_v17 }
 0x283   :  { %v1989_v26 = vmax.f32 %v1628_v19, 0.0  ;;  %v896_v27 = vadd.f32 %v6331_v12, %v895_v23  ;;  %v2231_v28 = vpop.xlane.xlu0 %2230  ;;  %v4445_v30 = vpop.f32.mrb[205].mxu0  ;;  %4700 = vmatmul.mubr.msk.bf16.gmra.mrb[200].mxu1 %vm1216_vm3, %v1164_v16  ;;  %3704 = vst.msk [vmem:[%s7311_s7 + $0x10] sm:$0xff] %vm3701_vm4, %v3578_v22  ;;  %v3454_v33 = vmul.f32 0.995, %v4783_v24 }
 0x284   :  { %v4785_v32 = vpop.eup %4784  ;;  %v2586_v34 = vadd.f32 %v6277_v44, %v2231_v28  ;;  %v898_v35 = vpop.f32.mrb[206].mxu0  ;;  %4703 = vmatprep.mubr.msk.bf16.mxu1 %vm5274_vm0, %v5273_v0  ;;  %4794 = vrcp.f32 %v3082_v25  ;;  %v2337_v45 = vsel %vm1216_vm3, %v2120_v31, 0.0 }
 0x285   :  { %v3083_v36 = vadd.f32 1.0, %v4785_v32  ;;  %v1091_v37 = vmax.f32 %v896_v27, 0.0  ;;  %v899_v38 = vadd.f32 %v6331_v12, %v898_v35  ;;  %v2234_v39 = vpop.xlane.xlu1 %2233  ;;  %v4446_v40 = vpop.f32.mrb[207].mxu0  ;;  %v3579_v41 = vadd.f32 0.005, %v3454_v33  ;;  %2338 = vadd.xlane.f32.xlu0 %v2337_v45 }
 0x286   :  { %v3979_v42 = vmul.f32 -1.442695, %v2586_v34  ;;  %v2587_v43 = vadd.f32 %v6277_v44, %v2234_v39  ;;  %v1632_v29 = vpop.f32.mrb[96].mxu1  ;;  %v4787_v46 = vpop.eup %4786  ;;  %v2121_v50 = vmul.f32 %v6302_v15, %v1989_v26 }
 0x287   :  { %4796 = vrcp.f32 %v3083_v36  ;;  %v1092_v47 = vmax.f32 %v899_v38, 0.0  ;;  %v1633_v48 = vadd.f32 %v6291_v62, %v1632_v29  ;;  %v4597_v49 = vpop.f32.mrb[97].mxu1  ;;  %3705 = vst.msk [vmem:[%s7311_s7 + $0x18] sm:$0xff] %vm3701_vm4, %v3579_v41  ;;  %v3455_v52 = vmul.f32 0.995, %v4787_v46 }
 0x288   :  { %4798 = vpow2.f32 %v3979_v42  ;;  %v3980_v51 = vmul.f32 -1.442695, %v2587_v43  ;;  %v1635_v53 = vpop.f32.mrb[98].mxu1  ;;  %v4789_v54 = vpop.eup %4788  ;;  %v2340_v58 = vsel %vm1216_vm3, %v2121_v50, 0.0 }
 0x289   :  { %v1165_v56 = vpack.c.bf16 %v1092_v47, %v1091_v37  ;;  %v1990_v57 = vmax.f32 %v1633_v48, 0.0  ;;  %v1636_v59 = vadd.f32 %v6291_v62, %v1635_v53  ;;  %v4598_v61 = vpop.f32.mrb[99].mxu1  ;;  %v4791_v63 = vpop.eup %4790  ;;  %v3580_v1 = vadd.f32 0.005, %v3455_v52  ;;  %2341 = vadd.xlane.f32.xlu1 %v2340_v58 }
 0x28a   :  { %v3456_v2 = vmul.f32 0.995, %v4789_v54  ;;  %4800 = vpow2.f32 %v3980_v51  ;;  %v903_v55 = vpop.f32.mrb[208].mxu0  ;;  %v3084_v3 = vadd.f32 1.0, %v4791_v63  ;;  %v2237_v5 = vpop.xlane.xlu0 %2236 }
 0x28b   :  { %v1991_v4 = vmax.f32 %v1636_v59, 0.0  ;;  %v904_v60 = vadd.f32 %v6331_v12, %v903_v55  ;;  %v4449_v6 = vpop.f32.mrb[209].mxu0  ;;  %4704 = vmatmul.mubr.msk.bf16.gmra.mrb[204].mxu1 %vm1216_vm3, %v1165_v56  ;;  %v2122_v7 = vmul.f32 %v6302_v15, %v1990_v57  ;;  %v4793_v8 = vpop.eup %4792  ;;  %3706 = vst.msk [vmem:[%s7311_s7 + $0x20] sm:$0xff] %vm3701_vm4, %v3580_v1  ;;  %v2588_v10 = vadd.f32 %v6277_v44, %v2237_v5 }
 0x28c   :  { %v3581_v9 = vadd.f32 0.005, %v3456_v2  ;;  %v906_v11 = vpop.f32.mrb[210].mxu0  ;;  %4707 = vmatprep.mubr.msk.bf16.mxu1 %vm5274_vm0, %v5273_v0  ;;  %4802 = vrcp.f32 %v3084_v3  ;;  %v3085_v13 = vadd.f32 1.0, %v4793_v8  ;;  %v2240_v16 = vpop.xlane.xlu1 %2239 }
 0x28d   :  { %v907_v14 = vadd.f32 %v6331_v12, %v906_v11  ;;  %v4450_v17 = vpop.f32.mrb[211].mxu0  ;;  %v3981_v18 = vmul.f32 -1.442695, %v2588_v10  ;;  %v2589_v19 = vadd.f32 %v6277_v44, %v2240_v16  ;;  %v2343_v20 = vsel %vm1216_vm3, %v2122_v7, 0.0  ;;  %v1640_v21 = vpop.f32.mrb[100].mxu1 }
 0x28e   :  { %3707 = vst.msk [vmem:[%s7311_s7 + $0x28] sm:$0xff] %vm3701_vm4, %v3581_v9  ;;  %v2123_v22 = vmul.f32 %v6302_v15, %v1991_v4  ;;  %v4795_v23 = vpop.eup %4794  ;;  %4804 = vrcp.f32 %v3085_v13  ;;  %v1093_v24 = vmax.f32 %v904_v60, 0.0  ;;  %2344 = vadd.xlane.f32.xlu0 %v2343_v20  ;;  %v1641_v26 = vadd.f32 %v6291_v62, %v1640_v21  ;;  %v4601_v27 = vpop.f32.mrb[101].mxu1 }
 0x28f   :  { %v1094_v25 = vmax.f32 %v907_v14, 0.0  ;;  %v3457_v28 = vmul.f32 0.995, %v4795_v23  ;;  %4806 = vpow2.f32 %v3981_v18  ;;  %v3982_v30 = vmul.f32 -1.442695, %v2589_v19  ;;  %v1643_v32 = vpop.f32.mrb[102].mxu1 }
 0x290   :  { %v2346_v31 = vsel %vm1216_vm3, %v2123_v22, 0.0  ;;  %v1992_v35 = vmax.f32 %v1641_v26, 0.0  ;;  %v1644_v36 = vadd.f32 %v6291_v62, %v1643_v32  ;;  %v4602_v37 = vpop.f32.mrb[103].mxu1 }
 0x291   :  { %v4797_v33 = vpop.eup %4796  ;;  %v1166_v34 = vpack.c.bf16 %v1094_v25, %v1093_v24  ;;  %2347 = vadd.xlane.f32.xlu1 %v2346_v31  ;;  %v3582_v39 = vadd.f32 0.005, %v3457_v28  ;;  %4808 = vpow2.f32 %v3982_v30  ;;  %v911_v41 = vpop.f32.mrb[212].mxu0 }
 0x292   :  { %v4799_v38 = vpop.eup %4798  ;;  %v3458_v40 = vmul.f32 0.995, %v4797_v33  ;;  %v1993_v43 = vmax.f32 %v1644_v36, 0.0  ;;  %v912_v45 = vadd.f32 %v6331_v12, %v911_v41  ;;  %v2243_v29 = vpop.xlane.xlu0 %2242  ;;  %v2124_v47 = vmul.f32 %v6302_v15, %v1992_v35 }
 0x293   :  { %v3086_v42 = vadd.f32 1.0, %v4799_v38  ;;  %v4453_v46 = vpop.f32.mrb[213].mxu0  ;;  %4708 = vmatmul.mubr.msk.bf16.gmra.mrb[208].mxu1 %vm1216_vm3, %v1166_v34  ;;  %3708 = vst.msk [vmem:[%s7311_s7 + $0x30] sm:$0xff] %vm3701_vm4, %v3582_v39  ;;  %v2590_v50 = vadd.f32 %v6277_v44, %v2243_v29 }
 0x294   :  { %v4801_v48 = vpop.eup %4800  ;;  %v3583_v49 = vadd.f32 0.005, %v3458_v40  ;;  %v914_v52 = vpop.f32.mrb[214].mxu0  ;;  %4711 = vmatprep.mubr.msk.bf16.mxu1 %vm5274_vm0, %v5273_v0  ;;  %v2349_v59 = vsel %vm1216_vm3, %v2124_v47, 0.0  ;;  %v2125_v63 = vmul.f32 %v6302_v15, %v1993_v43  ;;  %v1095_v2 = vmax.f32 %v912_v45, 0.0 }
 0x295   :  { %4810 = vrcp.f32 %v3086_v42  ;;  %v3087_v51 = vadd.f32 1.0, %v4801_v48  ;;  %v915_v53 = vadd.f32 %v6331_v12, %v914_v52  ;;  %v2246_v54 = vpop.xlane.xlu1 %2245  ;;  %v4454_v56 = vpop.f32.mrb[215].mxu0  ;;  %v3983_v57 = vmul.f32 -1.442695, %v2590_v50  ;;  %2350 = vadd.xlane.f32.xlu0 %v2349_v59 }
 0x296   :  { %3709 = vst.msk [vmem:[%s7311_s7 + $0x38] sm:$0xff] %vm3701_vm4, %v3583_v49  ;;  %v2591_v58 = vadd.f32 %v6277_v44, %v2246_v54  ;;  %v1648_v61 = vpop.f32.mrb[104].mxu1  ;;  %v4803_v1 = vpop.eup %4802  ;;  %v2352_v6 = vsel %vm1216_vm3, %v2125_v63, 0.0 }
 0x297   :  { %4812 = vrcp.f32 %v3087_v51  ;;  %v1096_v55 = vmax.f32 %v915_v53, 0.0  ;;  %v1649_v3 = vadd.f32 %v6291_v62, %v1648_v61  ;;  %v4605_v4 = vpop.f32.mrb[105].mxu1  ;;  %v3459_v60 = vmul.f32 0.995, %v4803_v1  ;;  %2353 = vadd.xlane.f32.xlu1 %v2352_v6 }
 0x298   :  { %4814 = vpow2.f32 %v3983_v57  ;;  %v3984_v5 = vmul.f32 -1.442695, %v2591_v58  ;;  %v1651_v7 = vpop.f32.mrb[106].mxu1  ;;  %v4805_v8 = vpop.eup %4804 }
 0x299   :  { %v1167_v9 = vpack.c.bf16 %v1096_v55, %v1095_v2  ;;  %v1994_v10 = vmax.f32 %v1649_v3, 0.0  ;;  %v1652_v11 = vadd.f32 %v6291_v62, %v1651_v7  ;;  %v4606_v13 = vpop.f32.mrb[107].mxu1  ;;  %v4807_v14 = vpop.eup %4806  ;;  %v3584_v16 = vadd.f32 0.005, %v3459_v60 }
 0x29a   :  { %v3460_v17 = vmul.f32 0.995, %v4805_v8  ;;  %4816 = vpow2.f32 %v3984_v5  ;;  %v919_v18 = vpop.f32.mrb[216].mxu0  ;;  %v3088_v19 = vadd.f32 1.0, %v4807_v14  ;;  %v2249_v22 = vpop.xlane.xlu0 %2248 }
 0x29b   :  { %v1995_v20 = vmax.f32 %v1652_v11, 0.0  ;;  %v920_v21 = vadd.f32 %v6331_v12, %v919_v18  ;;  %v4457_v23 = vpop.f32.mrb[217].mxu0  ;;  %4712 = vmatmul.mubr.msk.bf16.gmra.mrb[212].mxu1 %vm1216_vm3, %v1167_v9  ;;  %v2126_v24 = vmul.f32 %v6302_v15, %v1994_v10  ;;  %v4809_v25 = vpop.eup %4808  ;;  %3710 = vst.msk [vmem:[%s7311_s7 + $0x40] sm:$0xff] %vm3701_vm4, %v3584_v16  ;;  %v2592_v27 = vadd.f32 %v6277_v44, %v2249_v22 }
 0x29c   :  { %v3585_v26 = vadd.f32 0.005, %v3460_v17  ;;  %v922_v28 = vpop.f32.mrb[218].mxu0  ;;  %4715 = vmatprep.mubr.msk.bf16.mxu1 %vm5274_vm0, %v5273_v0  ;;  %4818 = vrcp.f32 %v3088_v19  ;;  %v3089_v30 = vadd.f32 1.0, %v4809_v25  ;;  %v2252_v32 = vpop.xlane.xlu1 %2251 }
 0x29d   :  { %v923_v31 = vadd.f32 %v6331_v12, %v922_v28  ;;  %v4458_v33 = vpop.f32.mrb[219].mxu0  ;;  %v3985_v34 = vmul.f32 -1.442695, %v2592_v27  ;;  %v2593_v35 = vadd.f32 %v6277_v44, %v2252_v32  ;;  %v2355_v36 = vsel %vm1216_vm3, %v2126_v24, 0.0  ;;  %v1656_v37 = vpop.f32.mrb[108].mxu1 }
 0x29e   :  { %3711 = vst.msk [vmem:[%s7311_s7 + $0x48] sm:$0xff] %vm3701_vm4, %v3585_v26  ;;  %v2127_v38 = vmul.f32 %v6302_v15, %v1995_v20  ;;  %4820 = vrcp.f32 %v3089_v30  ;;  %v1097_v40 = vmax.f32 %v920_v21, 0.0  ;;  %2356 = vadd.xlane.f32.xlu0 %v2355_v36  ;;  %v1657_v42 = vadd.f32 %v6291_v62, %v1656_v37  ;;  %v4609_v43 = vpop.f32.mrb[109].mxu1 }
 0x29f   :  { %v4811_v39 = vpop.eup %4810  ;;  %v1098_v41 = vmax.f32 %v923_v31, 0.0  ;;  %4822 = vpow2.f32 %v3985_v34  ;;  %v3986_v29 = vmul.f32 -1.442695, %v2593_v35  ;;  %v1659_v47 = vpop.f32.mrb[110].mxu1 }
 0x2a0   :  { %v3461_v45 = vmul.f32 0.995, %v4811_v39  ;;  %v2358_v46 = vsel %vm1216_vm3, %v2127_v38, 0.0  ;;  %v1996_v50 = vmax.f32 %v1657_v42, 0.0  ;;  %v1660_v52 = vadd.f32 %v6291_v62, %v1659_v47  ;;  %v4610_v51 = vpop.f32.mrb[111].mxu1 }
 0x2a1   :  { %v4813_v48 = vpop.eup %4812  ;;  %v1168_v49 = vpack.c.bf16 %v1098_v41, %v1097_v40  ;;  %2359 = vadd.xlane.f32.xlu1 %v2358_v46  ;;  %4824 = vpow2.f32 %v3986_v29  ;;  %v927_v57 = vpop.f32.mrb[220].mxu0 }
 0x2a2   :  { %v4815_v53 = vpop.eup %4814  ;;  %v3586_v54 = vadd.f32 0.005, %v3461_v45  ;;  %v3462_v56 = vmul.f32 0.995, %v4813_v48  ;;  %v1997_v59 = vmax.f32 %v1660_v52, 0.0  ;;  %v928_v61 = vadd.f32 %v6331_v12, %v927_v57  ;;  %v2255_v63 = vpop.xlane.xlu0 %2254 }
 0x2a3   :  { %v3090_v58 = vadd.f32 1.0, %v4815_v53  ;;  %v4461_v1 = vpop.f32.mrb[221].mxu0  ;;  %4716 = vmatmul.mubr.msk.bf16.gmra.mrb[216].mxu1 %vm1216_vm3, %v1168_v49  ;;  %v2128_v2 = vmul.f32 %v6302_v15, %v1996_v50  ;;  %v2594_v4 = vadd.f32 %v6277_v44, %v2255_v63 }
 0x2a4   :  { %v4817_v55 = vpop.eup %4816  ;;  %3712 = vst.msk [vmem:[%s7311_s7 + $0x50] sm:$0xff] %vm3701_vm4, %v3586_v54  ;;  %v3587_v3 = vadd.f32 0.005, %v3462_v56  ;;  %v930_v60 = vpop.f32.mrb[222].mxu0  ;;  %4719 = vmatprep.mubr.msk.bf16.mxu1 %vm5274_vm0, %v5273_v0  ;;  %v2129_v14 = vmul.f32 %v6302_v15, %v1997_v59  ;;  %v1099_v17 = vmax.f32 %v928_v61, 0.0 }
 0x2a5   :  { %4826 = vrcp.f32 %v3090_v58  ;;  %v3091_v5 = vadd.f32 1.0, %v4817_v55  ;;  %v931_v6 = vadd.f32 %v6331_v12, %v930_v60  ;;  %v2258_v7 = vpop.xlane.xlu1 %2257  ;;  %v4462_v8 = vpop.f32.mrb[223].mxu0  ;;  %v3987_v9 = vmul.f32 -1.442695, %v2594_v4 }
 0x2a6   :  { %3713 = vst.msk [vmem:[%s7311_s7 + $0x58] sm:$0xff] %vm3701_vm4, %v3587_v3  ;;  %v2595_v10 = vadd.f32 %v6277_v44, %v2258_v7  ;;  %v2361_v11 = vsel %vm1216_vm3, %v2128_v2, 0.0  ;;  %v1664_v13 = vpop.f32.mrb[112].mxu1  ;;  %v4819_v16 = vpop.eup %4818  ;;  %v2364_v23 = vsel %vm1216_vm3, %v2129_v14, 0.0 }
 0x2a7   :  { %4828 = vrcp.f32 %v3091_v5  ;;  %v1100_v18 = vmax.f32 %v931_v6, 0.0  ;;  %2362 = vadd.xlane.f32.xlu0 %v2361_v11  ;;  %v1665_v19 = vadd.f32 %v6291_v62, %v1664_v13  ;;  %v4613_v20 = vpop.f32.mrb[113].mxu1  ;;  %v3463_v21 = vmul.f32 0.995, %v4819_v16  ;;  %2365 = vadd.xlane.f32.xlu1 %v2364_v23 }
 0x2a8   :  { %4830 = vpow2.f32 %v3987_v9  ;;  %v3988_v22 = vmul.f32 -1.442695, %v2595_v10  ;;  %v1667_v24 = vpop.f32.mrb[114].mxu1  ;;  %v4821_v25 = vpop.eup %4820 }
 0x2a9   :  { %v1169_v26 = vpack.c.bf16 %v1100_v18, %v1099_v17  ;;  %v1998_v27 = vmax.f32 %v1665_v19, 0.0  ;;  %v1668_v28 = vadd.f32 %v6291_v62, %v1667_v24  ;;  %v4614_v30 = vpop.f32.mrb[115].mxu1  ;;  %v4823_v31 = vpop.eup %4822  ;;  %v3588_v32 = vadd.f32 0.005, %v3463_v21 }
 0x2aa   :  { %v3464_v33 = vmul.f32 0.995, %v4821_v25  ;;  %4832 = vpow2.f32 %v3988_v22  ;;  %v935_v34 = vpop.f32.mrb[224].mxu0  ;;  %v3092_v35 = vadd.f32 1.0, %v4823_v31  ;;  %v2261_v38 = vpop.xlane.xlu0 %2260 }
 0x2ab   :  { %v1999_v36 = vmax.f32 %v1668_v28, 0.0  ;;  %v936_v37 = vadd.f32 %v6331_v12, %v935_v34  ;;  %v4465_v39 = vpop.f32.mrb[225].mxu0  ;;  %4720 = vmatmul.mubr.msk.bf16.gmra.mrb[220].mxu1 %vm1216_vm3, %v1169_v26  ;;  %v2130_v40 = vmul.f32 %v6302_v15, %v1998_v27  ;;  %v4825_v41 = vpop.eup %4824  ;;  %3714 = vst.msk [vmem:[%s7311_s7 + $0x60] sm:$0xff] %vm3701_vm4, %v3588_v32  ;;  %v2596_v43 = vadd.f32 %v6277_v44, %v2261_v38 }
 0x2ac   :  { %v3589_v42 = vadd.f32 0.005, %v3464_v33  ;;  %v938_v45 = vpop.f32.mrb[226].mxu0  ;;  %4723 = vmatprep.mubr.msk.bf16.mxu1 %vm5274_vm0, %v5273_v0  ;;  %4834 = vrcp.f32 %v3092_v35  ;;  %v3093_v29 = vadd.f32 1.0, %v4825_v41  ;;  %v2264_v47 = vpop.xlane.xlu1 %2263 }
 0x2ad   :  { %v939_v46 = vadd.f32 %v6331_v12, %v938_v45  ;;  %v4466_v48 = vpop.f32.mrb[227].mxu0  ;;  %v3989_v49 = vmul.f32 -1.442695, %v2596_v43  ;;  %v2597_v50 = vadd.f32 %v6277_v44, %v2264_v47  ;;  %v2367_v52 = vsel %vm1216_vm3, %v2130_v40, 0.0  ;;  %v1672_v51 = vpop.f32.mrb[116].mxu1 }
 0x2ae   :  { %3715 = vst.msk [vmem:[%s7311_s7 + $0x68] sm:$0xff] %vm3701_vm4, %v3589_v42  ;;  %v2131_v53 = vmul.f32 %v6302_v15, %v1999_v36  ;;  %4836 = vrcp.f32 %v3093_v29  ;;  %v1101_v56 = vmax.f32 %v936_v37, 0.0  ;;  %2368 = vadd.xlane.f32.xlu0 %v2367_v52  ;;  %v1673_v58 = vadd.f32 %v6291_v62, %v1672_v51  ;;  %v4617_v59 = vpop.f32.mrb[117].mxu1 }
 0x2af   :  { %v4827_v54 = vpop.eup %4826  ;;  %v1102_v57 = vmax.f32 %v939_v46, 0.0  ;;  %4838 = vpow2.f32 %v3989_v49  ;;  %v3990_v63 = vmul.f32 -1.442695, %v2597_v50  ;;  %v1675_v2 = vpop.f32.mrb[118].mxu1 }
 0x2b0   :  { %v3465_v61 = vmul.f32 0.995, %v4827_v54  ;;  %v2370_v1 = vsel %vm1216_vm3, %v2131_v53, 0.0  ;;  %v2000_v4 = vmax.f32 %v1673_v58, 0.0  ;;  %v1676_v60 = vadd.f32 %v6291_v62, %v1675_v2  ;;  %v4618_v5 = vpop.f32.mrb[119].mxu1 }
 0x2b1   :  { %v4829_v55 = vpop.eup %4828  ;;  %v1170_v3 = vpack.c.bf16 %v1102_v57, %v1101_v56  ;;  %2371 = vadd.xlane.f32.xlu1 %v2370_v1  ;;  %4840 = vpow2.f32 %v3990_v63  ;;  %v943_v9 = vpop.f32.mrb[228].mxu0 }
 0x2b2   :  { %v4831_v6 = vpop.eup %4830  ;;  %v3590_v7 = vadd.f32 0.005, %v3465_v61  ;;  %v3466_v8 = vmul.f32 0.995, %v4829_v55  ;;  %v2001_v11 = vmax.f32 %v1676_v60, 0.0  ;;  %v944_v13 = vadd.f32 %v6331_v12, %v943_v9  ;;  %v2267_v14 = vpop.xlane.xlu0 %2266 }
 0x2b3   :  { %v3094_v10 = vadd.f32 1.0, %v4831_v6  ;;  %v4469_v16 = vpop.f32.mrb[229].mxu0  ;;  %4724 = vmatmul.mubr.msk.bf16.gmra.mrb[224].mxu1 %vm1216_vm3, %v1170_v3  ;;  %v2132_v17 = vmul.f32 %v6302_v15, %v2000_v4  ;;  %v2598_v20 = vadd.f32 %v6277_v44, %v2267_v14  ;;  %v6534_v60 = vld [vmem:[%s7309_s5] ss:$0 sm:$0xff] }
 0x2b4   :  { %v4833_v18 = vpop.eup %4832  ;;  %3716 = vst.msk [vmem:[%s7311_s7 + $0x70] sm:$0xff] %vm3701_vm4, %v3590_v7  ;;  %v3591_v19 = vadd.f32 0.005, %v3466_v8  ;;  %v946_v21 = vpop.f32.mrb[230].mxu0  ;;  %4727 = vmatprep.mubr.msk.bf16.mxu1 %vm5274_vm0, %v5273_v0  ;;  %v2133_v31 = vmul.f32 %v6302_v15, %v2001_v11  ;;  %v1103_v33 = vmax.f32 %v944_v13, 0.0 }
 0x2b5   :  { %4842 = vrcp.f32 %v3094_v10  ;;  %v3095_v22 = vadd.f32 1.0, %v4833_v18  ;;  %v947_v23 = vadd.f32 %v6331_v12, %v946_v21  ;;  %v2270_v24 = vpop.xlane.xlu1 %2269  ;;  %v4470_v25 = vpop.f32.mrb[231].mxu0  ;;  %v3991_v26 = vmul.f32 -1.442695, %v2598_v20  ;;  %v6540_v9 = vld [vmem:[%s7308_s4] ss:$0 sm:$0xff] }
 0x2b6   :  { %3717 = vst.msk [vmem:[%s7311_s7 + $0x78] sm:$0xff] %vm3701_vm4, %v3591_v19  ;;  %v2599_v27 = vadd.f32 %v6277_v44, %v2270_v24  ;;  %v2373_v28 = vsel %vm1216_vm3, %v2132_v17, 0.0  ;;  %v1680_v30 = vpop.f32.mrb[120].mxu1  ;;  %v4835_v32 = vpop.eup %4834  ;;  %v2376_v39 = vsel %vm1216_vm3, %v2133_v31, 0.0 }
 0x2b7   :  { %4844 = vrcp.f32 %v3095_v22  ;;  %v1104_v34 = vmax.f32 %v947_v23, 0.0  ;;  %2374 = vadd.xlane.f32.xlu0 %v2373_v28  ;;  %v1681_v35 = vadd.f32 %v6291_v62, %v1680_v30  ;;  %v4621_v36 = vpop.f32.mrb[121].mxu1  ;;  %v3467_v37 = vmul.f32 0.995, %v4835_v32  ;;  %2377 = vadd.xlane.f32.xlu1 %v2376_v39 }
 0x2b8   :  { %4846 = vpow2.f32 %v3991_v26  ;;  %v3992_v38 = vmul.f32 -1.442695, %v2599_v27  ;;  %v1683_v40 = vpop.f32.mrb[122].mxu1  ;;  %v4837_v41 = vpop.eup %4836 }
 0x2b9   :  { %v1171_v42 = vpack.c.bf16 %v1104_v34, %v1103_v33  ;;  %v2002_v43 = vmax.f32 %v1681_v35, 0.0  ;;  %v1684_v45 = vadd.f32 %v6291_v62, %v1683_v40  ;;  %v4622_v29 = vpop.f32.mrb[123].mxu1  ;;  %v4839_v46 = vpop.eup %4838  ;;  %v3592_v47 = vadd.f32 0.005, %v3467_v37 }
 0x2ba   :  { %v3468_v48 = vmul.f32 0.995, %v4837_v41  ;;  %4848 = vpow2.f32 %v3992_v38  ;;  %v951_v49 = vpop.f32.mrb[232].mxu0  ;;  %v3096_v50 = vadd.f32 1.0, %v4839_v46  ;;  %v2273_v53 = vpop.xlane.xlu0 %2272 }
 0x2bb   :  { %v2003_v52 = vmax.f32 %v1684_v45, 0.0  ;;  %v952_v51 = vadd.f32 %v6331_v12, %v951_v49  ;;  %v4473_v54 = vpop.f32.mrb[233].mxu0  ;;  %4728 = vmatmul.mubr.msk.bf16.gmra.mrb[228].mxu1 %vm1216_vm3, %v1171_v42  ;;  %v2134_v56 = vmul.f32 %v6302_v15, %v2002_v43  ;;  %v4841_v57 = vpop.eup %4840  ;;  %3718 = vst.msk [vmem:[%s7311_s7 + $0x80] sm:$0xff] %vm3701_vm4, %v3592_v47  ;;  %v2600_v58 = vadd.f32 %v6277_v44, %v2273_v53 }
 0x2bc   :  { %v3593_v62 = vadd.f32 0.005, %v3468_v48  ;;  %v954_v59 = vpop.f32.mrb[234].mxu0  ;;  %4731 = vmatprep.mubr.msk.bf16.mxu1 %vm5274_vm0, %v5273_v0  ;;  %4850 = vrcp.f32 %v3096_v50  ;;  %v3097_v61 = vadd.f32 1.0, %v4841_v57  ;;  %v2276_v1 = vpop.xlane.xlu1 %2275 }
 0x2bd   :  { %v955_v63 = vadd.f32 %v6331_v12, %v954_v59  ;;  %v4474_v2 = vpop.f32.mrb[235].mxu0  ;;  %v3993_v15 = vmul.f32 -1.442695, %v2600_v58  ;;  %v2601_v55 = vadd.f32 %v6277_v44, %v2276_v1  ;;  %v2379_v3 = vsel %vm1216_vm3, %v2134_v56, 0.0  ;;  %v1688_v4 = vpop.f32.mrb[124].mxu1 }
 0x2be   :  { %3719 = vst.msk [vmem:[%s7311_s7 + $0x88] sm:$0xff] %vm3701_vm4, %v3593_v62  ;;  %v2135_v5 = vmul.f32 %v6534_v60, %v2003_v52  ;;  %4852 = vrcp.f32 %v3097_v61  ;;  %v1105_v7 = vmax.f32 %v952_v51, 0.0  ;;  %2380 = vadd.xlane.f32.xlu0 %v2379_v3  ;;  %v1689_v10 = vadd.f32 %v6540_v9, %v1688_v4  ;;  %v4625_v11 = vpop.f32.mrb[125].mxu1  ;;  %v6569_v3 = vld [vmem:[%s7307_s2] ss:$0 sm:$0xff] }
 0x2bf   :  { %v4843_v6 = vpop.eup %4842  ;;  %v1106_v8 = vmax.f32 %v955_v63, 0.0  ;;  %4854 = vpow2.f32 %v3993_v15  ;;  %v3994_v14 = vmul.f32 -1.442695, %v2601_v55  ;;  %v1691_v17 = vpop.f32.mrb[126].mxu1 }
 0x2c0   :  { %v3469_v13 = vmul.f32 0.995, %v4843_v6  ;;  %v2382_v16 = vsel %vm1216_vm3, %v2135_v5, 0.0  ;;  %v2004_v20 = vmax.f32 %v1689_v10, 0.0  ;;  %v1692_v21 = vadd.f32 %v6540_v9, %v1691_v17  ;;  %v4626_v22 = vpop.f32.mrb[127].mxu1 }
 0x2c1   :  { %v4845_v18 = vpop.eup %4844  ;;  %v1172_v19 = vpack.c.bf16 %v1106_v8, %v1105_v7  ;;  %2383 = vadd.xlane.f32.xlu1 %v2382_v16  ;;  %4856 = vpow2.f32 %v3994_v14  ;;  %v959_v26 = vpop.f32.mrb[236].mxu0 }
 0x2c2   :  { %v4847_v23 = vpop.eup %4846  ;;  %v3594_v24 = vadd.f32 0.005, %v3469_v13  ;;  %v3470_v25 = vmul.f32 0.995, %v4845_v18  ;;  %v2005_v28 = vmax.f32 %v1692_v21, 0.0  ;;  %v960_v30 = vadd.f32 %v6331_v12, %v959_v26  ;;  %v2279_v31 = vpop.xlane.xlu0 %2278 }
 0x2c3   :  { %v3098_v27 = vadd.f32 1.0, %v4847_v23  ;;  %v4477_v32 = vpop.f32.mrb[237].mxu0  ;;  %4732 = vmatmul.mubr.msk.bf16.gmra.mrb[232].mxu1 %vm1216_vm3, %v1172_v19  ;;  %v2136_v33 = vmul.f32 %v6534_v60, %v2004_v20  ;;  %v2602_v36 = vadd.f32 %v6277_v44, %v2279_v31 }
 0x2c4   :  { %v4849_v34 = vpop.eup %4848  ;;  %3720 = vst.msk [vmem:[%s7311_s7 + $0x90] sm:$0xff] %vm3701_vm4, %v3594_v24  ;;  %v3595_v35 = vadd.f32 0.005, %v3470_v25  ;;  %v962_v37 = vpop.f32.mrb[238].mxu0  ;;  %4735 = vmatprep.mubr.msk.bf16.mxu1 %vm5274_vm0, %v5273_v0  ;;  %v2137_v46 = vmul.f32 %v6534_v60, %v2005_v28  ;;  %v1107_v48 = vmax.f32 %v960_v30, 0.0 }
 0x2c5   :  { %4858 = vrcp.f32 %v3098_v27  ;;  %v3099_v38 = vadd.f32 1.0, %v4849_v34  ;;  %v963_v39 = vadd.f32 %v6331_v12, %v962_v37  ;;  %v2282_v40 = vpop.xlane.xlu1 %2281  ;;  %v4478_v41 = vpop.f32.mrb[239].mxu0  ;;  %v3995_v42 = vmul.f32 -1.442695, %v2602_v36 }
 0x2c6   :  { %3721 = vst.msk [vmem:[%s7311_s7 + $0x98] sm:$0xff] %vm3701_vm4, %v3595_v35  ;;  %v2603_v43 = vadd.f32 %v6277_v44, %v2282_v40  ;;  %v2385_v45 = vsel %vm1216_vm3, %v2136_v33, 0.0  ;;  %v1696_v29 = vpop.f32.mrb[128].mxu1  ;;  %v4851_v47 = vpop.eup %4850  ;;  %v2388_v53 = vsel %vm1216_vm3, %v2137_v46, 0.0 }
 0x2c7   :  { %4860 = vrcp.f32 %v3099_v38  ;;  %v1108_v49 = vmax.f32 %v963_v39, 0.0  ;;  %2386 = vadd.xlane.f32.xlu0 %v2385_v45  ;;  %v1697_v12 = vadd.f32 %v6540_v9, %v1696_v29  ;;  %v4629_v50 = vpop.f32.mrb[129].mxu1  ;;  %v3471_v52 = vmul.f32 0.995, %v4851_v47  ;;  %2389 = vadd.xlane.f32.xlu1 %v2388_v53 }
 0x2c8   :  { %4862 = vpow2.f32 %v3995_v42  ;;  %v3996_v51 = vmul.f32 -1.442695, %v2603_v43  ;;  %v1699_v54 = vpop.f32.mrb[130].mxu1  ;;  %v4853_v56 = vpop.eup %4852 }
 0x2c9   :  { %v1173_v57 = vpack.c.bf16 %v1108_v49, %v1107_v48  ;;  %v2006_v62 = vmax.f32 %v1697_v12, 0.0  ;;  %v1700_v58 = vadd.f32 %v6540_v9, %v1699_v54  ;;  %v4630_v59 = vpop.f32.mrb[131].mxu1  ;;  %v4855_v61 = vpop.eup %4854  ;;  %v3596_v63 = vadd.f32 0.005, %v3471_v52 }
 0x2ca   :  { %v3472_v1 = vmul.f32 0.995, %v4853_v56  ;;  %4864 = vpow2.f32 %v3996_v51  ;;  %v967_v2 = vpop.f32.mrb[240].mxu0  ;;  %v3100_v15 = vadd.f32 1.0, %v4855_v61  ;;  %v2285_v5 = vpop.xlane.xlu0 %2284 }
 0x2cb   :  { %v2007_v55 = vmax.f32 %v1700_v58, 0.0  ;;  %v968_v4 = vadd.f32 %v6569_v3, %v967_v2  ;;  %v4481_v6 = vpop.f32.mrb[241].mxu0  ;;  %4736 = vmatmul.mubr.msk.bf16.gmra.mrb[236].mxu1 %vm1216_vm3, %v1173_v57  ;;  %v2138_v7 = vmul.f32 %v6534_v60, %v2006_v62  ;;  %v4857_v8 = vpop.eup %4856  ;;  %3722 = vst.msk [vmem:[%s7311_s7 + $0xa0] sm:$0xff] %vm3701_vm4, %v3596_v63  ;;  %v2604_v11 = vadd.f32 %v6277_v44, %v2285_v5 }
 0x2cc   :  { %v3597_v10 = vadd.f32 0.005, %v3472_v1  ;;  %v970_v13 = vpop.f32.mrb[242].mxu0  ;;  %4739 = vmatprep.mubr.msk.bf16.mxu1 %vm5274_vm0, %v5273_v0  ;;  %4866 = vrcp.f32 %v3100_v15  ;;  %v3101_v14 = vadd.f32 1.0, %v4857_v8  ;;  %v2288_v17 = vpop.xlane.xlu1 %2287 }
 0x2cd   :  { %v971_v16 = vadd.f32 %v6569_v3, %v970_v13  ;;  %v4482_v18 = vpop.f32.mrb[243].mxu0  ;;  %v3997_v19 = vmul.f32 -1.442695, %v2604_v11  ;;  %v2605_v20 = vadd.f32 %v6277_v44, %v2288_v17  ;;  %v2391_v21 = vsel %vm1216_vm3, %v2138_v7, 0.0  ;;  %v1704_v22 = vpop.f32.mrb[132].mxu1 }
 0x2ce   :  { %3723 = vst.msk [vmem:[%s7311_s7 + $0xa8] sm:$0xff] %vm3701_vm4, %v3597_v10  ;;  %v2139_v23 = vmul.f32 %v6534_v60, %v2007_v55  ;;  %4868 = vrcp.f32 %v3101_v14  ;;  %v1109_v25 = vmax.f32 %v968_v4, 0.0  ;;  %2392 = vadd.xlane.f32.xlu0 %v2391_v21  ;;  %v1705_v27 = vadd.f32 %v6540_v9, %v1704_v22  ;;  %v4633_v28 = vpop.f32.mrb[133].mxu1 }
 0x2cf   :  { %v4859_v24 = vpop.eup %4858  ;;  %v1110_v26 = vmax.f32 %v971_v16, 0.0  ;;  %4870 = vpow2.f32 %v3997_v19  ;;  %v3998_v31 = vmul.f32 -1.442695, %v2605_v20  ;;  %v1707_v33 = vpop.f32.mrb[134].mxu1 }
 0x2d0   :  { %v3473_v30 = vmul.f32 0.995, %v4859_v24  ;;  %v2394_v32 = vsel %vm1216_vm3, %v2139_v23, 0.0  ;;  %v2008_v36 = vmax.f32 %v1705_v27, 0.0  ;;  %v1708_v37 = vadd.f32 %v6540_v9, %v1707_v33  ;;  %v4634_v38 = vpop.f32.mrb[135].mxu1 }
 0x2d1   :  { %v4861_v34 = vpop.eup %4860  ;;  %v1174_v35 = vpack.c.bf16 %v1110_v26, %v1109_v25  ;;  %2395 = vadd.xlane.f32.xlu1 %v2394_v32  ;;  %4872 = vpow2.f32 %v3998_v31  ;;  %v975_v42 = vpop.f32.mrb[244].mxu0 }
 0x2d2   :  { %v4863_v39 = vpop.eup %4862  ;;  %v3598_v40 = vadd.f32 0.005, %v3473_v30  ;;  %v3474_v41 = vmul.f32 0.995, %v4861_v34  ;;  %v2009_v45 = vmax.f32 %v1708_v37, 0.0  ;;  %v976_v29 = vadd.f32 %v6569_v3, %v975_v42  ;;  %v2291_v46 = vpop.xlane.xlu0 %2290 }
 0x2d3   :  { %v3102_v43 = vadd.f32 1.0, %v4863_v39  ;;  %v4485_v47 = vpop.f32.mrb[245].mxu0  ;;  %4740 = vmatmul.mubr.msk.bf16.gmra.mrb[240].mxu1 %vm1216_vm3, %v1174_v35  ;;  %v2140_v48 = vmul.f32 %v6534_v60, %v2008_v36  ;;  %v2606_v50 = vadd.f32 %v6277_v44, %v2291_v46 }
 0x2d4   :  { %v4865_v49 = vpop.eup %4864  ;;  %3724 = vst.msk [vmem:[%s7311_s7 + $0xb0] sm:$0xff] %vm3701_vm4, %v3598_v40  ;;  %v3599_v12 = vadd.f32 0.005, %v3474_v41  ;;  %v978_v52 = vpop.f32.mrb[246].mxu0  ;;  %4743 = vmatprep.mubr.msk.bf16.mxu1 %vm5274_vm0, %v5273_v0  ;;  %v2141_v61 = vmul.f32 %v6534_v60, %v2009_v45  ;;  %v1111_v1 = vmax.f32 %v976_v29, 0.0 }
 0x2d5   :  { %4874 = vrcp.f32 %v3102_v43  ;;  %v3103_v51 = vadd.f32 1.0, %v4865_v49  ;;  %v979_v53 = vadd.f32 %v6569_v3, %v978_v52  ;;  %v2294_v54 = vpop.xlane.xlu1 %2293  ;;  %v4486_v56 = vpop.f32.mrb[247].mxu0  ;;  %v3999_v57 = vmul.f32 -1.442695, %v2606_v50 }
 0x2d6   :  { %3725 = vst.msk [vmem:[%s7311_s7 + $0xb8] sm:$0xff] %vm3701_vm4, %v3599_v12  ;;  %v2607_v62 = vadd.f32 %v6277_v44, %v2294_v54  ;;  %v2397_v58 = vsel %vm1216_vm3, %v2140_v48, 0.0  ;;  %v1712_v59 = vpop.f32.mrb[136].mxu1  ;;  %v4867_v63 = vpop.eup %4866  ;;  %v2400_v6 = vsel %vm1216_vm3, %v2141_v61, 0.0 }
 0x2d7   :  { %4876 = vrcp.f32 %v3103_v51  ;;  %v1112_v2 = vmax.f32 %v979_v53, 0.0  ;;  %2398 = vadd.xlane.f32.xlu0 %v2397_v58  ;;  %v1713_v15 = vadd.f32 %v6540_v9, %v1712_v59  ;;  %v4637_v55 = vpop.f32.mrb[137].mxu1  ;;  %v3475_v4 = vmul.f32 0.995, %v4867_v63  ;;  %2401 = vadd.xlane.f32.xlu1 %v2400_v6 }
 0x2d8   :  { %4878 = vpow2.f32 %v3999_v57  ;;  %v4000_v5 = vmul.f32 -1.442695, %v2607_v62  ;;  %v1715_v7 = vpop.f32.mrb[138].mxu1  ;;  %v4869_v8 = vpop.eup %4868 }
 0x2d9   :  { %v1175_v10 = vpack.c.bf16 %v1112_v2, %v1111_v1  ;;  %v2010_v11 = vmax.f32 %v1713_v15, 0.0  ;;  %v1716_v13 = vadd.f32 %v6540_v9, %v1715_v7  ;;  %v4638_v14 = vpop.f32.mrb[139].mxu1  ;;  %v4871_v16 = vpop.eup %4870  ;;  %v3600_v17 = vadd.f32 0.005, %v3475_v4 }
 0x2da   :  { %v3476_v18 = vmul.f32 0.995, %v4869_v8  ;;  %4880 = vpow2.f32 %v4000_v5  ;;  %v983_v19 = vpop.f32.mrb[248].mxu0  ;;  %v3104_v20 = vadd.f32 1.0, %v4871_v16  ;;  %v2297_v23 = vpop.xlane.xlu0 %2296 }
 0x2db   :  { %v2011_v21 = vmax.f32 %v1716_v13, 0.0  ;;  %v984_v22 = vadd.f32 %v6569_v3, %v983_v19  ;;  %v4489_v24 = vpop.f32.mrb[249].mxu0  ;;  %4744 = vmatmul.mubr.msk.bf16.gmra.mrb[244].mxu1 %vm1216_vm3, %v1175_v10  ;;  %v2142_v25 = vmul.f32 %v6534_v60, %v2010_v11  ;;  %v4873_v26 = vpop.eup %4872  ;;  %3726 = vst.msk [vmem:[%s7311_s7 + $0xc0] sm:$0xff] %vm3701_vm4, %v3600_v17  ;;  %v2608_v28 = vadd.f32 %v6277_v44, %v2297_v23 }
 0x2dc   :  { %v3601_v27 = vadd.f32 0.005, %v3476_v18  ;;  %v986_v30 = vpop.f32.mrb[250].mxu0  ;;  %4747 = vmatprep.mubr.msk.bf16.mxu1 %vm5274_vm0, %v5273_v0  ;;  %4882 = vrcp.f32 %v3104_v20  ;;  %v3105_v3 = vadd.f32 1.0, %v4873_v26  ;;  %v2300_v32 = vpop.xlane.xlu1 %2299 }
 0x2dd   :  { %v1113_v31 = vmax.f32 %v984_v22, 0.0  ;;  %v4490_v33 = vpop.f32.mrb[251].mxu0  ;;  %v2403_v34 = vsel %vm1216_vm3, %v2142_v25, 0.0  ;;  %v4001_v35 = vmul.f32 -1.442695, %v2608_v28  ;;  %v2609_v36 = vadd.f32 %v6277_v44, %v2300_v32  ;;  %v1720_v37 = vpop.f32.mrb[140].mxu1 }
 0x2de   :  { %3727 = vst.msk [vmem:[%s7311_s7 + $0xc8] sm:$0xff] %vm3701_vm4, %v3601_v27  ;;  %2404 = vadd.xlane.f32.xlu0 %v2403_v34  ;;  %v2143_v38 = vmul.f32 %v6534_v60, %v2011_v21  ;;  %4884 = vrcp.f32 %v3105_v3  ;;  %v1721_v40 = vadd.f32 %v6540_v9, %v1720_v37  ;;  %v4641_v41 = vpop.f32.mrb[141].mxu1 }
 0x2df   :  { %v4875_v0 = vpop.eup %4874  ;;  %v1176_v39 = vpack.c.bf16 %v1113_v31, %v1113_v31  ;;  %4886 = vpow2.f32 %v4001_v35  ;;  %v4002_v43 = vmul.f32 -1.442695, %v2609_v36  ;;  %v1723_v29 = vpop.f32.mrb[142].mxu1 }
 0x2e0   :  { %v3477_v42 = vmul.f32 0.995, %v4875_v0  ;;  %v2406_v45 = vsel %vm1216_vm3, %v2143_v38, 0.0  ;;  %v2012_v47 = vmax.f32 %v1721_v40, 0.0  ;;  %v1724_v48 = vadd.f32 %v6540_v9, %v1723_v29  ;;  %v4642_v49 = vpop.f32.mrb[143].mxu1 }
 0x2e1   :  { %v4877_v46 = vpop.eup %4876  ;;  %2407 = vadd.xlane.f32.xlu1 %v2406_v45  ;;  %4888 = vpow2.f32 %v4002_v43 }
 0x2e2   :  { %v4879_v12 = vpop.eup %4878  ;;  %v3602_v50 = vadd.f32 0.005, %v3477_v42  ;;  %v3478_v52 = vmul.f32 0.995, %v4877_v46  ;;  %v2013_v53 = vmax.f32 %v1724_v48, 0.0  ;;  %v2303_v54 = vpop.xlane.xlu0 %2302  ;;  %v2144_v56 = vmul.f32 %v6534_v60, %v2012_v47 }
 0x2e3   :  { %v3106_v51 = vadd.f32 1.0, %v4879_v12  ;;  %4748 = vmatmul.mubr.msk.bf16.gmra.mrb[248].mxu1 %vm1216_vm3, %v1176_v39  ;;  %v2610_v58 = vadd.f32 %v6277_v44, %v2303_v54 }
 0x2e4   :  { %v4881_v57 = vpop.eup %4880  ;;  %3728 = vst.msk [vmem:[%s7311_s7 + $0xd0] sm:$0xff] %vm3701_vm4, %v3602_v50  ;;  %v3603_v62 = vadd.f32 0.005, %v3478_v52  ;;  %v2306_v61 = vpop.xlane.xlu1 %2305  ;;  %v2409_v63 = vsel %vm1216_vm3, %v2144_v56, 0.0  ;;  %v2145_v1 = vmul.f32 %v6534_v60, %v2013_v53 }
 0x2e5   :  { %4890 = vrcp.f32 %v3106_v51  ;;  %v3107_v59 = vadd.f32 1.0, %v4881_v57  ;;  %v4003_v2 = vmul.f32 -1.442695, %v2610_v58  ;;  %v2611_v15 = vadd.f32 %v6277_v44, %v2306_v61  ;;  %2410 = vadd.xlane.f32.xlu0 %v2409_v63  ;;  %v1728_v55 = vpop.f32.mrb[144].mxu1 }
 0x2e6   :  { %3729 = vst.msk [vmem:[%s7311_s7 + $0xd8] sm:$0xff] %vm3701_vm4, %v3603_v62  ;;  %v4883_v4 = vpop.eup %4882  ;;  %v1729_v5 = vadd.f32 %v6540_v9, %v1728_v55  ;;  %v4645_v6 = vpop.f32.mrb[145].mxu1  ;;  %v2412_v7 = vsel %vm1216_vm3, %v2145_v1, 0.0 }
 0x2e7   :  { %4892 = vrcp.f32 %v3107_v59  ;;  %v3479_v8 = vmul.f32 0.995, %v4883_v4  ;;  %v4004_v10 = vmul.f32 -1.442695, %v2611_v15  ;;  %2413 = vadd.xlane.f32.xlu1 %v2412_v7  ;;  %v1731_v11 = vpop.f32.mrb[146].mxu1 }
 0x2e8   :  { %4894 = vpow2.f32 %v4003_v2  ;;  %v4885_v13 = vpop.eup %4884  ;;  %v2014_v14 = vmax.f32 %v1729_v5, 0.0  ;;  %v1732_v16 = vadd.f32 %v6540_v9, %v1731_v11  ;;  %v4646_v17 = vpop.f32.mrb[147].mxu1 }
 0x2e9   :  { %v4887_v18 = vpop.eup %4886  ;;  %v3604_v19 = vadd.f32 0.005, %v3479_v8  ;;  %v3480_v20 = vmul.f32 0.995, %v4885_v13  ;;  %4896 = vpow2.f32 %v4004_v10 }
 0x2ea   :  { %v3108_v21 = vadd.f32 1.0, %v4887_v18  ;;  %v2015_v22 = vmax.f32 %v1732_v16, 0.0  ;;  %v2309_v23 = vpop.xlane.xlu0 %2308  ;;  %v2146_v24 = vmul.f32 %v6534_v60, %v2014_v14 }
 0x2eb   :  { %v4889_v25 = vpop.eup %4888  ;;  %3730 = vst.msk [vmem:[%s7311_s7 + $0xe0] sm:$0xff] %vm3701_vm4, %v3604_v19  ;;  %v3605_v26 = vadd.f32 0.005, %v3480_v20  ;;  %v2612_v27 = vadd.f32 %v6277_v44, %v2309_v23 }
 0x2ec   :  { %4898 = vrcp.f32 %v3108_v21  ;;  %v3109_v28 = vadd.f32 1.0, %v4889_v25  ;;  %v2312_v30 = vpop.xlane.xlu1 %2311  ;;  %v2415_v3 = vsel %vm1216_vm3, %v2146_v24, 0.0  ;;  %v2147_v31 = vmul.f32 %v6534_v60, %v2015_v22 }
 0x2ed   :  { %3731 = vst.msk [vmem:[%s7311_s7 + $0xe8] sm:$0xff] %vm3701_vm4, %v3605_v26  ;;  %v4005_v32 = vmul.f32 -1.442695, %v2612_v27  ;;  %v2613_v33 = vadd.f32 %v6277_v44, %v2312_v30  ;;  %2416 = vadd.xlane.f32.xlu0 %v2415_v3  ;;  %v1736_v34 = vpop.f32.mrb[148].mxu1 }
 0x2ee   :  { %4900 = vrcp.f32 %v3109_v28  ;;  %v1737_v36 = vadd.f32 %v6540_v9, %v1736_v34  ;;  %v4649_v37 = vpop.f32.mrb[149].mxu1  ;;  %v2418_v38 = vsel %vm1216_vm3, %v2147_v31, 0.0 }
 0x2ef   :  { %v4891_v35 = vpop.eup %4890  ;;  %4902 = vpow2.f32 %v4005_v32  ;;  %v4006_v39 = vmul.f32 -1.442695, %v2613_v33  ;;  %2419 = vadd.xlane.f32.xlu1 %v2418_v38  ;;  %v1739_v40 = vpop.f32.mrb[150].mxu1 }
 0x2f0   :  { %v3481_v0 = vmul.f32 0.995, %v4891_v35  ;;  %v2016_v42 = vmax.f32 %v1737_v36, 0.0  ;;  %v1740_v43 = vadd.f32 %v6540_v9, %v1739_v40  ;;  %v4650_v45 = vpop.f32.mrb[151].mxu1 }
 0x2f1   :  { %v4893_v41 = vpop.eup %4892  ;;  %4904 = vpow2.f32 %v4006_v39 }
 0x2f2   :  { %v4895_v29 = vpop.eup %4894  ;;  %v3606_v46 = vadd.f32 0.005, %v3481_v0  ;;  %v3482_v47 = vmul.f32 0.995, %v4893_v41  ;;  %v2017_v49 = vmax.f32 %v1740_v43, 0.0  ;;  %v2315_v12 = vpop.xlane.xlu0 %2314  ;;  %v2148_v50 = vmul.f32 %v6534_v60, %v2016_v42 }
 0x2f3   :  { %v3110_v48 = vadd.f32 1.0, %v4895_v29  ;;  %v4897_v52 = vpop.eup %4896  ;;  %v2614_v53 = vadd.f32 %v6277_v44, %v2315_v12 }
 0x2f4   :  { %3732 = vst.msk [vmem:[%s7311_s7 + $0xf0] sm:$0xff] %vm3701_vm4, %v3606_v46  ;;  %v3607_v51 = vadd.f32 0.005, %v3482_v47  ;;  %v3111_v54 = vadd.f32 1.0, %v4897_v52  ;;  %v2318_v56 = vpop.xlane.xlu1 %2317  ;;  %v2421_v57 = vsel %vm1216_vm3, %v2148_v50, 0.0  ;;  %v2149_v62 = vmul.f32 %v6534_v60, %v2017_v49 }
 0x2f5   :  { %4906 = vrcp.f32 %v3110_v48  ;;  %v4007_v58 = vmul.f32 -1.442695, %v2614_v53  ;;  %v2615_v59 = vadd.f32 %v6277_v44, %v2318_v56  ;;  %2422 = vadd.xlane.f32.xlu0 %v2421_v57  ;;  %v1744_v61 = vpop.f32.mrb[152].mxu1 }
 0x2f6   :  { %3733 = vst.msk [vmem:[%s7311_s7 + $0xf8] sm:$0xff] %vm3701_vm4, %v3607_v51  ;;  %v4899_v63 = vpop.eup %4898  ;;  %4908 = vrcp.f32 %v3111_v54  ;;  %v1745_v1 = vadd.f32 %v6540_v9, %v1744_v61  ;;  %v4653_v2 = vpop.f32.mrb[153].mxu1  ;;  %v2424_v15 = vsel %vm1216_vm3, %v2149_v62, 0.0 }
 0x2f7   :  { %v3483_v55 = vmul.f32 0.995, %v4899_v63  ;;  %4910 = vpow2.f32 %v4007_v58  ;;  %v4008_v4 = vmul.f32 -1.442695, %v2615_v59  ;;  %2425 = vadd.xlane.f32.xlu1 %v2424_v15  ;;  %v1747_v5 = vpop.f32.mrb[154].mxu1 }
 0x2f8   :  { %v4901_v6 = vpop.eup %4900  ;;  %v2018_v7 = vmax.f32 %v1745_v1, 0.0  ;;  %v1748_v8 = vadd.f32 %v6540_v9, %v1747_v5  ;;  %v4654_v10 = vpop.f32.mrb[155].mxu1 }
 0x2f9   :  { %v4903_v11 = vpop.eup %4902  ;;  %v3608_v13 = vadd.f32 0.005, %v3483_v55  ;;  %v3484_v14 = vmul.f32 0.995, %v4901_v6  ;;  %4912 = vpow2.f32 %v4008_v4 }
 0x2fa   :  { %v3112_v16 = vadd.f32 1.0, %v4903_v11  ;;  %v2019_v17 = vmax.f32 %v1748_v8, 0.0  ;;  %v2321_v18 = vpop.xlane.xlu0 %2320  ;;  %v2150_v19 = vmul.f32 %v6534_v60, %v2018_v7 }
 0x2fb   :  { %v4905_v20 = vpop.eup %4904  ;;  %3734 = vst.msk [vmem:[%s7311_s7 + $0x100] sm:$0xff] %vm3701_vm4, %v3608_v13  ;;  %v3609_v21 = vadd.f32 0.005, %v3484_v14  ;;  %v2616_v22 = vadd.f32 %v6277_v44, %v2321_v18 }
 0x2fc   :  { %4914 = vrcp.f32 %v3112_v16  ;;  %v3113_v23 = vadd.f32 1.0, %v4905_v20  ;;  %v2427_v24 = vsel %vm1216_vm3, %v2150_v19, 0.0  ;;  %v2151_v25 = vmul.f32 %v6534_v60, %v2019_v17  ;;  %v2324_v27 = vpop.xlane.xlu1 %2323 }
 0x2fd   :  { %3735 = vst.msk [vmem:[%s7311_s7 + $0x108] sm:$0xff] %vm3701_vm4, %v3609_v21  ;;  %v4009_v26 = vmul.f32 -1.442695, %v2616_v22  ;;  %2428 = vadd.xlane.f32.xlu0 %v2427_v24  ;;  %v1752_v28 = vpop.f32.mrb[156].mxu1  ;;  %v2617_v3 = vadd.f32 %v6277_v44, %v2324_v27 }
 0x2fe   :  { %4916 = vrcp.f32 %v3113_v23  ;;  %v1753_v31 = vadd.f32 %v6540_v9, %v1752_v28  ;;  %v4657_v32 = vpop.f32.mrb[157].mxu1  ;;  %v2430_v33 = vsel %vm1216_vm3, %v2151_v25, 0.0 }
 0x2ff   :  { %v4907_v30 = vpop.eup %4906  ;;  %4918 = vpow2.f32 %v4009_v26  ;;  %2431 = vadd.xlane.f32.xlu1 %v2430_v33  ;;  %v1755_v35 = vpop.f32.mrb[158].mxu1  ;;  %v4010_v37 = vmul.f32 -1.442695, %v2617_v3 }
 0x300   :  { %v3485_v34 = vmul.f32 0.995, %v4907_v30  ;;  %v4909_v36 = vpop.eup %4908  ;;  %v2020_v38 = vmax.f32 %v1753_v31, 0.0  ;;  %v1756_v0 = vadd.f32 %v6540_v9, %v1755_v35  ;;  %v4658_v39 = vpop.f32.mrb[159].mxu1 }
 0x301   :  { %v4911_v40 = vpop.eup %4910  ;;  %v3486_v42 = vmul.f32 0.995, %v4909_v36  ;;  %4920 = vpow2.f32 %v4010_v37 }
 0x302   :  { %v3610_v41 = vadd.f32 0.005, %v3485_v34  ;;  %v3114_v43 = vadd.f32 1.0, %v4911_v40  ;;  %v2021_v45 = vmax.f32 %v1756_v0, 0.0  ;;  %v2327_v29 = vpop.xlane.xlu0 %2326  ;;  %v2152_v46 = vmul.f32 %v6534_v60, %v2020_v38 }
 0x303   :  { %v4913_v47 = vpop.eup %4912  ;;  %v3611_v48 = vadd.f32 0.005, %v3486_v42  ;;  %v2618_v49 = vadd.f32 %v6277_v44, %v2327_v29 }
 0x304   :  { %3736 = vst.msk [vmem:[%s7311_s7 + $0x110] sm:$0xff] %vm3701_vm4, %v3610_v41  ;;  %4922 = vrcp.f32 %v3114_v43  ;;  %v3115_v12 = vadd.f32 1.0, %v4913_v47  ;;  %v2433_v50 = vsel %vm1216_vm3, %v2152_v46, 0.0  ;;  %v2153_v52 = vmul.f32 %v6534_v60, %v2021_v45  ;;  %v2330_v53 = vpop.xlane.xlu1 %2329 }
 0x305   :  { %3737 = vst.msk [vmem:[%s7311_s7 + $0x118] sm:$0xff] %vm3701_vm4, %v3611_v48  ;;  %v4011_v51 = vmul.f32 -1.442695, %v2618_v49  ;;  %2434 = vadd.xlane.f32.xlu0 %v2433_v50  ;;  %v1760_v54 = vpop.f32.mrb[160].mxu1  ;;  %v2619_v57 = vadd.f32 %v6277_v44, %v2330_v53 }
 0x306   :  { %v4915_v56 = vpop.eup %4914  ;;  %4924 = vrcp.f32 %v3115_v12  ;;  %v1761_v62 = vadd.f32 %v6540_v9, %v1760_v54  ;;  %v4661_v58 = vpop.f32.mrb[161].mxu1  ;;  %v2436_v59 = vsel %vm1216_vm3, %v2153_v52, 0.0 }
 0x307   :  { %v3487_v61 = vmul.f32 0.995, %v4915_v56  ;;  %4926 = vpow2.f32 %v4011_v51  ;;  %2437 = vadd.xlane.f32.xlu1 %v2436_v59  ;;  %v1763_v63 = vpop.f32.mrb[162].mxu1  ;;  %v4012_v2 = vmul.f32 -1.442695, %v2619_v57 }
 0x308   :  { %v4917_v1 = vpop.eup %4916  ;;  %v2022_v15 = vmax.f32 %v1761_v62, 0.0  ;;  %v1764_v55 = vadd.f32 %v6540_v9, %v1763_v63  ;;  %v4662_v4 = vpop.f32.mrb[163].mxu1 }
 0x309   :  { %v4919_v5 = vpop.eup %4918  ;;  %v3612_v6 = vadd.f32 0.005, %v3487_v61  ;;  %v3488_v7 = vmul.f32 0.995, %v4917_v1  ;;  %4928 = vpow2.f32 %v4012_v2 }
 0x30a   :  { %v3116_v8 = vadd.f32 1.0, %v4919_v5  ;;  %v2023_v10 = vmax.f32 %v1764_v55, 0.0  ;;  %v2154_v11 = vmul.f32 %v6534_v60, %v2022_v15  ;;  %v2333_v14 = vpop.xlane.xlu0 %2332 }
 0x30b   :  { %3738 = vst.msk [vmem:[%s7311_s7 + $0x120] sm:$0xff] %vm3701_vm4, %v3612_v6  ;;  %v3613_v13 = vadd.f32 0.005, %v3488_v7  ;;  %v4921_v16 = vpop.eup %4920  ;;  %v2620_v17 = vadd.f32 %v6277_v44, %v2333_v14 }
 0x30c   :  { %4930 = vrcp.f32 %v3116_v8  ;;  %v2439_v18 = vsel %vm1216_vm3, %v2154_v11, 0.0  ;;  %v2155_v19 = vmul.f32 %v6534_v60, %v2023_v10  ;;  %v3117_v20 = vadd.f32 1.0, %v4921_v16 }
 0x30d   :  { %3739 = vst.msk [vmem:[%s7311_s7 + $0x128] sm:$0xff] %vm3701_vm4, %v3613_v13  ;;  %2440 = vadd.xlane.f32.xlu0 %v2439_v18  ;;  %v1768_v21 = vpop.f32.mrb[164].mxu1  ;;  %v4013_v23 = vmul.f32 -1.442695, %v2620_v17 }
 0x30e   :  { %v4923_v22 = vpop.eup %4922  ;;  %v2336_v24 = vpop.xlane.xlu1 %2335  ;;  %v1769_v25 = vadd.f32 %v6540_v9, %v1768_v21  ;;  %v2442_v27 = vsel %vm1216_vm3, %v2155_v19, 0.0  ;;  %4932 = vrcp.f32 %v3117_v20 }
 0x30f   :  { %v4665_v26 = vpop.f32.mrb[165].mxu1  ;;  %v3489_v28 = vmul.f32 0.995, %v4923_v22  ;;  %v2621_v30 = vadd.f32 %v6277_v44, %v2336_v24  ;;  %2443 = vadd.xlane.f32.xlu1 %v2442_v27  ;;  %4934 = vpow2.f32 %v4013_v23 }
 0x310   :  { %v1771_v3 = vpop.f32.mrb[166].mxu1  ;;  %v4925_v31 = vpop.eup %4924  ;;  %v2024_v32 = vmax.f32 %v1769_v25, 0.0 }
 0x311   :  { %v1772_v33 = vadd.f32 %v6540_v9, %v1771_v3  ;;  %v4666_v34 = vpop.f32.mrb[167].mxu1  ;;  %v4927_v35 = vpop.eup %4926  ;;  %v3614_v36 = vadd.f32 0.005, %v3489_v28  ;;  %v3490_v37 = vmul.f32 0.995, %v4925_v31 }
 0x312   :  { %v4014_v38 = vmul.f32 -1.442695, %v2621_v30  ;;  %v3118_v0 = vadd.f32 1.0, %v4927_v35  ;;  %v2156_v40 = vmul.f32 %v6534_v60, %v2024_v32  ;;  %v2339_v42 = vpop.xlane.xlu0 %2338 }
 0x313   :  { %v2025_v39 = vmax.f32 %v1772_v33, 0.0  ;;  %3740 = vst.msk [vmem:[%s7311_s7 + $0x130] sm:$0xff] %vm3701_vm4, %v3614_v36  ;;  %v3615_v41 = vadd.f32 0.005, %v3490_v37  ;;  %v4929_v43 = vpop.eup %4928  ;;  %v2622_v45 = vadd.f32 %v6277_v44, %v2339_v42 }
 0x314   :  { %4936 = vpow2.f32 %v4014_v38  ;;  %v2445_v29 = vsel %vm1216_vm3, %v2156_v40, 0.0  ;;  %v3119_v47 = vadd.f32 1.0, %v4929_v43 }
 0x315   :  { %4938 = vrcp.f32 %v3118_v0  ;;  %v2157_v46 = vmul.f32 %v6534_v60, %v2025_v39  ;;  %3741 = vst.msk [vmem:[%s7311_s7 + $0x138] sm:$0xff] %vm3701_vm4, %v3615_v41  ;;  %2446 = vadd.xlane.f32.xlu0 %v2445_v29  ;;  %v1776_v48 = vpop.f32.mrb[168].mxu1  ;;  %v4015_v12 = vmul.f32 -1.442695, %v2622_v45 }
 0x316   :  { %v4931_v49 = vpop.eup %4930  ;;  %v2342_v50 = vpop.xlane.xlu1 %2341  ;;  %v1777_v52 = vadd.f32 %v6540_v9, %v1776_v48  ;;  %4940 = vrcp.f32 %v3119_v47 }
 0x317   :  { %v4669_v51 = vpop.f32.mrb[169].mxu1  ;;  %v2448_v53 = vsel %vm1216_vm3, %v2157_v46, 0.0  ;;  %v3491_v54 = vmul.f32 0.995, %v4931_v49  ;;  %v2623_v56 = vadd.f32 %v6277_v44, %v2342_v50  ;;  %4942 = vpow2.f32 %v4015_v12 }
 0x318   :  { %2449 = vadd.xlane.f32.xlu1 %v2448_v53  ;;  %v1779_v57 = vpop.f32.mrb[170].mxu1  ;;  %v2026_v62 = vmax.f32 %v1777_v52, 0.0  ;;  %v4933_v61 = vpop.eup %4932 }
 0x319   :  { %v1780_v58 = vadd.f32 %v6540_v9, %v1779_v57  ;;  %v4670_v59 = vpop.f32.mrb[171].mxu1  ;;  %v3616_v63 = vadd.f32 0.005, %v3491_v54  ;;  %v4016_v1 = vmul.f32 -1.442695, %v2623_v56  ;;  %v4935_v2 = vpop.eup %4934 }
 0x31a   :  { %v3492_v15 = vmul.f32 0.995, %v4933_v61  ;;  %v2158_v4 = vmul.f32 %v6534_v60, %v2026_v62  ;;  %v3120_v5 = vadd.f32 1.0, %v4935_v2  ;;  %v6780_v54 = vld [vmem:[%s7308_s4] ss:$0 sm:$0xff] }
 0x31b   :  { %v2027_v55 = vmax.f32 %v1780_v58, 0.0  ;;  %3742 = vst.msk [vmem:[%s7311_s7 + $0x140] sm:$0xff] %vm3701_vm4, %v3616_v63  ;;  %4944 = vpow2.f32 %v4016_v1  ;;  %v2345_v6 = vpop.xlane.xlu0 %2344  ;;  %v6786_v62 = vld [vmem:[%s7309_s5] ss:$0 sm:$0xff] }
 0x31c   :  { %v3617_v7 = vadd.f32 0.005, %v3492_v15  ;;  %v2624_v8 = vadd.f32 %v6277_v44, %v2345_v6  ;;  %v2451_v10 = vsel %vm1216_vm3, %v2158_v4, 0.0  ;;  %4946 = vrcp.f32 %v3120_v5 }
 0x31d   :  { %v2159_v11 = vmul.f32 %v6534_v60, %v2027_v55  ;;  %2452 = vadd.xlane.f32.xlu0 %v2451_v10  ;;  %v1784_v16 = vpop.f32.mrb[172].mxu1 }
 0x31e   :  { %v4937_v13 = vpop.eup %4936  ;;  %v2348_v14 = vpop.xlane.xlu1 %2347  ;;  %3743 = vst.msk [vmem:[%s7311_s7 + $0x148] sm:$0xff] %vm3701_vm4, %v3617_v7  ;;  %v4017_v19 = vmul.f32 -1.442695, %v2624_v8  ;;  %v1785_v21 = vadd.f32 %v6540_v9, %v1784_v16 }
 0x31f   :  { %v4939_v17 = vpop.eup %4938  ;;  %v3121_v18 = vadd.f32 1.0, %v4937_v13  ;;  %v2625_v20 = vadd.f32 %v6277_v44, %v2348_v14  ;;  %v4673_v22 = vpop.f32.mrb[173].mxu1  ;;  %v2454_v24 = vsel %vm1216_vm3, %v2159_v11, 0.0 }
 0x320   :  { %v3493_v23 = vmul.f32 0.995, %v4939_v17  ;;  %v1787_v25 = vpop.f32.mrb[174].mxu1  ;;  %v2028_v27 = vmax.f32 %v1785_v21, 0.0  ;;  %2455 = vadd.xlane.f32.xlu1 %v2454_v24  ;;  %v4941_v3 = vpop.eup %4940 }
 0x321   :  { %4948 = vrcp.f32 %v3121_v18  ;;  %v4018_v26 = vmul.f32 -1.442695, %v2625_v20  ;;  %v1788_v28 = vadd.f32 %v6540_v9, %v1787_v25  ;;  %v4674_v30 = vpop.f32.mrb[175].mxu1  ;;  %v4943_v32 = vpop.eup %4942  ;;  %v3494_v33 = vmul.f32 0.995, %v4941_v3 }
 0x322   :  { %v3618_v31 = vadd.f32 0.005, %v3493_v23  ;;  %4950 = vpow2.f32 %v4017_v19  ;;  %v2160_v35 = vmul.f32 %v6534_v60, %v2028_v27  ;;  %v3122_v36 = vadd.f32 1.0, %v4943_v32  ;;  %v2351_v37 = vpop.xlane.xlu0 %2350 }
 0x323   :  { %4952 = vpow2.f32 %v4018_v26  ;;  %v2029_v34 = vmax.f32 %v1788_v28, 0.0  ;;  %v3619_v38 = vadd.f32 0.005, %v3494_v33  ;;  %v2626_v0 = vadd.f32 %v6277_v44, %v2351_v37 }
 0x324   :  { %3744 = vst.msk [vmem:[%s7311_s7 + $0x150] sm:$0xff] %vm3701_vm4, %v3618_v31  ;;  %v2457_v39 = vsel %vm1216_vm3, %v2160_v35, 0.0  ;;  %4954 = vrcp.f32 %v3122_v36  ;;  %v2354_v42 = vpop.xlane.xlu1 %2353 }
 0x325   :  { %v2161_v40 = vmul.f32 %v6534_v60, %v2029_v34  ;;  %v4945_v41 = vpop.eup %4944  ;;  %2458 = vadd.xlane.f32.xlu0 %v2457_v39  ;;  %v1792_v43 = vpop.f32.mrb[176].mxu1  ;;  %3745 = vst.msk [vmem:[%s7311_s7 + $0x158] sm:$0xff] %vm3701_vm4, %v3619_v38  ;;  %v4019_v29 = vmul.f32 -1.442695, %v2626_v0  ;;  %v2627_v46 = vadd.f32 %v6277_v44, %v2354_v42 }
 0x326   :  { %v3123_v45 = vadd.f32 1.0, %v4945_v41  ;;  %v1793_v47 = vadd.f32 %v6540_v9, %v1792_v43  ;;  %v4677_v48 = vpop.f32.mrb[177].mxu1  ;;  %v4947_v49 = vpop.eup %4946 }
 0x327   :  { %v2460_v60 = vsel %vm1216_vm3, %v2161_v40, 0.0  ;;  %v1795_v12 = vpop.f32.mrb[178].mxu1  ;;  %v3495_v50 = vmul.f32 0.995, %v4947_v49  ;;  %v4020_v52 = vmul.f32 -1.442695, %v2627_v46 }
 0x328   :  { %4956 = vrcp.f32 %v3123_v45  ;;  %v2030_v51 = vmax.f32 %v1793_v47, 0.0  ;;  %2461 = vadd.xlane.f32.xlu1 %v2460_v60  ;;  %v4678_v53 = vpop.f32.mrb[179].mxu1  ;;  %v1796_v56 = vadd.f32 %v6780_v54, %v1795_v12 }
 0x329   :  { %4958 = vpow2.f32 %v4019_v29  ;;  %v3620_v57 = vadd.f32 0.005, %v3495_v50 }
 0x32a   :  { %4960 = vpow2.f32 %v4020_v52  ;;  %v2162_v58 = vmul.f32 %v6786_v62, %v2030_v51  ;;  %v2031_v63 = vmax.f32 %v1796_v56, 0.0 }
 0x32b   :  { %v4949_v9 = vpop.eup %4948  ;;  %v2357_v1 = vpop.xlane.xlu0 %2356  ;;  %3746 = vst.msk [vmem:[%s7311_s7 + $0x160] sm:$0xff] %vm3701_vm4, %v3620_v57 }
 0x32c   :  { %v4951_v59 = vpop.eup %4950  ;;  %v3496_v61 = vmul.f32 0.995, %v4949_v9  ;;  %v2628_v55 = vadd.f32 %v6277_v44, %v2357_v1  ;;  %v2463_v4 = vsel %vm1216_vm3, %v2162_v58, 0.0  ;;  %v2163_v10 = vmul.f32 %v6786_v62, %v2031_v63 }
 0x32d   :  { %v4953_v2 = vpop.eup %4952  ;;  %v3124_v15 = vadd.f32 1.0, %v4951_v59  ;;  %2464 = vadd.xlane.f32.xlu0 %v2463_v4  ;;  %v1800_v8 = vpop.f32.mrb[180].mxu1 }
 0x32e   :  { %v3621_v5 = vadd.f32 0.005, %v3496_v61  ;;  %v3125_v6 = vadd.f32 1.0, %v4953_v2  ;;  %v2360_v7 = vpop.xlane.xlu1 %2359  ;;  %v4021_v11 = vmul.f32 -1.442695, %v2628_v55  ;;  %v1801_v14 = vadd.f32 %v6780_v54, %v1800_v8  ;;  %v4681_v16 = vpop.f32.mrb[181].mxu1 }
 0x32f   :  { %4962 = vrcp.f32 %v3124_v15  ;;  %v2629_v13 = vadd.f32 %v6277_v44, %v2360_v7  ;;  %v4955_v17 = vpop.eup %4954  ;;  %v2466_v18 = vsel %vm1216_vm3, %v2163_v10, 0.0  ;;  %v1803_v19 = vpop.f32.mrb[182].mxu1 }
 0x330   :  { %3747 = vst.msk [vmem:[%s7311_s7 + $0x168] sm:$0xff] %vm3701_vm4, %v3621_v5  ;;  %4964 = vrcp.f32 %v3125_v6  ;;  %v3497_v20 = vmul.f32 0.995, %v4955_v17  ;;  %v2032_v22 = vmax.f32 %v1801_v14, 0.0  ;;  %2467 = vadd.xlane.f32.xlu1 %v2466_v18  ;;  %v4682_v23 = vpop.f32.mrb[183].mxu1  ;;  %v1804_v24 = vadd.f32 %v6780_v54, %v1803_v19 }
 0x331   :  { %4966 = vpow2.f32 %v4021_v11  ;;  %v4022_v21 = vmul.f32 -1.442695, %v2629_v13 }
 0x332   :  { %v4957_v25 = vpop.eup %4956  ;;  %v3622_v26 = vadd.f32 0.005, %v3497_v20  ;;  %v2164_v27 = vmul.f32 %v6786_v62, %v2032_v22  ;;  %v2033_v3 = vmax.f32 %v1804_v24, 0.0 }
 0x333   :  { %4968 = vpow2.f32 %v4022_v21  ;;  %v4959_v28 = vpop.eup %4958  ;;  %v3498_v30 = vmul.f32 0.995, %v4957_v25 }
 0x334   :  { %v2363_v31 = vpop.xlane.xlu0 %2362  ;;  %v4961_v32 = vpop.eup %4960  ;;  %3748 = vst.msk [vmem:[%s7311_s7 + $0x170] sm:$0xff] %vm3701_vm4, %v3622_v26  ;;  %v3126_v33 = vadd.f32 1.0, %v4959_v28  ;;  %v2469_v35 = vsel %vm1216_vm3, %v2164_v27, 0.0  ;;  %v2165_v39 = vmul.f32 %v6786_v62, %v2033_v3 }
 0x335   :  { %v2630_v34 = vadd.f32 %v6277_v44, %v2363_v31  ;;  %v3623_v36 = vadd.f32 0.005, %v3498_v30  ;;  %v3127_v37 = vadd.f32 1.0, %v4961_v32  ;;  %v2366_v38 = vpop.xlane.xlu1 %2365  ;;  %2470 = vadd.xlane.f32.xlu0 %v2469_v35  ;;  %v1808_v0 = vpop.f32.mrb[184].mxu1 }
 0x336   :  { %4970 = vrcp.f32 %v3126_v33  ;;  %v2631_v41 = vadd.f32 %v6277_v44, %v2366_v38  ;;  %v1809_v42 = vadd.f32 %v6780_v54, %v1808_v0  ;;  %v4685_v43 = vpop.f32.mrb[185].mxu1  ;;  %v2472_v45 = vsel %vm1216_vm3, %v2165_v39, 0.0 }
 0x337   :  { %v4023_v40 = vmul.f32 -1.442695, %v2630_v34  ;;  %3749 = vst.msk [vmem:[%s7311_s7 + $0x178] sm:$0xff] %vm3701_vm4, %v3623_v36  ;;  %4972 = vrcp.f32 %v3127_v37  ;;  %v1811_v29 = vpop.f32.mrb[186].mxu1  ;;  %2473 = vadd.xlane.f32.xlu1 %v2472_v45 }
 0x338   :  { %v4024_v47 = vmul.f32 -1.442695, %v2631_v41  ;;  %v2034_v48 = vmax.f32 %v1809_v42, 0.0  ;;  %v1812_v49 = vadd.f32 %v6780_v54, %v1811_v29  ;;  %v4686_v60 = vpop.f32.mrb[187].mxu1 }
 0x339   :  { %v4963_v46 = vpop.eup %4962  ;;  %4974 = vpow2.f32 %v4023_v40 }
 0x33a   :  { %v4965_v12 = vpop.eup %4964  ;;  %v3499_v50 = vmul.f32 0.995, %v4963_v46  ;;  %4976 = vpow2.f32 %v4024_v47  ;;  %v2035_v53 = vmax.f32 %v1812_v49, 0.0  ;;  %v2166_v56 = vmul.f32 %v6786_v62, %v2034_v48 }
 0x33b   :  { %v4967_v52 = vpop.eup %4966  ;;  %v3500_v51 = vmul.f32 0.995, %v4965_v12  ;;  %v2369_v58 = vpop.xlane.xlu0 %2368 }
 0x33c   :  { %v3624_v9 = vadd.f32 0.005, %v3499_v50  ;;  %v3128_v57 = vadd.f32 1.0, %v4967_v52  ;;  %v2632_v63 = vadd.f32 %v6277_v44, %v2369_v58  ;;  %v2475_v1 = vsel %vm1216_vm3, %v2166_v56, 0.0 }
 0x33d   :  { %v4969_v59 = vpop.eup %4968  ;;  %v3625_v61 = vadd.f32 0.005, %v3500_v51  ;;  %v2167_v2 = vmul.f32 %v6786_v62, %v2035_v53  ;;  %2476 = vadd.xlane.f32.xlu0 %v2475_v1  ;;  %v1816_v4 = vpop.f32.mrb[188].mxu1 }
 0x33e   :  { %3750 = vst.msk [vmem:[%s7311_s7 + $0x180] sm:$0xff] %vm3701_vm4, %v3624_v9  ;;  %4978 = vrcp.f32 %v3128_v57  ;;  %v3129_v15 = vadd.f32 1.0, %v4969_v59  ;;  %v2372_v55 = vpop.xlane.xlu1 %2371  ;;  %v4025_v5 = vmul.f32 -1.442695, %v2632_v63  ;;  %v1817_v7 = vadd.f32 %v6780_v54, %v1816_v4  ;;  %v4689_v8 = vpop.f32.mrb[189].mxu1 }
 0x33f   :  { %3751 = vst.msk [vmem:[%s7311_s7 + $0x188] sm:$0xff] %vm3701_vm4, %v3625_v61  ;;  %v2633_v6 = vadd.f32 %v6277_v44, %v2372_v55  ;;  %v2478_v10 = vsel %vm1216_vm3, %v2167_v2, 0.0  ;;  %v1819_v11 = vpop.f32.mrb[190].mxu1 }
 0x340   :  { %4980 = vrcp.f32 %v3129_v15  ;;  %2479 = vadd.xlane.f32.xlu1 %v2478_v10  ;;  %v4971_v13 = vpop.eup %4970  ;;  %v2036_v16 = vmax.f32 %v1817_v7, 0.0  ;;  %v1820_v17 = vadd.f32 %v6780_v54, %v1819_v11  ;;  %v4690_v18 = vpop.f32.mrb[191].mxu1 }
 0x341   :  { %4982 = vpow2.f32 %v4025_v5  ;;  %v4026_v14 = vmul.f32 -1.442695, %v2633_v6  ;;  %v4973_v19 = vpop.eup %4972  ;;  %v3501_v20 = vmul.f32 0.995, %v4971_v13 }
 0x342   :  { %v3502_v22 = vmul.f32 0.995, %v4973_v19  ;;  %v2037_v23 = vmax.f32 %v1820_v17, 0.0  ;;  %v2168_v24 = vmul.f32 %v6786_v62, %v2036_v16 }
 0x343   :  { %v4975_v21 = vpop.eup %4974  ;;  %4984 = vpow2.f32 %v4026_v14  ;;  %v3626_v25 = vadd.f32 0.005, %v3501_v20 }
 0x344   :  { %v3130_v26 = vadd.f32 1.0, %v4975_v21  ;;  %v2375_v27 = vpop.xlane.xlu0 %2374  ;;  %v4977_v28 = vpop.eup %4976  ;;  %v3627_v30 = vadd.f32 0.005, %v3502_v22  ;;  %v2481_v31 = vsel %vm1216_vm3, %v2168_v24, 0.0  ;;  %v2169_v32 = vmul.f32 %v6786_v62, %v2037_v23 }
 0x345   :  { %v2634_v3 = vadd.f32 %v6277_v44, %v2375_v27  ;;  %3752 = vst.msk [vmem:[%s7311_s7 + $0x190] sm:$0xff] %vm3701_vm4, %v3626_v25  ;;  %v3131_v33 = vadd.f32 1.0, %v4977_v28  ;;  %v2378_v34 = vpop.xlane.xlu1 %2377  ;;  %2482 = vadd.xlane.f32.xlu0 %v2481_v31  ;;  %v1824_v35 = vpop.f32.mrb[192].mxu1 }
 0x346   :  { %4986 = vrcp.f32 %v3130_v26  ;;  %3753 = vst.msk [vmem:[%s7311_s7 + $0x198] sm:$0xff] %vm3701_vm4, %v3627_v30  ;;  %v2635_v37 = vadd.f32 %v6277_v44, %v2378_v34  ;;  %v1825_v38 = vadd.f32 %v6780_v54, %v1824_v35  ;;  %v4693_v0 = vpop.f32.mrb[193].mxu1  ;;  %v2484_v39 = vsel %vm1216_vm3, %v2169_v32, 0.0 }
 0x347   :  { %v4027_v36 = vmul.f32 -1.442695, %v2634_v3  ;;  %4988 = vrcp.f32 %v3131_v33  ;;  %2485 = vadd.xlane.f32.xlu1 %v2484_v39  ;;  %v1827_v41 = vpop.f32.mrb[194].mxu1 }
 0x348   :  { %v4979_v40 = vpop.eup %4978  ;;  %v4028_v43 = vmul.f32 -1.442695, %v2635_v37  ;;  %v2038_v45 = vmax.f32 %v1825_v38, 0.0  ;;  %v4694_v29 = vpop.f32.mrb[195].mxu1  ;;  %v1828_v47 = vadd.f32 %v6780_v54, %v1827_v41 }
 0x349   :  { %v3503_v42 = vmul.f32 0.995, %v4979_v40  ;;  %4990 = vpow2.f32 %v4027_v36 }
 0x34a   :  { %v4981_v46 = vpop.eup %4980  ;;  %4992 = vpow2.f32 %v4028_v43  ;;  %v2170_v12 = vmul.f32 %v6786_v62, %v2038_v45  ;;  %v2039_v52 = vmax.f32 %v1828_v47, 0.0 }
 0x34b   :  { %v4983_v48 = vpop.eup %4982  ;;  %v3628_v49 = vadd.f32 0.005, %v3503_v42  ;;  %v3504_v60 = vmul.f32 0.995, %v4981_v46  ;;  %v2381_v51 = vpop.xlane.xlu0 %2380 }
 0x34c   :  { %v3132_v50 = vadd.f32 1.0, %v4983_v48  ;;  %v2636_v9 = vadd.f32 %v6277_v44, %v2381_v51  ;;  %v2487_v57 = vsel %vm1216_vm3, %v2170_v12, 0.0  ;;  %v2171_v63 = vmul.f32 %v6786_v62, %v2039_v52 }
 0x34d   :  { %v4985_v53 = vpop.eup %4984  ;;  %3754 = vst.msk [vmem:[%s7311_s7 + $0x1a0] sm:$0xff] %vm3701_vm4, %v3628_v49  ;;  %v3629_v56 = vadd.f32 0.005, %v3504_v60  ;;  %2488 = vadd.xlane.f32.xlu0 %v2487_v57  ;;  %v1832_v61 = vpop.f32.mrb[196].mxu1 }
 0x34e   :  { %4994 = vrcp.f32 %v3132_v50  ;;  %v3133_v58 = vadd.f32 1.0, %v4985_v53  ;;  %v2384_v59 = vpop.xlane.xlu1 %2383  ;;  %v4029_v1 = vmul.f32 -1.442695, %v2636_v9  ;;  %v1833_v15 = vadd.f32 %v6780_v54, %v1832_v61  ;;  %v4697_v55 = vpop.f32.mrb[197].mxu1 }
 0x34f   :  { %3755 = vst.msk [vmem:[%s7311_s7 + $0x1a8] sm:$0xff] %vm3701_vm4, %v3629_v56  ;;  %v2637_v2 = vadd.f32 %v6277_v44, %v2384_v59  ;;  %v2490_v5 = vsel %vm1216_vm3, %v2171_v63, 0.0  ;;  %v1835_v6 = vpop.f32.mrb[198].mxu1 }
 0x350   :  { %v4987_v4 = vpop.eup %4986  ;;  %4996 = vrcp.f32 %v3133_v58  ;;  %v2040_v10 = vmax.f32 %v1833_v15, 0.0  ;;  %2491 = vadd.xlane.f32.xlu1 %v2490_v5  ;;  %v4698_v11 = vpop.f32.mrb[199].mxu1  ;;  %v1836_v14 = vadd.f32 %v6780_v54, %v1835_v6 }
 0x351   :  { %v3505_v7 = vmul.f32 0.995, %v4987_v4  ;;  %4998 = vpow2.f32 %v4029_v1  ;;  %v4030_v8 = vmul.f32 -1.442695, %v2637_v2  ;;  %v4989_v13 = vpop.eup %4988 }
 0x352   :  { %v3506_v18 = vmul.f32 0.995, %v4989_v13  ;;  %v2172_v19 = vmul.f32 %v6786_v62, %v2040_v10  ;;  %v2041_v21 = vmax.f32 %v1836_v14, 0.0 }
 0x353   :  { %v4991_v16 = vpop.eup %4990  ;;  %v3630_v17 = vadd.f32 0.005, %v3505_v7  ;;  %5000 = vpow2.f32 %v4030_v8 }
 0x354   :  { %v3134_v20 = vadd.f32 1.0, %v4991_v16  ;;  %v2387_v22 = vpop.xlane.xlu0 %2386  ;;  %v4993_v23 = vpop.eup %4992  ;;  %v3631_v24 = vadd.f32 0.005, %v3506_v18  ;;  %v2493_v26 = vsel %vm1216_vm3, %v2172_v19, 0.0  ;;  %v2173_v28 = vmul.f32 %v6786_v62, %v2041_v21 }
 0x355   :  { %3756 = vst.msk [vmem:[%s7311_s7 + $0x1b0] sm:$0xff] %vm3701_vm4, %v3630_v17  ;;  %v2638_v25 = vadd.f32 %v6277_v44, %v2387_v22  ;;  %v3135_v27 = vadd.f32 1.0, %v4993_v23  ;;  %v2390_v30 = vpop.xlane.xlu1 %2389  ;;  %2494 = vadd.xlane.f32.xlu0 %v2493_v26 }
 0x356   :  { %5002 = vrcp.f32 %v3134_v20  ;;  %v1840_v3 = vpop.f32.mrb[200].mxu1  ;;  %3757 = vst.msk [vmem:[%s7311_s7 + $0x1b8] sm:$0xff] %vm3701_vm4, %v3631_v24  ;;  %v2639_v32 = vadd.f32 %v6277_v44, %v2390_v30  ;;  %v2496_v36 = vsel %vm1216_vm3, %v2173_v28, 0.0 }
 0x357   :  { %v4031_v31 = vmul.f32 -1.442695, %v2638_v25  ;;  %v1841_v33 = vadd.f32 %v6780_v54, %v1840_v3  ;;  %v4701_v34 = vpop.f32.mrb[201].mxu1  ;;  %5004 = vrcp.f32 %v3135_v27  ;;  %2497 = vadd.xlane.f32.xlu1 %v2496_v36 }
 0x358   :  { %v4995_v35 = vpop.eup %4994  ;;  %v1843_v37 = vpop.f32.mrb[202].mxu1  ;;  %v4032_v0 = vmul.f32 -1.442695, %v2639_v32 }
 0x359   :  { %v3507_v38 = vmul.f32 0.995, %v4995_v35  ;;  %5006 = vpow2.f32 %v4031_v31  ;;  %v2042_v39 = vmax.f32 %v1841_v33, 0.0  ;;  %v4702_v40 = vpop.f32.mrb[203].mxu1  ;;  %v1844_v42 = vadd.f32 %v6780_v54, %v1843_v37 }
 0x35a   :  { %v4997_v41 = vpop.eup %4996  ;;  %5008 = vpow2.f32 %v4032_v0 }
 0x35b   :  { %v4999_v43 = vpop.eup %4998  ;;  %v3632_v45 = vadd.f32 0.005, %v3507_v38  ;;  %v3508_v29 = vmul.f32 0.995, %v4997_v41  ;;  %v2174_v46 = vmul.f32 %v6786_v62, %v2042_v39  ;;  %v2043_v48 = vmax.f32 %v1844_v42, 0.0  ;;  %v2393_v49 = vpop.xlane.xlu0 %2392 }
 0x35c   :  { %v3136_v47 = vadd.f32 1.0, %v4999_v43  ;;  %v2640_v50 = vadd.f32 %v6277_v44, %v2393_v49 }
 0x35d   :  { %v5001_v60 = vpop.eup %5000  ;;  %3758 = vst.msk [vmem:[%s7311_s7 + $0x1c0] sm:$0xff] %vm3701_vm4, %v3632_v45  ;;  %v3633_v12 = vadd.f32 0.005, %v3508_v29  ;;  %v2499_v52 = vsel %vm1216_vm3, %v2174_v46, 0.0  ;;  %v2175_v53 = vmul.f32 %v6786_v62, %v2043_v48 }
 0x35e   :  { %5010 = vrcp.f32 %v3136_v47  ;;  %v3137_v51 = vadd.f32 1.0, %v5001_v60  ;;  %v2396_v56 = vpop.xlane.xlu1 %2395  ;;  %2500 = vadd.xlane.f32.xlu0 %v2499_v52  ;;  %v1848_v9 = vpop.f32.mrb[204].mxu1  ;;  %v4033_v57 = vmul.f32 -1.442695, %v2640_v50 }
 0x35f   :  { %3759 = vst.msk [vmem:[%s7311_s7 + $0x1c8] sm:$0xff] %vm3701_vm4, %v3633_v12  ;;  %v2641_v58 = vadd.f32 %v6277_v44, %v2396_v56  ;;  %v1849_v59 = vadd.f32 %v6780_v54, %v1848_v9  ;;  %v4705_v61 = vpop.f32.mrb[205].mxu1  ;;  %v2502_v1 = vsel %vm1216_vm3, %v2175_v53, 0.0 }
 0x360   :  { %v5003_v63 = vpop.eup %5002  ;;  %5012 = vrcp.f32 %v3137_v51  ;;  %v1851_v2 = vpop.f32.mrb[206].mxu1  ;;  %2503 = vadd.xlane.f32.xlu1 %v2502_v1 }
 0x361   :  { %v3509_v15 = vmul.f32 0.995, %v5003_v63  ;;  %5014 = vpow2.f32 %v4033_v57  ;;  %v4034_v55 = vmul.f32 -1.442695, %v2641_v58  ;;  %v2044_v4 = vmax.f32 %v1849_v59, 0.0  ;;  %v4706_v5 = vpop.f32.mrb[207].mxu1  ;;  %v5005_v6 = vpop.eup %5004 }
 0x362   :  { %v1852_v7 = vadd.f32 %v6780_v54, %v1851_v2  ;;  %v3510_v11 = vmul.f32 0.995, %v5005_v6 }
 0x363   :  { %v5007_v8 = vpop.eup %5006  ;;  %v3634_v10 = vadd.f32 0.005, %v3509_v15  ;;  %5016 = vpow2.f32 %v4034_v55  ;;  %v2176_v13 = vmul.f32 %v6786_v62, %v2044_v4 }
 0x364   :  { %v3138_v14 = vadd.f32 1.0, %v5007_v8  ;;  %v2045_v16 = vmax.f32 %v1852_v7, 0.0  ;;  %v2399_v17 = vpop.xlane.xlu0 %2398  ;;  %v5009_v18 = vpop.eup %5008  ;;  %v3635_v19 = vadd.f32 0.005, %v3510_v11 }
 0x365   :  { %3760 = vst.msk [vmem:[%s7311_s7 + $0x1d0] sm:$0xff] %vm3701_vm4, %v3634_v10  ;;  %v2642_v20 = vadd.f32 %v6277_v44, %v2399_v17  ;;  %v2505_v21 = vsel %vm1216_vm3, %v2176_v13, 0.0  ;;  %v3139_v22 = vadd.f32 1.0, %v5009_v18  ;;  %v2402_v24 = vpop.xlane.xlu1 %2401 }
 0x366   :  { %5018 = vrcp.f32 %v3138_v14  ;;  %v2177_v23 = vmul.f32 %v6786_v62, %v2045_v16  ;;  %2506 = vadd.xlane.f32.xlu0 %v2505_v21  ;;  %v1856_v25 = vpop.f32.mrb[208].mxu1  ;;  %3761 = vst.msk [vmem:[%s7311_s7 + $0x1d8] sm:$0xff] %vm3701_vm4, %v3635_v19  ;;  %v2643_v27 = vadd.f32 %v6277_v44, %v2402_v24 }
 0x367   :  { %v4035_v26 = vmul.f32 -1.442695, %v2642_v20  ;;  %v1857_v28 = vadd.f32 %v6780_v54, %v1856_v25  ;;  %v4709_v30 = vpop.f32.mrb[209].mxu1  ;;  %5020 = vrcp.f32 %v3139_v22 }
 0x368   :  { %v5011_v3 = vpop.eup %5010  ;;  %v2508_v31 = vsel %vm1216_vm3, %v2177_v23, 0.0  ;;  %v1859_v32 = vpop.f32.mrb[210].mxu1  ;;  %v4036_v34 = vmul.f32 -1.442695, %v2643_v27 }
 0x369   :  { %v3511_v33 = vmul.f32 0.995, %v5011_v3  ;;  %5022 = vpow2.f32 %v4035_v26  ;;  %v2046_v35 = vmax.f32 %v1857_v28, 0.0  ;;  %2509 = vadd.xlane.f32.xlu1 %v2508_v31  ;;  %v4710_v36 = vpop.f32.mrb[211].mxu1  ;;  %v1860_v38 = vadd.f32 %v6780_v54, %v1859_v32 }
 0x36a   :  { %v5013_v37 = vpop.eup %5012  ;;  %5024 = vpow2.f32 %v4036_v34 }
 0x36b   :  { %v5015_v0 = vpop.eup %5014  ;;  %v3636_v39 = vadd.f32 0.005, %v3511_v33  ;;  %v3512_v40 = vmul.f32 0.995, %v5013_v37  ;;  %v2178_v41 = vmul.f32 %v6786_v62, %v2046_v35  ;;  %v2405_v42 = vpop.xlane.xlu0 %2404  ;;  %v2047_v45 = vmax.f32 %v1860_v38, 0.0 }
 0x36c   :  { %v3140_v43 = vadd.f32 1.0, %v5015_v0  ;;  %v2644_v29 = vadd.f32 %v6277_v44, %v2405_v42 }
 0x36d   :  { %v5017_v46 = vpop.eup %5016  ;;  %3762 = vst.msk [vmem:[%s7311_s7 + $0x1e0] sm:$0xff] %vm3701_vm4, %v3636_v39  ;;  %v3637_v47 = vadd.f32 0.005, %v3512_v40  ;;  %v2511_v48 = vsel %vm1216_vm3, %v2178_v41, 0.0  ;;  %v2179_v60 = vmul.f32 %v6786_v62, %v2047_v45 }
 0x36e   :  { %5026 = vrcp.f32 %v3140_v43  ;;  %v3141_v49 = vadd.f32 1.0, %v5017_v46  ;;  %v4037_v12 = vmul.f32 -1.442695, %v2644_v29  ;;  %v2408_v50 = vpop.xlane.xlu1 %2407  ;;  %2512 = vadd.xlane.f32.xlu0 %v2511_v48  ;;  %v1864_v52 = vpop.f32.mrb[212].mxu1 }
 0x36f   :  { %3763 = vst.msk [vmem:[%s7311_s7 + $0x1e8] sm:$0xff] %vm3701_vm4, %v3637_v47  ;;  %v2645_v51 = vadd.f32 %v6277_v44, %v2408_v50  ;;  %v1865_v53 = vadd.f32 %v6780_v54, %v1864_v52  ;;  %v4713_v56 = vpop.f32.mrb[213].mxu1  ;;  %v2514_v57 = vsel %vm1216_vm3, %v2179_v60, 0.0 }
 0x370   :  { %v5019_v9 = vpop.eup %5018  ;;  %5028 = vrcp.f32 %v3141_v49  ;;  %v1867_v58 = vpop.f32.mrb[214].mxu1  ;;  %2515 = vadd.xlane.f32.xlu1 %v2514_v57 }
 0x371   :  { %v3513_v59 = vmul.f32 0.995, %v5019_v9  ;;  %5030 = vpow2.f32 %v4037_v12  ;;  %v4038_v61 = vmul.f32 -1.442695, %v2645_v51  ;;  %v2048_v63 = vmax.f32 %v1865_v53, 0.0  ;;  %v4714_v1 = vpop.f32.mrb[215].mxu1  ;;  %v5021_v2 = vpop.eup %5020 }
 0x372   :  { %v1868_v15 = vadd.f32 %v6780_v54, %v1867_v58  ;;  %v3514_v5 = vmul.f32 0.995, %v5021_v2  ;;  %v2411_v7 = vpop.xlane.xlu0 %2410 }
 0x373   :  { %v5023_v55 = vpop.eup %5022  ;;  %v3638_v4 = vadd.f32 0.005, %v3513_v59  ;;  %5032 = vpow2.f32 %v4038_v61  ;;  %v2180_v6 = vmul.f32 %v6786_v62, %v2048_v63  ;;  %v2646_v11 = vadd.f32 %v6277_v44, %v2411_v7 }
 0x374   :  { %v3142_v8 = vadd.f32 1.0, %v5023_v55  ;;  %v2049_v10 = vmax.f32 %v1868_v15, 0.0  ;;  %v5025_v13 = vpop.eup %5024  ;;  %v3639_v14 = vadd.f32 0.005, %v3514_v5  ;;  %v2414_v16 = vpop.xlane.xlu1 %2413 }
 0x375   :  { %3764 = vst.msk [vmem:[%s7311_s7 + $0x1f0] sm:$0xff] %vm3701_vm4, %v3638_v4  ;;  %v2517_v17 = vsel %vm1216_vm3, %v2180_v6, 0.0  ;;  %v3143_v18 = vadd.f32 1.0, %v5025_v13  ;;  %v4039_v20 = vmul.f32 -1.442695, %v2646_v11  ;;  %v2647_v22 = vadd.f32 %v6277_v44, %v2414_v16 }
 0x376   :  { %5034 = vrcp.f32 %v3142_v8  ;;  %v2181_v19 = vmul.f32 %v6786_v62, %v2049_v10  ;;  %2518 = vadd.xlane.f32.xlu0 %v2517_v17  ;;  %v1872_v21 = vpop.f32.mrb[216].mxu1  ;;  %3765 = vst.msk [vmem:[%s7311_s7 + $0x1f8] sm:$0xff] %vm3701_vm4, %v3639_v14 }
 0x377   :  { %v1873_v23 = vadd.f32 %v6780_v54, %v1872_v21  ;;  %v4717_v24 = vpop.f32.mrb[217].mxu1  ;;  %5036 = vrcp.f32 %v3143_v18  ;;  %v4040_v30 = vmul.f32 -1.442695, %v2647_v22 }
 0x378   :  { %v5027_v25 = vpop.eup %5026  ;;  %v2520_v26 = vsel %vm1216_vm3, %v2181_v19, 0.0  ;;  %v1875_v27 = vpop.f32.mrb[218].mxu1  ;;  %5038 = vpow2.f32 %v4039_v20 }
 0x379   :  { %v3515_v28 = vmul.f32 0.995, %v5027_v25  ;;  %v2050_v3 = vmax.f32 %v1873_v23, 0.0  ;;  %2521 = vadd.xlane.f32.xlu1 %v2520_v26  ;;  %v4718_v31 = vpop.f32.mrb[219].mxu1  ;;  %v1876_v33 = vadd.f32 %v6780_v54, %v1875_v27  ;;  %5040 = vpow2.f32 %v4040_v30 }
 0x37a   :  { %v5029_v32 = vpop.eup %5028  ;;  %v2417_v38 = vpop.xlane.xlu0 %2416 }
 0x37b   :  { %v5031_v34 = vpop.eup %5030  ;;  %v3640_v35 = vadd.f32 0.005, %v3515_v28  ;;  %v3516_v36 = vmul.f32 0.995, %v5029_v32  ;;  %v2182_v37 = vmul.f32 %v6786_v62, %v2050_v3  ;;  %v2051_v39 = vmax.f32 %v1876_v33, 0.0 }
 0x37c   :  { %v3144_v0 = vadd.f32 1.0, %v5031_v34  ;;  %v2648_v40 = vadd.f32 %v6277_v44, %v2417_v38  ;;  %v2420_v43 = vpop.xlane.xlu1 %2419 }
 0x37d   :  { %v5033_v41 = vpop.eup %5032  ;;  %3766 = vst.msk [vmem:[%s7311_s7 + $0x200] sm:$0xff] %vm3701_vm4, %v3640_v35  ;;  %v3641_v42 = vadd.f32 0.005, %v3516_v36  ;;  %v2523_v45 = vsel %vm1216_vm3, %v2182_v37, 0.0  ;;  %v2183_v46 = vmul.f32 %v6786_v62, %v2051_v39  ;;  %v2649_v49 = vadd.f32 %v6277_v44, %v2420_v43 }
 0x37e   :  { %5042 = vrcp.f32 %v3144_v0  ;;  %v3145_v29 = vadd.f32 1.0, %v5033_v41  ;;  %v4041_v47 = vmul.f32 -1.442695, %v2648_v40  ;;  %2524 = vadd.xlane.f32.xlu0 %v2523_v45  ;;  %v1880_v48 = vpop.f32.mrb[220].mxu1 }
 0x37f   :  { %3767 = vst.msk [vmem:[%s7311_s7 + $0x208] sm:$0xff] %vm3701_vm4, %v3641_v42  ;;  %v1881_v60 = vadd.f32 %v6780_v54, %v1880_v48  ;;  %v4721_v12 = vpop.f32.mrb[221].mxu1  ;;  %v2526_v52 = vsel %vm1216_vm3, %v2183_v46, 0.0  ;;  %v4042_v56 = vmul.f32 -1.442695, %v2649_v49 }
 0x380   :  { %v5035_v50 = vpop.eup %5034  ;;  %5044 = vrcp.f32 %v3145_v29  ;;  %v1883_v51 = vpop.f32.mrb[222].mxu1  ;;  %2527 = vadd.xlane.f32.xlu1 %v2526_v52 }
 0x381   :  { %v3517_v53 = vmul.f32 0.995, %v5035_v50  ;;  %5046 = vpow2.f32 %v4041_v47  ;;  %v2052_v9 = vmax.f32 %v1881_v60, 0.0  ;;  %v4722_v57 = vpop.f32.mrb[223].mxu1  ;;  %v5037_v58 = vpop.eup %5036  ;;  %v1884_v59 = vadd.f32 %v6780_v54, %v1883_v51 }
 0x382   :  { %v5039_v61 = vpop.eup %5038  ;;  %v3518_v1 = vmul.f32 0.995, %v5037_v58  ;;  %5048 = vpow2.f32 %v4042_v56  ;;  %v2423_v15 = vpop.xlane.xlu0 %2422 }
 0x383   :  { %v3642_v63 = vadd.f32 0.005, %v3517_v53  ;;  %v2184_v2 = vmul.f32 %v6786_v62, %v2052_v9  ;;  %v3146_v55 = vadd.f32 1.0, %v5039_v61  ;;  %v2053_v4 = vmax.f32 %v1884_v59, 0.0  ;;  %v5041_v6 = vpop.eup %5040 }
 0x384   :  { %v2650_v5 = vadd.f32 %v6277_v44, %v2423_v15  ;;  %v3643_v7 = vadd.f32 0.005, %v3518_v1  ;;  %v2426_v8 = vpop.xlane.xlu1 %2425  ;;  %v3147_v11 = vadd.f32 1.0, %v5041_v6 }
 0x385   :  { %3768 = vst.msk [vmem:[%s7311_s7 + $0x210] sm:$0xff] %vm3701_vm4, %v3642_v63  ;;  %v2529_v10 = vsel %vm1216_vm3, %v2184_v2, 0.0  ;;  %5050 = vrcp.f32 %v3146_v55  ;;  %v2185_v13 = vmul.f32 %v6786_v62, %v2053_v4  ;;  %v2651_v17 = vadd.f32 %v6277_v44, %v2426_v8 }
 0x386   :  { %v4043_v14 = vmul.f32 -1.442695, %v2650_v5  ;;  %2530 = vadd.xlane.f32.xlu0 %v2529_v10  ;;  %v1888_v16 = vpop.f32.mrb[224].mxu1  ;;  %3769 = vst.msk [vmem:[%s7311_s7 + $0x218] sm:$0xff] %vm3701_vm4, %v3643_v7  ;;  %5052 = vrcp.f32 %v3147_v11 }
 0x387   :  { %v1889_v18 = vadd.f32 %v6780_v54, %v1888_v16  ;;  %v4725_v19 = vpop.f32.mrb[225].mxu1  ;;  %v2532_v21 = vsel %vm1216_vm3, %v2185_v13, 0.0  ;;  %v4044_v24 = vmul.f32 -1.442695, %v2651_v17 }
 0x388   :  { %v5043_v20 = vpop.eup %5042  ;;  %v1891_v22 = vpop.f32.mrb[226].mxu1  ;;  %5054 = vpow2.f32 %v4043_v14  ;;  %2533 = vadd.xlane.f32.xlu1 %v2532_v21 }
 0x389   :  { %v3519_v23 = vmul.f32 0.995, %v5043_v20  ;;  %v2054_v25 = vmax.f32 %v1889_v18, 0.0  ;;  %v4726_v26 = vpop.f32.mrb[227].mxu1  ;;  %v1892_v28 = vadd.f32 %v6780_v54, %v1891_v22  ;;  %5056 = vpow2.f32 %v4044_v24 }
 0x38a   :  { %v5045_v27 = vpop.eup %5044  ;;  %v2429_v33 = vpop.xlane.xlu0 %2428 }
 0x38b   :  { %v5047_v30 = vpop.eup %5046  ;;  %v3644_v3 = vadd.f32 0.005, %v3519_v23  ;;  %v3520_v31 = vmul.f32 0.995, %v5045_v27  ;;  %v2186_v32 = vmul.f32 %v6786_v62, %v2054_v25  ;;  %v2055_v35 = vmax.f32 %v1892_v28, 0.0 }
 0x38c   :  { %v3148_v34 = vadd.f32 1.0, %v5047_v30  ;;  %v2652_v36 = vadd.f32 %v6277_v44, %v2429_v33  ;;  %v5049_v37 = vpop.eup %5048  ;;  %v2432_v0 = vpop.xlane.xlu1 %2431 }
 0x38d   :  { %3770 = vst.msk [vmem:[%s7311_s7 + $0x220] sm:$0xff] %vm3701_vm4, %v3644_v3  ;;  %v3645_v38 = vadd.f32 0.005, %v3520_v31  ;;  %v2535_v39 = vsel %vm1216_vm3, %v2186_v32, 0.0  ;;  %v3149_v40 = vadd.f32 1.0, %v5049_v37  ;;  %v2187_v41 = vmul.f32 %v6786_v62, %v2055_v35 }
 0x38e   :  { %5058 = vrcp.f32 %v3148_v34  ;;  %v4045_v42 = vmul.f32 -1.442695, %v2652_v36  ;;  %2536 = vadd.xlane.f32.xlu0 %v2535_v39  ;;  %v1896_v43 = vpop.f32.mrb[228].mxu1  ;;  %v2653_v45 = vadd.f32 %v6277_v44, %v2432_v0  ;;  %v7033_v39 = vld [vmem:[%s7308_s4] ss:$0 sm:$0xff] }
 0x38f   :  { %3771 = vst.msk [vmem:[%s7311_s7 + $0x228] sm:$0xff] %vm3701_vm4, %v3645_v38  ;;  %v1897_v29 = vadd.f32 %v6780_v54, %v1896_v43  ;;  %v4729_v46 = vpop.f32.mrb[229].mxu1  ;;  %v5051_v47 = vpop.eup %5050  ;;  %5060 = vrcp.f32 %v3149_v40  ;;  %v2538_v48 = vsel %vm1216_vm3, %v2187_v41, 0.0 }
 0x390   :  { %v1899_v49 = vpop.f32.mrb[230].mxu1  ;;  %v3521_v60 = vmul.f32 0.995, %v5051_v47  ;;  %5062 = vpow2.f32 %v4045_v42  ;;  %v4046_v12 = vmul.f32 -1.442695, %v2653_v45  ;;  %2539 = vadd.xlane.f32.xlu1 %v2538_v48  ;;  %v5053_v51 = vpop.eup %5052 }
 0x391   :  { %v2056_v50 = vmax.f32 %v1897_v29, 0.0  ;;  %v4730_v52 = vpop.f32.mrb[231].mxu1  ;;  %v1900_v53 = vadd.f32 %v6780_v54, %v1899_v49  ;;  %v3522_v57 = vmul.f32 0.995, %v5053_v51 }
 0x392   :  { %v5055_v56 = vpop.eup %5054  ;;  %v3646_v9 = vadd.f32 0.005, %v3521_v60  ;;  %5064 = vpow2.f32 %v4046_v12  ;;  %v2435_v59 = vpop.xlane.xlu0 %2434 }
 0x393   :  { %v2188_v58 = vmul.f32 %v6786_v62, %v2056_v50  ;;  %v3150_v61 = vadd.f32 1.0, %v5055_v56  ;;  %v2057_v63 = vmax.f32 %v1900_v53, 0.0  ;;  %v2654_v1 = vadd.f32 %v6277_v44, %v2435_v59  ;;  %v5057_v2 = vpop.eup %5056 }
 0x394   :  { %3772 = vst.msk [vmem:[%s7311_s7 + $0x230] sm:$0xff] %vm3701_vm4, %v3646_v9  ;;  %v3647_v15 = vadd.f32 0.005, %v3522_v57  ;;  %v2438_v55 = vpop.xlane.xlu1 %2437  ;;  %v3151_v5 = vadd.f32 1.0, %v5057_v2 }
 0x395   :  { %v2541_v4 = vsel %vm1216_vm3, %v2188_v58, 0.0  ;;  %5066 = vrcp.f32 %v3150_v61  ;;  %v2189_v6 = vmul.f32 %v6786_v62, %v2057_v63  ;;  %v4047_v7 = vmul.f32 -1.442695, %v2654_v1 }
 0x396   :  { %2542 = vadd.xlane.f32.xlu0 %v2541_v4  ;;  %v1904_v8 = vpop.f32.mrb[232].mxu1  ;;  %3773 = vst.msk [vmem:[%s7311_s7 + $0x238] sm:$0xff] %vm3701_vm4, %v3647_v15  ;;  %v2655_v10 = vadd.f32 %v6277_v44, %v2438_v55  ;;  %5068 = vrcp.f32 %v3151_v5 }
 0x397   :  { %v1905_v11 = vadd.f32 %v6780_v54, %v1904_v8  ;;  %v4733_v13 = vpop.f32.mrb[233].mxu1  ;;  %v2544_v16 = vsel %vm1216_vm3, %v2189_v6, 0.0  ;;  %5070 = vpow2.f32 %v4047_v7 }
 0x398   :  { %v5059_v14 = vpop.eup %5058  ;;  %v1907_v17 = vpop.f32.mrb[234].mxu1  ;;  %v4048_v19 = vmul.f32 -1.442695, %v2655_v10  ;;  %2545 = vadd.xlane.f32.xlu1 %v2544_v16 }
 0x399   :  { %v3523_v18 = vmul.f32 0.995, %v5059_v14  ;;  %v2058_v20 = vmax.f32 %v1905_v11, 0.0  ;;  %v4734_v21 = vpop.f32.mrb[235].mxu1  ;;  %v5061_v22 = vpop.eup %5060  ;;  %v1908_v23 = vadd.f32 %v6780_v54, %v1907_v17 }
 0x39a   :  { %v5063_v24 = vpop.eup %5062  ;;  %v3524_v26 = vmul.f32 0.995, %v5061_v22  ;;  %5072 = vpow2.f32 %v4048_v19  ;;  %v2441_v28 = vpop.xlane.xlu0 %2440 }
 0x39b   :  { %v3648_v25 = vadd.f32 0.005, %v3523_v18  ;;  %v2190_v27 = vmul.f32 %v6786_v62, %v2058_v20  ;;  %v3152_v30 = vadd.f32 1.0, %v5063_v24  ;;  %v2059_v3 = vmax.f32 %v1908_v23, 0.0  ;;  %v7022_v62 = vld [vmem:[%s7309_s5] ss:$0 sm:$0xff] }
 0x39c   :  { %v2656_v31 = vadd.f32 %v6277_v44, %v2441_v28  ;;  %v5065_v32 = vpop.eup %5064  ;;  %v3649_v33 = vadd.f32 0.005, %v3524_v26  ;;  %v2444_v34 = vpop.xlane.xlu1 %2443 }
 0x39d   :  { %3774 = vst.msk [vmem:[%s7311_s7 + $0x240] sm:$0xff] %vm3701_vm4, %v3648_v25  ;;  %v2547_v54 = vsel %vm1216_vm3, %v2190_v27, 0.0  ;;  %5074 = vrcp.f32 %v3152_v30  ;;  %v3153_v35 = vadd.f32 1.0, %v5065_v32  ;;  %v2191_v36 = vmul.f32 %v7022_v62, %v2059_v3 }
 0x39e   :  { %v4049_v37 = vmul.f32 -1.442695, %v2656_v31  ;;  %2548 = vadd.xlane.f32.xlu0 %v2547_v54  ;;  %v1912_v38 = vpop.f32.mrb[236].mxu1  ;;  %3775 = vst.msk [vmem:[%s7311_s7 + $0x248] sm:$0xff] %vm3701_vm4, %v3649_v33  ;;  %v2657_v0 = vadd.f32 %v6277_v44, %v2444_v34 }
 0x39f   :  { %v1913_v40 = vadd.f32 %v7033_v39, %v1912_v38  ;;  %v4737_v41 = vpop.f32.mrb[237].mxu1  ;;  %v5067_v42 = vpop.eup %5066  ;;  %5076 = vrcp.f32 %v3153_v35  ;;  %v2550_v43 = vsel %vm1216_vm3, %v2191_v36, 0.0 }
 0x3a0   :  { %v1915_v45 = vpop.f32.mrb[238].mxu1  ;;  %v3525_v29 = vmul.f32 0.995, %v5067_v42  ;;  %5078 = vpow2.f32 %v4049_v37  ;;  %v4050_v46 = vmul.f32 -1.442695, %v2657_v0  ;;  %2551 = vadd.xlane.f32.xlu1 %v2550_v43  ;;  %v5069_v49 = vpop.eup %5068 }
 0x3a1   :  { %v2060_v47 = vmax.f32 %v1913_v40, 0.0  ;;  %v4738_v48 = vpop.f32.mrb[239].mxu1  ;;  %v1916_v60 = vadd.f32 %v7033_v39, %v1915_v45  ;;  %v5071_v12 = vpop.eup %5070  ;;  %v3526_v52 = vmul.f32 0.995, %v5069_v49 }
 0x3a2   :  { %v3650_v50 = vadd.f32 0.005, %v3525_v29  ;;  %5080 = vpow2.f32 %v4050_v46  ;;  %v2447_v53 = vpop.xlane.xlu0 %2446  ;;  %v3154_v56 = vadd.f32 1.0, %v5071_v12 }
 0x3a3   :  { %v2192_v51 = vmul.f32 %v7022_v62, %v2060_v47  ;;  %v2061_v9 = vmax.f32 %v1916_v60, 0.0  ;;  %v2658_v57 = vadd.f32 %v6277_v44, %v2447_v53  ;;  %v3651_v59 = vadd.f32 0.005, %v3526_v52 }
 0x3a4   :  { %v5073_v58 = vpop.eup %5072  ;;  %3776 = vst.msk [vmem:[%s7311_s7 + $0x250] sm:$0xff] %vm3701_vm4, %v3650_v50  ;;  %5082 = vrcp.f32 %v3154_v56 }
 0x3a5   :  { %v2450_v61 = vpop.xlane.xlu1 %2449  ;;  %v2553_v63 = vsel %vm1216_vm3, %v2192_v51, 0.0  ;;  %v3155_v1 = vadd.f32 1.0, %v5073_v58  ;;  %v2193_v2 = vmul.f32 %v7022_v62, %v2061_v9  ;;  %v4051_v15 = vmul.f32 -1.442695, %v2658_v57  ;;  %3777 = vst.msk [vmem:[%s7311_s7 + $0x258] sm:$0xff] %vm3701_vm4, %v3651_v59 }
 0x3a6   :  { %2554 = vadd.xlane.f32.xlu0 %v2553_v63  ;;  %v1920_v55 = vpop.f32.mrb[240].mxu1  ;;  %v2659_v4 = vadd.f32 %v6277_v44, %v2450_v61 }
 0x3a7   :  { %v1921_v5 = vadd.f32 %v7033_v39, %v1920_v55  ;;  %v4741_v6 = vpop.f32.mrb[241].mxu1  ;;  %v5075_v7 = vpop.eup %5074  ;;  %5084 = vrcp.f32 %v3155_v1  ;;  %v2556_v8 = vsel %vm1216_vm3, %v2193_v2, 0.0 }
 0x3a8   :  { %v1923_v10 = vpop.f32.mrb[242].mxu1  ;;  %v3527_v11 = vmul.f32 0.995, %v5075_v7  ;;  %5086 = vpow2.f32 %v4051_v15  ;;  %v4052_v13 = vmul.f32 -1.442695, %v2659_v4  ;;  %2557 = vadd.xlane.f32.xlu1 %v2556_v8 }
 0x3a9   :  { %v2062_v14 = vmax.f32 %v1921_v5, 0.0  ;;  %v4742_v16 = vpop.f32.mrb[243].mxu1  ;;  %v5077_v17 = vpop.eup %5076  ;;  %v1924_v18 = vadd.f32 %v7033_v39, %v1923_v10 }
 0x3aa   :  { %v5079_v19 = vpop.eup %5078  ;;  %v3652_v20 = vadd.f32 0.005, %v3527_v11  ;;  %v3528_v21 = vmul.f32 0.995, %v5077_v17  ;;  %5088 = vpow2.f32 %v4052_v13  ;;  %v2453_v23 = vpop.xlane.xlu0 %2452 }
 0x3ab   :  { %v2194_v22 = vmul.f32 %v7022_v62, %v2062_v14  ;;  %v3156_v24 = vadd.f32 1.0, %v5079_v19  ;;  %v2063_v25 = vmax.f32 %v1924_v18, 0.0  ;;  %v2660_v26 = vadd.f32 %v6277_v44, %v2453_v23 }
 0x3ac   :  { %v5081_v27 = vpop.eup %5080  ;;  %3778 = vst.msk [vmem:[%s7311_s7 + $0x260] sm:$0xff] %vm3701_vm4, %v3652_v20  ;;  %v3653_v28 = vadd.f32 0.005, %v3528_v21 }
 0x3ad   :  { %v2559_v30 = vsel %vm1216_vm3, %v2194_v22, 0.0  ;;  %5090 = vrcp.f32 %v3156_v24  ;;  %v3157_v3 = vadd.f32 1.0, %v5081_v27  ;;  %v2195_v31 = vmul.f32 %v7022_v62, %v2063_v25  ;;  %v2456_v33 = vpop.xlane.xlu1 %2455 }
 0x3ae   :  { %v4053_v32 = vmul.f32 -1.442695, %v2660_v26  ;;  %2560 = vadd.xlane.f32.xlu0 %v2559_v30  ;;  %v1928_v34 = vpop.f32.mrb[244].mxu1  ;;  %3779 = vst.msk [vmem:[%s7311_s7 + $0x268] sm:$0xff] %vm3701_vm4, %v3653_v28  ;;  %v2661_v54 = vadd.f32 %v6277_v44, %v2456_v33  ;;  %v5083_v37 = vpop.eup %5082 }
 0x3af   :  { %v1929_v35 = vadd.f32 %v7033_v39, %v1928_v34  ;;  %v4745_v36 = vpop.f32.mrb[245].mxu1  ;;  %5092 = vrcp.f32 %v3157_v3  ;;  %v2562_v38 = vsel %vm1216_vm3, %v2195_v31, 0.0  ;;  %v3529_v40 = vmul.f32 0.995, %v5083_v37 }
 0x3b0   :  { %v1931_v0 = vpop.f32.mrb[246].mxu1  ;;  %5094 = vpow2.f32 %v4053_v32  ;;  %v4054_v41 = vmul.f32 -1.442695, %v2661_v54  ;;  %2563 = vadd.xlane.f32.xlu1 %v2562_v38 }
 0x3b1   :  { %v2064_v42 = vmax.f32 %v1929_v35, 0.0  ;;  %v4746_v43 = vpop.f32.mrb[247].mxu1  ;;  %v5085_v45 = vpop.eup %5084  ;;  %v1932_v29 = vadd.f32 %v7033_v39, %v1931_v0  ;;  %v3654_v47 = vadd.f32 0.005, %v3529_v40 }
 0x3b2   :  { %v5087_v46 = vpop.eup %5086  ;;  %v3530_v48 = vmul.f32 0.995, %v5085_v45  ;;  %5096 = vpow2.f32 %v4054_v41  ;;  %v2459_v60 = vpop.xlane.xlu0 %2458 }
 0x3b3   :  { %v2196_v49 = vmul.f32 %v7022_v62, %v2064_v42  ;;  %v3158_v12 = vadd.f32 1.0, %v5087_v46  ;;  %v2065_v50 = vmax.f32 %v1932_v29, 0.0  ;;  %v2662_v52 = vadd.f32 %v6277_v44, %v2459_v60  ;;  %3780 = vst.msk [vmem:[%s7311_s7 + $0x270] sm:$0xff] %vm3701_vm4, %v3654_v47 }
 0x3b4   :  { %v5089_v51 = vpop.eup %5088  ;;  %v3655_v53 = vadd.f32 0.005, %v3530_v48 }
 0x3b5   :  { %v2565_v56 = vsel %vm1216_vm3, %v2196_v49, 0.0  ;;  %5098 = vrcp.f32 %v3158_v12  ;;  %v3159_v9 = vadd.f32 1.0, %v5089_v51  ;;  %v2197_v57 = vmul.f32 %v7022_v62, %v2065_v50  ;;  %v2462_v59 = vpop.xlane.xlu1 %2461 }
 0x3b6   :  { %v4055_v58 = vmul.f32 -1.442695, %v2662_v52  ;;  %2566 = vadd.xlane.f32.xlu0 %v2565_v56  ;;  %v1936_v61 = vpop.f32.mrb[248].mxu1  ;;  %3781 = vst.msk [vmem:[%s7311_s7 + $0x278] sm:$0xff] %vm3701_vm4, %v3655_v53  ;;  %v2663_v63 = vadd.f32 %v6277_v44, %v2462_v59 }
 0x3b7   :  { %v1937_v1 = vadd.f32 %v7033_v39, %v1936_v61  ;;  %v4749_v2 = vpop.f32.mrb[249].mxu1  ;;  %v5091_v15 = vpop.eup %5090  ;;  %5100 = vrcp.f32 %v3159_v9  ;;  %v2568_v55 = vsel %vm1216_vm3, %v2197_v57, 0.0 }
 0x3b8   :  { %v1939_v4 = vpop.f32.mrb[250].mxu1  ;;  %v3531_v5 = vmul.f32 0.995, %v5091_v15  ;;  %5102 = vpow2.f32 %v4055_v58  ;;  %v4056_v6 = vmul.f32 -1.442695, %v2663_v63  ;;  %2569 = vadd.xlane.f32.xlu1 %v2568_v55 }
 0x3b9   :  { %v2066_v7 = vmax.f32 %v1937_v1, 0.0  ;;  %v4750_v8 = vpop.f32.mrb[251].mxu1  ;;  %v5093_v10 = vpop.eup %5092 }
 0x3ba   :  { %v5095_v11 = vpop.eup %5094  ;;  %v3656_v13 = vadd.f32 0.005, %v3531_v5  ;;  %v3532_v14 = vmul.f32 0.995, %v5093_v10  ;;  %5104 = vpow2.f32 %v4056_v6  ;;  %v2465_v39 = vpop.xlane.xlu0 %2464 }
 0x3bb   :  { %v2198_v16 = vmul.f32 %v7022_v62, %v2066_v7  ;;  %v3160_v17 = vadd.f32 1.0, %v5095_v11  ;;  %v2664_v18 = vadd.f32 %v6277_v44, %v2465_v39 }
 0x3bc   :  { %v5097_v19 = vpop.eup %5096  ;;  %3782 = vst.msk [vmem:[%s7311_s7 + $0x280] sm:$0xff] %vm3701_vm4, %v3656_v13  ;;  %v3657_v20 = vadd.f32 0.005, %v3532_v14 }
 0x3bd   :  { %v2571_v21 = vsel %vm1216_vm3, %v2198_v16, 0.0  ;;  %5106 = vrcp.f32 %v3160_v17  ;;  %v3161_v22 = vadd.f32 1.0, %v5097_v19  ;;  %v4057_v23 = vmul.f32 -1.442695, %v2664_v18  ;;  %v2468_v24 = vpop.xlane.xlu1 %2467 }
 0x3be   :  { %2572 = vadd.xlane.f32.xlu0 %v2571_v21  ;;  %3783 = vst.msk [vmem:[%s7311_s7 + $0x288] sm:$0xff] %vm3701_vm4, %v3657_v20  ;;  %v2665_v62 = vadd.f32 %v6277_v44, %v2468_v24 }
 0x3bf   :  { %v5099_v25 = vpop.eup %5098  ;;  %5108 = vrcp.f32 %v3161_v22 }
 0x3c0   :  { %v3533_v26 = vmul.f32 0.995, %v5099_v25  ;;  %5110 = vpow2.f32 %v4057_v23  ;;  %v4058_v27 = vmul.f32 -1.442695, %v2665_v62 }
 0x3c1   :  { %v5101_v28 = vpop.eup %5100 }
 0x3c2   :  { %v5103_v30 = vpop.eup %5102  ;;  %v3658_v3 = vadd.f32 0.005, %v3533_v26  ;;  %v3534_v31 = vmul.f32 0.995, %v5101_v28  ;;  %5112 = vpow2.f32 %v4058_v27  ;;  %v2471_v32 = vpop.xlane.xlu0 %2470 }
 0x3c3   :  { %v3162_v33 = vadd.f32 1.0, %v5103_v30  ;;  %v2666_v34 = vadd.f32 %v6277_v44, %v2471_v32 }
 0x3c4   :  { %v5105_v54 = vpop.eup %5104  ;;  %3784 = vst.msk [vmem:[%s7311_s7 + $0x290] sm:$0xff] %vm3701_vm4, %v3658_v3  ;;  %v3659_v35 = vadd.f32 0.005, %v3534_v31  ;;  %v2474_v38 = vpop.xlane.xlu1 %2473 }
 0x3c5   :  { %5114 = vrcp.f32 %v3162_v33  ;;  %v3163_v36 = vadd.f32 1.0, %v5105_v54  ;;  %v4059_v37 = vmul.f32 -1.442695, %v2666_v34  ;;  %v2667_v0 = vadd.f32 %v6277_v44, %v2474_v38 }
 0x3c6   :  { %3785 = vst.msk [vmem:[%s7311_s7 + $0x298] sm:$0xff] %vm3701_vm4, %v3659_v35 }
 0x3c7   :  { %v5107_v40 = vpop.eup %5106  ;;  %5116 = vrcp.f32 %v3163_v36  ;;  %v4060_v42 = vmul.f32 -1.442695, %v2667_v0 }
 0x3c8   :  { %v3535_v41 = vmul.f32 0.995, %v5107_v40  ;;  %5118 = vpow2.f32 %v4059_v37 }
 0x3c9   :  { %v5109_v43 = vpop.eup %5108  ;;  %5120 = vpow2.f32 %v4060_v42 }
 0x3ca   :  { %v5111_v45 = vpop.eup %5110  ;;  %v3660_v29 = vadd.f32 0.005, %v3535_v41  ;;  %v3536_v46 = vmul.f32 0.995, %v5109_v43  ;;  %v2477_v47 = vpop.xlane.xlu0 %2476 }
 0x3cb   :  { %v3164_v48 = vadd.f32 1.0, %v5111_v45  ;;  %v2668_v49 = vadd.f32 %v6277_v44, %v2477_v47 }
 0x3cc   :  { %v5113_v60 = vpop.eup %5112  ;;  %3786 = vst.msk [vmem:[%s7311_s7 + $0x2a0] sm:$0xff] %vm3701_vm4, %v3660_v29  ;;  %v3661_v12 = vadd.f32 0.005, %v3536_v46 }
 0x3cd   :  { %v2480_v50 = vpop.xlane.xlu1 %2479  ;;  %5122 = vrcp.f32 %v3164_v48  ;;  %v3165_v52 = vadd.f32 1.0, %v5113_v60  ;;  %v4061_v51 = vmul.f32 -1.442695, %v2668_v49 }
 0x3ce   :  { %v2669_v53 = vadd.f32 %v6277_v44, %v2480_v50  ;;  %3787 = vst.msk [vmem:[%s7311_s7 + $0x2a8] sm:$0xff] %vm3701_vm4, %v3661_v12 }
 0x3cf   :  { %v5115_v56 = vpop.eup %5114  ;;  %5124 = vrcp.f32 %v3165_v52 }
 0x3d0   :  { %v4062_v9 = vmul.f32 -1.442695, %v2669_v53  ;;  %v3537_v57 = vmul.f32 0.995, %v5115_v56  ;;  %5126 = vpow2.f32 %v4061_v51 }
 0x3d1   :  { %v5117_v58 = vpop.eup %5116 }
 0x3d2   :  { %5128 = vpow2.f32 %v4062_v9  ;;  %v5119_v59 = vpop.eup %5118  ;;  %v3662_v61 = vadd.f32 0.005, %v3537_v57  ;;  %v3538_v63 = vmul.f32 0.995, %v5117_v58  ;;  %v2483_v1 = vpop.xlane.xlu0 %2482 }
 0x3d3   :  { %v3166_v2 = vadd.f32 1.0, %v5119_v59  ;;  %v2670_v15 = vadd.f32 %v6277_v44, %v2483_v1  ;;  %v5121_v55 = vpop.eup %5120 }
 0x3d4   :  { %3788 = vst.msk [vmem:[%s7311_s7 + $0x2b0] sm:$0xff] %vm3701_vm4, %v3662_v61  ;;  %v3663_v4 = vadd.f32 0.005, %v3538_v63  ;;  %v2486_v5 = vpop.xlane.xlu1 %2485  ;;  %v3167_v6 = vadd.f32 1.0, %v5121_v55 }
 0x3d5   :  { %5130 = vrcp.f32 %v3166_v2  ;;  %v4063_v7 = vmul.f32 -1.442695, %v2670_v15  ;;  %v2671_v8 = vadd.f32 %v6277_v44, %v2486_v5 }
 0x3d6   :  { %3789 = vst.msk [vmem:[%s7311_s7 + $0x2b8] sm:$0xff] %vm3701_vm4, %v3663_v4  ;;  %5132 = vrcp.f32 %v3167_v6 }
 0x3d7   :  { %v5123_v10 = vpop.eup %5122  ;;  %v4064_v11 = vmul.f32 -1.442695, %v2671_v8  ;;  %5134 = vpow2.f32 %v4063_v7 }
 0x3d8   :  { %v3539_v13 = vmul.f32 0.995, %v5123_v10 }
 0x3d9   :  { %v5125_v14 = vpop.eup %5124  ;;  %5136 = vpow2.f32 %v4064_v11 }
 0x3da   :  { %v5127_v16 = vpop.eup %5126  ;;  %v3664_v39 = vadd.f32 0.005, %v3539_v13  ;;  %v3540_v17 = vmul.f32 0.995, %v5125_v14  ;;  %v2489_v18 = vpop.xlane.xlu0 %2488 }
 0x3db   :  { %v3168_v20 = vadd.f32 1.0, %v5127_v16  ;;  %v2672_v21 = vadd.f32 %v6277_v44, %v2489_v18 }
 0x3dc   :  { %v5129_v19 = vpop.eup %5128  ;;  %3790 = vst.msk [vmem:[%s7311_s7 + $0x2c0] sm:$0xff] %vm3701_vm4, %v3664_v39  ;;  %v3665_v22 = vadd.f32 0.005, %v3540_v17 }
 0x3dd   :  { %v3169_v23 = vadd.f32 1.0, %v5129_v19  ;;  %5138 = vrcp.f32 %v3168_v20  ;;  %v4065_v24 = vmul.f32 -1.442695, %v2672_v21  ;;  %v2492_v62 = vpop.xlane.xlu1 %2491 }
 0x3de   :  { %3791 = vst.msk [vmem:[%s7311_s7 + $0x2c8] sm:$0xff] %vm3701_vm4, %v3665_v22  ;;  %v2673_v25 = vadd.f32 %v6277_v44, %v2492_v62 }
 0x3df   :  { %5140 = vrcp.f32 %v3169_v23  ;;  %v5131_v26 = vpop.eup %5130 }
 0x3e0   :  { %5142 = vpow2.f32 %v4065_v24  ;;  %v3541_v27 = vmul.f32 0.995, %v5131_v26  ;;  %v4066_v28 = vmul.f32 -1.442695, %v2673_v25  ;;  %v5133_v30 = vpop.eup %5132 }
 0x3e1   :  { %v5135_v3 = vpop.eup %5134  ;;  %v3542_v32 = vmul.f32 0.995, %v5133_v30 }
 0x3e2   :  { %v3666_v31 = vadd.f32 0.005, %v3541_v27  ;;  %5144 = vpow2.f32 %v4066_v28  ;;  %v2495_v33 = vpop.xlane.xlu0 %2494  ;;  %v3170_v54 = vadd.f32 1.0, %v5135_v3 }
 0x3e3   :  { %v5137_v34 = vpop.eup %5136  ;;  %v2674_v35 = vadd.f32 %v6277_v44, %v2495_v33  ;;  %v3667_v36 = vadd.f32 0.005, %v3542_v32 }
 0x3e4   :  { %3792 = vst.msk [vmem:[%s7311_s7 + $0x2d0] sm:$0xff] %vm3701_vm4, %v3666_v31  ;;  %v3171_v37 = vadd.f32 1.0, %v5137_v34  ;;  %5146 = vrcp.f32 %v3170_v54  ;;  %v2498_v0 = vpop.xlane.xlu1 %2497 }
 0x3e5   :  { %v4067_v38 = vmul.f32 -1.442695, %v2674_v35  ;;  %3793 = vst.msk [vmem:[%s7311_s7 + $0x2d8] sm:$0xff] %vm3701_vm4, %v3667_v36  ;;  %v2675_v40 = vadd.f32 %v6277_v44, %v2498_v0 }
 0x3e6   :  { %5148 = vrcp.f32 %v3171_v37 }
 0x3e7   :  { %v5139_v41 = vpop.eup %5138  ;;  %5150 = vpow2.f32 %v4067_v38  ;;  %v4068_v45 = vmul.f32 -1.442695, %v2675_v40 }
 0x3e8   :  { %v3543_v43 = vmul.f32 0.995, %v5139_v41 }
 0x3e9   :  { %v5141_v42 = vpop.eup %5140  ;;  %5152 = vpow2.f32 %v4068_v45 }
 0x3ea   :  { %v5143_v29 = vpop.eup %5142  ;;  %v3544_v46 = vmul.f32 0.995, %v5141_v42  ;;  %v3668_v47 = vadd.f32 0.005, %v3543_v43 }
 0x3eb   :  { %v3172_v48 = vadd.f32 1.0, %v5143_v29  ;;  %v2501_v49 = vpop.xlane.xlu0 %2500 }
 0x3ec   :  { %v3669_v60 = vadd.f32 0.005, %v3544_v46  ;;  %v2676_v12 = vadd.f32 %v6277_v44, %v2501_v49  ;;  %v5145_v50 = vpop.eup %5144  ;;  %3794 = vst.msk [vmem:[%s7311_s7 + $0x2e0] sm:$0xff] %vm3701_vm4, %v3668_v47 }
 0x3ed   :  { %5154 = vrcp.f32 %v3172_v48  ;;  %v3173_v52 = vadd.f32 1.0, %v5145_v50  ;;  %v2504_v53 = vpop.xlane.xlu1 %2503 }
 0x3ee   :  { %3795 = vst.msk [vmem:[%s7311_s7 + $0x2e8] sm:$0xff] %vm3701_vm4, %v3669_v60  ;;  %v4069_v51 = vmul.f32 -1.442695, %v2676_v12  ;;  %v2677_v56 = vadd.f32 %v6277_v44, %v2504_v53  ;;  %v5147_v9 = vpop.eup %5146 }
 0x3ef   :  { %5156 = vrcp.f32 %v3173_v52  ;;  %v3545_v58 = vmul.f32 0.995, %v5147_v9 }
 0x3f0   :  { %v5149_v57 = vpop.eup %5148  ;;  %5158 = vpow2.f32 %v4069_v51  ;;  %v4070_v59 = vmul.f32 -1.442695, %v2677_v56 }
 0x3f1   :  { %v5151_v61 = vpop.eup %5150  ;;  %v3546_v63 = vmul.f32 0.995, %v5149_v57  ;;  %v3670_v1 = vadd.f32 0.005, %v3545_v58 }
 0x3f2   :  { %v3174_v2 = vadd.f32 1.0, %v5151_v61  ;;  %5160 = vpow2.f32 %v4070_v59 }
 0x3f3   :  { %v2507_v15 = vpop.xlane.xlu0 %2506  ;;  %v3671_v55 = vadd.f32 0.005, %v3546_v63  ;;  %v5153_v5 = vpop.eup %5152  ;;  %3796 = vst.msk [vmem:[%s7311_s7 + $0x2f0] sm:$0xff] %vm3701_vm4, %v3670_v1 }
 0x3f4   :  { %v2678_v4 = vadd.f32 %v6277_v44, %v2507_v15  ;;  %5162 = vrcp.f32 %v3174_v2  ;;  %v3175_v6 = vadd.f32 1.0, %v5153_v5 }
 0x3f5   :  { %3797 = vst.msk [vmem:[%s7311_s7 + $0x2f8] sm:$0xff] %vm3701_vm4, %v3671_v55 }
 0x3f6   :  { %v4071_v7 = vmul.f32 -1.442695, %v2678_v4  ;;  %v2510_v8 = vpop.xlane.xlu1 %2509  ;;  %5164 = vrcp.f32 %v3175_v6 }
 0x3f7   :  { %v5155_v10 = vpop.eup %5154  ;;  %v2679_v11 = vadd.f32 %v6277_v44, %v2510_v8 }
 0x3f8   :  { %v3547_v13 = vmul.f32 0.995, %v5155_v10  ;;  %5166 = vpow2.f32 %v4071_v7 }
 0x3f9   :  { %v4072_v14 = vmul.f32 -1.442695, %v2679_v11  ;;  %v5157_v16 = vpop.eup %5156 }
 0x3fa   :  { %v3672_v39 = vadd.f32 0.005, %v3547_v13  ;;  %v5159_v17 = vpop.eup %5158  ;;  %v3548_v18 = vmul.f32 0.995, %v5157_v16 }
 0x3fb   :  { %5168 = vpow2.f32 %v4072_v14  ;;  %v2513_v19 = vpop.xlane.xlu0 %2512  ;;  %v3176_v20 = vadd.f32 1.0, %v5159_v17 }
 0x3fc   :  { %3798 = vst.msk [vmem:[%s7311_s7 + $0x300] sm:$0xff] %vm3701_vm4, %v3672_v39  ;;  %v2680_v21 = vadd.f32 %v6277_v44, %v2513_v19  ;;  %v5161_v22 = vpop.eup %5160  ;;  %v3673_v23 = vadd.f32 0.005, %v3548_v18 }
 0x3fd   :  { %5170 = vrcp.f32 %v3176_v20  ;;  %v3177_v24 = vadd.f32 1.0, %v5161_v22  ;;  %v2516_v25 = vpop.xlane.xlu1 %2515 }
 0x3fe   :  { %v4073_v62 = vmul.f32 -1.442695, %v2680_v21  ;;  %v5163_v26 = vpop.eup %5162  ;;  %3799 = vst.msk [vmem:[%s7311_s7 + $0x308] sm:$0xff] %vm3701_vm4, %v3673_v23  ;;  %v2681_v27 = vadd.f32 %v6277_v44, %v2516_v25 }
 0x3ff   :  { %v3549_v28 = vmul.f32 0.995, %v5163_v26  ;;  %5172 = vrcp.f32 %v3177_v24 }
 0x400   :  { %5174 = vpow2.f32 %v4073_v62  ;;  %v4074_v30 = vmul.f32 -1.442695, %v2681_v27  ;;  %v5165_v3 = vpop.eup %5164 }
 0x401   :  { %v3674_v31 = vadd.f32 0.005, %v3549_v28  ;;  %v3550_v33 = vmul.f32 0.995, %v5165_v3 }
 0x402   :  { %v5167_v32 = vpop.eup %5166  ;;  %5176 = vpow2.f32 %v4074_v30 }
 0x403   :  { %v2519_v34 = vpop.xlane.xlu0 %2518  ;;  %3800 = vst.msk [vmem:[%s7311_s7 + $0x310] sm:$0xff] %vm3701_vm4, %v3674_v31  ;;  %v3178_v54 = vadd.f32 1.0, %v5167_v32  ;;  %v3675_v37 = vadd.f32 0.005, %v3550_v33 }
 0x404   :  { %v2682_v35 = vadd.f32 %v6277_v44, %v2519_v34 }
 0x405   :  { %v5169_v36 = vpop.eup %5168  ;;  %5178 = vrcp.f32 %v3178_v54  ;;  %3801 = vst.msk [vmem:[%s7311_s7 + $0x318] sm:$0xff] %vm3701_vm4, %v3675_v37 }
 0x406   :  { %v3179_v38 = vadd.f32 1.0, %v5169_v36  ;;  %v4075_v0 = vmul.f32 -1.442695, %v2682_v35  ;;  %v2522_v40 = vpop.xlane.xlu1 %2521 }
 0x407   :  { %v2683_v41 = vadd.f32 %v6277_v44, %v2522_v40  ;;  %v5171_v42 = vpop.eup %5170 }
 0x408   :  { %5180 = vrcp.f32 %v3179_v38  ;;  %v3551_v43 = vmul.f32 0.995, %v5171_v42 }
 0x409   :  { %5182 = vpow2.f32 %v4075_v0  ;;  %v4076_v45 = vmul.f32 -1.442695, %v2683_v41  ;;  %v5173_v29 = vpop.eup %5172 }
 0x40a   :  { %v5175_v46 = vpop.eup %5174  ;;  %v3676_v47 = vadd.f32 0.005, %v3551_v43  ;;  %v3552_v48 = vmul.f32 0.995, %v5173_v29 }
 0x40b   :  { %5184 = vpow2.f32 %v4076_v45  ;;  %v2525_v49 = vpop.xlane.xlu0 %2524  ;;  %v3180_v60 = vadd.f32 1.0, %v5175_v46 }
 0x40c   :  { %v2684_v12 = vadd.f32 %v6277_v44, %v2525_v49  ;;  %v5177_v50 = vpop.eup %5176  ;;  %3802 = vst.msk [vmem:[%s7311_s7 + $0x320] sm:$0xff] %vm3701_vm4, %v3676_v47  ;;  %v3677_v52 = vadd.f32 0.005, %v3552_v48 }
 0x40d   :  { %5186 = vrcp.f32 %v3180_v60  ;;  %v3181_v51 = vadd.f32 1.0, %v5177_v50  ;;  %v2528_v56 = vpop.xlane.xlu1 %2527 }
 0x40e   :  { %v4077_v53 = vmul.f32 -1.442695, %v2684_v12  ;;  %3803 = vst.msk [vmem:[%s7311_s7 + $0x328] sm:$0xff] %vm3701_vm4, %v3677_v52  ;;  %v2685_v9 = vadd.f32 %v6277_v44, %v2528_v56 }
 0x40f   :  { %v5179_v57 = vpop.eup %5178  ;;  %5188 = vrcp.f32 %v3181_v51 }
 0x410   :  { %v3553_v58 = vmul.f32 0.995, %v5179_v57  ;;  %5190 = vpow2.f32 %v4077_v53  ;;  %v4078_v59 = vmul.f32 -1.442695, %v2685_v9 }
 0x412   :  { %v5181_v61 = vpop.eup %5180  ;;  %v3678_v1 = vadd.f32 0.005, %v3553_v58  ;;  %5192 = vpow2.f32 %v4078_v59 }
 0x413   :  { %v5183_v63 = vpop.eup %5182  ;;  %v3554_v2 = vmul.f32 0.995, %v5181_v61  ;;  %v2531_v15 = vpop.xlane.xlu0 %2530 }
 0x414   :  { %v3182_v55 = vadd.f32 1.0, %v5183_v63  ;;  %v2686_v4 = vadd.f32 %v6277_v44, %v2531_v15  ;;  %3804 = vst.msk [vmem:[%s7311_s7 + $0x330] sm:$0xff] %vm3701_vm4, %v3678_v1 }
 0x415   :  { %v5185_v5 = vpop.eup %5184  ;;  %v3679_v6 = vadd.f32 0.005, %v3554_v2  ;;  %v2534_v10 = vpop.xlane.xlu1 %2533 }
 0x416   :  { %5194 = vrcp.f32 %v3182_v55  ;;  %v3183_v7 = vadd.f32 1.0, %v5185_v5  ;;  %v4079_v8 = vmul.f32 -1.442695, %v2686_v4  ;;  %v2687_v11 = vadd.f32 %v6277_v44, %v2534_v10 }
 0x417   :  { %3805 = vst.msk [vmem:[%s7311_s7 + $0x338] sm:$0xff] %vm3701_vm4, %v3679_v6  ;;  %v5187_v13 = vpop.eup %5186 }
 0x418   :  { %5196 = vrcp.f32 %v3183_v7  ;;  %v3555_v14 = vmul.f32 0.995, %v5187_v13  ;;  %v4080_v16 = vmul.f32 -1.442695, %v2687_v11 }
 0x419   :  { %5198 = vpow2.f32 %v4079_v8  ;;  %v5189_v39 = vpop.eup %5188 }
 0x41a   :  { %v5191_v17 = vpop.eup %5190  ;;  %v3680_v18 = vadd.f32 0.005, %v3555_v14  ;;  %v3556_v19 = vmul.f32 0.995, %v5189_v39  ;;  %5200 = vpow2.f32 %v4080_v16 }
 0x41b   :  { %v2537_v20 = vpop.xlane.xlu0 %2536  ;;  %v3184_v21 = vadd.f32 1.0, %v5191_v17 }
 0x41c   :  { %v2688_v22 = vadd.f32 %v6277_v44, %v2537_v20  ;;  %v5193_v23 = vpop.eup %5192  ;;  %3806 = vst.msk [vmem:[%s7311_s7 + $0x340] sm:$0xff] %vm3701_vm4, %v3680_v18  ;;  %v3681_v24 = vadd.f32 0.005, %v3556_v19 }
 0x41d   :  { %5202 = vrcp.f32 %v3184_v21  ;;  %v3185_v62 = vadd.f32 1.0, %v5193_v23  ;;  %v2540_v26 = vpop.xlane.xlu1 %2539 }
 0x41e   :  { %v4081_v25 = vmul.f32 -1.442695, %v2688_v22  ;;  %3807 = vst.msk [vmem:[%s7311_s7 + $0x348] sm:$0xff] %vm3701_vm4, %v3681_v24  ;;  %v2689_v27 = vadd.f32 %v6277_v44, %v2540_v26 }
 0x41f   :  { %5204 = vrcp.f32 %v3185_v62 }
 0x420   :  { %v5195_v28 = vpop.eup %5194  ;;  %5206 = vpow2.f32 %v4081_v25  ;;  %v4082_v3 = vmul.f32 -1.442695, %v2689_v27 }
 0x421   :  { %v3557_v30 = vmul.f32 0.995, %v5195_v28 }
 0x422   :  { %v5197_v31 = vpop.eup %5196  ;;  %5208 = vpow2.f32 %v4082_v3 }
 0x423   :  { %v5199_v32 = vpop.eup %5198  ;;  %v3682_v33 = vadd.f32 0.005, %v3557_v30  ;;  %v3558_v34 = vmul.f32 0.995, %v5197_v31  ;;  %v2543_v54 = vpop.xlane.xlu0 %2542 }
 0x424   :  { %v3186_v35 = vadd.f32 1.0, %v5199_v32  ;;  %v2690_v36 = vadd.f32 %v6277_v44, %v2543_v54  ;;  %v5201_v37 = vpop.eup %5200 }
 0x425   :  { %3808 = vst.msk [vmem:[%s7311_s7 + $0x350] sm:$0xff] %vm3701_vm4, %v3682_v33  ;;  %v3683_v38 = vadd.f32 0.005, %v3558_v34  ;;  %v3187_v0 = vadd.f32 1.0, %v5201_v37  ;;  %v2546_v41 = vpop.xlane.xlu1 %2545 }
 0x426   :  { %5210 = vrcp.f32 %v3186_v35  ;;  %v4083_v40 = vmul.f32 -1.442695, %v2690_v36  ;;  %v2691_v42 = vadd.f32 %v6277_v44, %v2546_v41 }
 0x427   :  { %3809 = vst.msk [vmem:[%s7311_s7 + $0x358] sm:$0xff] %vm3701_vm4, %v3683_v38  ;;  %v5203_v43 = vpop.eup %5202  ;;  %5212 = vrcp.f32 %v3187_v0 }
 0x428   :  { %v3559_v45 = vmul.f32 0.995, %v5203_v43  ;;  %5214 = vpow2.f32 %v4083_v40  ;;  %v4084_v29 = vmul.f32 -1.442695, %v2691_v42 }
 0x429   :  { %v5205_v46 = vpop.eup %5204 }
 0x42a   :  { %v5207_v47 = vpop.eup %5206  ;;  %v3684_v48 = vadd.f32 0.005, %v3559_v45  ;;  %v3560_v49 = vmul.f32 0.995, %v5205_v46  ;;  %5216 = vpow2.f32 %v4084_v29 }
 0x42b   :  { %v2549_v60 = vpop.xlane.xlu0 %2548  ;;  %v3188_v12 = vadd.f32 1.0, %v5207_v47 }
 0x42c   :  { %v2692_v50 = vadd.f32 %v6277_v44, %v2549_v60  ;;  %v5209_v52 = vpop.eup %5208  ;;  %3810 = vst.msk [vmem:[%s7311_s7 + $0x360] sm:$0xff] %vm3701_vm4, %v3684_v48  ;;  %v3685_v51 = vadd.f32 0.005, %v3560_v49 }
 0x42d   :  { %5218 = vrcp.f32 %v3188_v12  ;;  %v3189_v53 = vadd.f32 1.0, %v5209_v52  ;;  %v2552_v9 = vpop.xlane.xlu1 %2551 }
 0x42e   :  { %v4085_v56 = vmul.f32 -1.442695, %v2692_v50  ;;  %3811 = vst.msk [vmem:[%s7311_s7 + $0x368] sm:$0xff] %vm3701_vm4, %v3685_v51  ;;  %v2693_v57 = vadd.f32 %v6277_v44, %v2552_v9 }
 0x42f   :  { %5220 = vrcp.f32 %v3189_v53 }
 0x430   :  { %v5211_v58 = vpop.eup %5210  ;;  %5222 = vpow2.f32 %v4085_v56  ;;  %v4086_v61 = vmul.f32 -1.442695, %v2693_v57 }
 0x431   :  { %v3561_v59 = vmul.f32 0.995, %v5211_v58  ;;  %v5213_v63 = vpop.eup %5212 }
 0x432   :  { %v5215_v1 = vpop.eup %5214  ;;  %v3562_v15 = vmul.f32 0.995, %v5213_v63  ;;  %5224 = vpow2.f32 %v4086_v61 }
 0x433   :  { %v3686_v2 = vadd.f32 0.005, %v3561_v59  ;;  %v2555_v55 = vpop.xlane.xlu0 %2554  ;;  %v3190_v4 = vadd.f32 1.0, %v5215_v1 }
 0x434   :  { %v2694_v5 = vadd.f32 %v6277_v44, %v2555_v55  ;;  %v5217_v6 = vpop.eup %5216  ;;  %v3687_v7 = vadd.f32 0.005, %v3562_v15 }
 0x435   :  { %3812 = vst.msk [vmem:[%s7311_s7 + $0x370] sm:$0xff] %vm3701_vm4, %v3686_v2  ;;  %5226 = vrcp.f32 %v3190_v4  ;;  %v3191_v8 = vadd.f32 1.0, %v5217_v6  ;;  %v2558_v11 = vpop.xlane.xlu1 %2557 }
 0x436   :  { %v4087_v10 = vmul.f32 -1.442695, %v2694_v5  ;;  %3813 = vst.msk [vmem:[%s7311_s7 + $0x378] sm:$0xff] %vm3701_vm4, %v3687_v7  ;;  %v2695_v13 = vadd.f32 %v6277_v44, %v2558_v11 }
 0x437   :  { %v5219_v14 = vpop.eup %5218  ;;  %5228 = vrcp.f32 %v3191_v8 }
 0x438   :  { %v3563_v16 = vmul.f32 0.995, %v5219_v14  ;;  %5230 = vpow2.f32 %v4087_v10  ;;  %v4088_v39 = vmul.f32 -1.442695, %v2695_v13 }
 0x439   :  { %v5221_v17 = vpop.eup %5220 }
 0x43a   :  { %v5223_v18 = vpop.eup %5222  ;;  %v3688_v19 = vadd.f32 0.005, %v3563_v16  ;;  %v3564_v20 = vmul.f32 0.995, %v5221_v17  ;;  %5232 = vpow2.f32 %v4088_v39 }
 0x43b   :  { %v2561_v21 = vpop.xlane.xlu0 %2560  ;;  %v3192_v22 = vadd.f32 1.0, %v5223_v18 }
 0x43c   :  { %v2696_v23 = vadd.f32 %v6277_v44, %v2561_v21  ;;  %v5225_v24 = vpop.eup %5224  ;;  %3814 = vst.msk [vmem:[%s7311_s7 + $0x380] sm:$0xff] %vm3701_vm4, %v3688_v19  ;;  %v3689_v62 = vadd.f32 0.005, %v3564_v20 }
 0x43d   :  { %5234 = vrcp.f32 %v3192_v22  ;;  %v3193_v25 = vadd.f32 1.0, %v5225_v24  ;;  %v2564_v27 = vpop.xlane.xlu1 %2563 }
 0x43e   :  { %v4089_v26 = vmul.f32 -1.442695, %v2696_v23  ;;  %3815 = vst.msk [vmem:[%s7311_s7 + $0x388] sm:$0xff] %vm3701_vm4, %v3689_v62  ;;  %v2697_v28 = vadd.f32 %v6277_v44, %v2564_v27 }
 0x43f   :  { %v5227_v30 = vpop.eup %5226  ;;  %5236 = vrcp.f32 %v3193_v25 }
 0x440   :  { %v3565_v3 = vmul.f32 0.995, %v5227_v30  ;;  %5238 = vpow2.f32 %v4089_v26  ;;  %v4090_v31 = vmul.f32 -1.442695, %v2697_v28 }
 0x441   :  { %v5229_v32 = vpop.eup %5228 }
 0x442   :  { %v5231_v33 = vpop.eup %5230  ;;  %v3690_v34 = vadd.f32 0.005, %v3565_v3  ;;  %v3566_v54 = vmul.f32 0.995, %v5229_v32  ;;  %5240 = vpow2.f32 %v4090_v31 }
 0x443   :  { %v2567_v35 = vpop.xlane.xlu0 %2566  ;;  %v3194_v36 = vadd.f32 1.0, %v5231_v33 }
 0x444   :  { %v2698_v37 = vadd.f32 %v6277_v44, %v2567_v35  ;;  %v5233_v38 = vpop.eup %5232  ;;  %3816 = vst.msk [vmem:[%s7311_s7 + $0x390] sm:$0xff] %vm3701_vm4, %v3690_v34  ;;  %v3691_v0 = vadd.f32 0.005, %v3566_v54 }
 0x445   :  { %5242 = vrcp.f32 %v3194_v36  ;;  %v3195_v40 = vadd.f32 1.0, %v5233_v38  ;;  %v2570_v42 = vpop.xlane.xlu1 %2569 }
 0x446   :  { %v4091_v41 = vmul.f32 -1.442695, %v2698_v37  ;;  %3817 = vst.msk [vmem:[%s7311_s7 + $0x398] sm:$0xff] %vm3701_vm4, %v3691_v0  ;;  %v2699_v43 = vadd.f32 %v6277_v44, %v2570_v42 }
 0x447   :  { %v5235_v45 = vpop.eup %5234  ;;  %5244 = vrcp.f32 %v3195_v40 }
 0x448   :  { %v3567_v29 = vmul.f32 0.995, %v5235_v45  ;;  %5246 = vpow2.f32 %v4091_v41  ;;  %v4092_v46 = vmul.f32 -1.442695, %v2699_v43 }
 0x449   :  { %v5237_v47 = vpop.eup %5236 }
 0x44a   :  { %v5239_v48 = vpop.eup %5238  ;;  %v3692_v49 = vadd.f32 0.005, %v3567_v29  ;;  %v3568_v60 = vmul.f32 0.995, %v5237_v47  ;;  %5248 = vpow2.f32 %v4092_v46 }
 0x44b   :  { %v2573_v12 = vpop.xlane.xlu0 %2572  ;;  %v3196_v50 = vadd.f32 1.0, %v5239_v48 }
 0x44c   :  { %v2700_v52 = vadd.f32 %v6277_v44, %v2573_v12  ;;  %v5241_v51 = vpop.eup %5240  ;;  %3818 = vst.msk [vmem:[%s7311_s7 + $0x3a0] sm:$0xff] %vm3701_vm4, %v3692_v49  ;;  %v3693_v53 = vadd.f32 0.005, %v3568_v60 }
 0x44d   :  { %5250 = vrcp.f32 %v3196_v50  ;;  %v3197_v56 = vadd.f32 1.0, %v5241_v51 }
 0x44e   :  { %v4093_v9 = vmul.f32 -1.442695, %v2700_v52  ;;  %3819 = vst.msk [vmem:[%s7311_s7 + $0x3a8] sm:$0xff] %vm3701_vm4, %v3693_v53 }
 0x44f   :  { %v5243_v57 = vpop.eup %5242  ;;  %5252 = vrcp.f32 %v3197_v56 }
 0x450   :  { %v3569_v58 = vmul.f32 0.995, %v5243_v57  ;;  %5254 = vpow2.f32 %v4093_v9 }
 0x451   :  { %v5245_v44 = vpop.eup %5244 }
 0x452   :  { %v5247_v59 = vpop.eup %5246  ;;  %v3694_v61 = vadd.f32 0.005, %v3569_v58  ;;  %v3570_v63 = vmul.f32 0.995, %v5245_v44 }
 0x453   :  { %v3198_v1 = vadd.f32 1.0, %v5247_v59 }
 0x454   :  { %v5249_v2 = vpop.eup %5248  ;;  %3820 = vst.msk [vmem:[%s7311_s7 + $0x3b0] sm:$0xff] %vm3701_vm4, %v3694_v61  ;;  %v3695_v15 = vadd.f32 0.005, %v3570_v63 }
 0x455   :  { %5256 = vrcp.f32 %v3198_v1  ;;  %v3199_v55 = vadd.f32 1.0, %v5249_v2 }
 0x456   :  { %3821 = vst.msk [vmem:[%s7311_s7 + $0x3b8] sm:$0xff] %vm3701_vm4, %v3695_v15 }
 0x457   :  { %v5251_v4 = vpop.eup %5250  ;;  %5258 = vrcp.f32 %v3199_v55 }
 0x458   :  { %v3571_v5 = vmul.f32 0.995, %v5251_v4 }
 0x459   :  { %v5253_v6 = vpop.eup %5252 }
 0x45a   :  { %v5255_v7 = vpop.eup %5254  ;;  %v3696_v8 = vadd.f32 0.005, %v3571_v5  ;;  %v3572_v10 = vmul.f32 0.995, %v5253_v6 }
 0x45b   :  { %v3200_v11 = vadd.f32 1.0, %v5255_v7 }
 0x45c   :  { %3822 = vst.msk [vmem:[%s7311_s7 + $0x3c0] sm:$0xff] %vm3701_vm4, %v3696_v8  ;;  %v3697_v13 = vadd.f32 0.005, %v3572_v10 }
 0x45d   :  { %5260 = vrcp.f32 %v3200_v11 }
 0x45e   :  { %3823 = vst.msk [vmem:[%s7311_s7 + $0x3c8] sm:$0xff] %vm3701_vm4, %v3697_v13 }
 0x45f   :  { %v5257_v14 = vpop.eup %5256 }
 0x460   :  { %v3573_v16 = vmul.f32 0.995, %v5257_v14 }
 0x461   :  { %v5259_v39 = vpop.eup %5258 }
 0x462   :  { %v3698_v17 = vadd.f32 0.005, %v3573_v16  ;;  %v3574_v18 = vmul.f32 0.995, %v5259_v39 }
 0x464   :  { %3824 = vst.msk [vmem:[%s7311_s7 + $0x3d0] sm:$0xff] %vm3701_vm4, %v3698_v17  ;;  %v3699_v19 = vadd.f32 0.005, %v3574_v18 }
 0x466   :  { %3825 = vst.msk [vmem:[%s7311_s7 + $0x3d8] sm:$0xff] %vm3701_vm4, %v3699_v19 }
 0x467   :  { %v5261_v20 = vpop.eup %5260 }
 0x468   :  { %v3575_v21 = vmul.f32 0.995, %v5261_v20 }
 0x46a   :  { %v3700_v22 = vadd.f32 0.005, %v3575_v21 }
 0x46c   :  { %3826 = vst.msk [vmem:[%s7311_s7 + $0x3e0] sm:$0xff] %vm3701_vm4, %v3700_v22 }

</bundles_post_ra>
